<compile_context>
chip_gen: v7x
topology: tpu7x:2x2x1
jax: 0.10.0
libtpu: 0.0.40
codegen_flags: <defaults>
</compile_context>

<pallas_src>
import functools

import jax
import jax.numpy as jnp
from jax import lax
from jax.experimental import pallas as pl
from jax.experimental.pallas import tpu as pltpu


def _default_bisect_dtype():
    """bf16 bisection only where the VPU has native bf16 (v6e / v7x)."""
    try:
        kind = jax.devices()[0].device_kind.lower()
    except Exception:
        return jnp.float32
    if "v6" in kind or "v7" in kind or "7x" in kind:
        return jnp.bfloat16
    return jnp.float32


def _sparsemax_last(z, *, n_iters, work_dtype=jnp.float32, n_refine=2):
    """Exact sparsemax along the last axis, sort-free and O(N) per row.

    Operates on max-shifted values zs = z - max(z) in (-inf, 0] (sparsemax is
    shift-invariant).  The bisection bracket is the constant [-1, 0]; the
    midpoint is always strictly < 0 == max(zs), so even a low-precision
    (bf16) work copy can never yield an empty support.  A closed-form
    refinement (tau <- (sum_{zs>=tau} zs - 1)/|{zs>=tau}|), run n_refine times
    in f32, makes the final threshold exact for the identified support.
    """
    z_max = jnp.max(z, axis=-1, keepdims=True)          # f32
    zs = z - z_max                                       # f32, (-inf, 0]
    zw = zs.astype(work_dtype)                           # bisection work copy

    half = jnp.asarray(0.5, work_dtype)
    zero = jnp.asarray(0.0, work_dtype)
    lo = jnp.full(z_max.shape, -1.0, work_dtype)
    hi = jnp.zeros(z_max.shape, work_dtype)

    def body(_, carry):
        lo, hi = carry
        mid = half * (lo + hi)
        # Elementwise work in work_dtype (bf16 on v6e/v7x); row-sum in f32.
        g = jnp.sum(jnp.maximum(zw - mid, zero).astype(jnp.float32),
                    axis=-1, keepdims=True)
        above = g >= 1.0
        return jnp.where(above, mid, lo), jnp.where(above, hi, mid)

    lo, hi = lax.fori_loop(0, n_iters, body, (lo, hi), unroll=True)
    tau = (half * (lo + hi)).astype(jnp.float32)         # strictly < 0

    # Exact f32 refinement on the identified support; tau stays < 0 so the
    # support always contains the row maximum (never empty).
    for _ in range(n_refine):
        supp = (zs >= tau).astype(jnp.float32)
        k = jnp.maximum(jnp.sum(supp, axis=-1, keepdims=True), 1.0)
        s = jnp.sum(zs * supp, axis=-1, keepdims=True)
        tau = (s - 1.0) / k
    return jnp.maximum(zs - tau, 0.0)


def _cross_attn_kernel(*refs, num_heads, depth, has_mask, return_att,
                       n_iters, bisect_dtype):
    i = 0
    ctx_ref = refs[i]; i += 1          # [1, tq, E]   bf16
    img_ref = refs[i]; i += 1          # [1, Nk, E]   bf16
    if has_mask:
        mask_ref = refs[i]; i += 1     # [1, tq, Nk]  int8 (nonzero => masked)
    else:
        mask_ref = None
    wq_ref = refs[i]; i += 1           # [E, E]   bf16 (pre-scaled by emb_dim**-0.5)
    wkv_ref = refs[i]; i += 1          # [E, 2E]  bf16 (K | V fused)
    bq_ref = refs[i]; i += 1           # [1, E]   f32  (pre-scaled)
    bkv_ref = refs[i]; i += 1          # [1, 2E]  f32
    out_ref = refs[i]; i += 1          # [1, tq, E] f32
    if return_att:
        att_ref = refs[i]; i += 1      # [1, H, tq, Nk] (bf16 by default)
    else:
        att_ref = None
    kv_ref = refs[i]; i += 1           # [Nk, 2E] bf16 scratch (persists across q-tiles)
    logits_ref = refs[i]; i += 1       # [H, tq, Nk] f32 scratch

    E = num_heads * depth

    # ---- K|V projection: only on the first q-tile of each batch; the result
    # lives in VMEM scratch for all later q-tiles of this batch. ----
    @pl.when(pl.program_id(1) == 0)
    def _():
        kv = jnp.dot(img_ref[0], wkv_ref[...],
                     preferred_element_type=jnp.float32) + bkv_ref[...]
        kv_ref[...] = kv.astype(jnp.bfloat16)

    # ---- Q projection for this q-tile (scale pre-folded into wq/bq). ----
    q = jnp.dot(ctx_ref[0], wq_ref[...],
                preferred_element_type=jnp.float32) + bq_ref[...]
    q = q.astype(jnp.bfloat16)         # [tq, E]

    if has_mask:
        masked = mask_ref[0] != 0      # [tq, Nk], computed once for all heads

    # ---- Per-head Q@K^T straight into the [H, tq, Nk] logits scratch.
    # Static head slices; no stack/concat relayout copies. ----
    for h in range(num_heads):
        qh = q[:, h * depth:(h + 1) * depth]              # [tq, D] bf16
        kh = kv_ref[:, h * depth:(h + 1) * depth]         # [Nk, D] bf16
        lh = lax.dot_general(qh, kh, (((1,), (1,)), ((), ())),
                             preferred_element_type=jnp.float32)   # [tq, Nk]
        if has_mask:
            lh = jnp.where(masked, -1000000000.0, lh)
        logits_ref[h] = lh

    logits = logits_ref[...]                              # [H, tq, Nk] f32
    p = _sparsemax_last(logits, n_iters=n_iters, work_dtype=bisect_dtype)

    if return_att:
        att_ref[0] = p.astype(att_ref.dtype)              # single block store

    p_bf = p.astype(jnp.bfloat16)

    # ---- Per-head P@V, stored directly into the head's lane slice of out. ----
    for h in range(num_heads):
        vh = kv_ref[:, E + h * depth:E + (h + 1) * depth]  # [Nk, D] bf16
        oh = jnp.dot(p_bf[h], vh, preferred_element_type=jnp.float32)
        out_ref[0, :, h * depth:(h + 1) * depth] = oh.astype(out_ref.dtype)


def _pick_block_q(Nq, Nk, E, H, att_itemsize, vmem_limit):
    """Largest q-tile whose rough per-step working set fits the VMEM budget."""
    if Nq <= 128:
        return Nq
    fixed = (Nk * 2 * E * 2            # bf16 K|V scratch (persistent)
             + 2 * Nk * E * 2          # double-buffered img block
             + 2 * 3 * E * E * 2)      # double-buffered bf16 weights
    for bq in (256, 128, 64):
        if bq > Nq:
            continue
        ws = fixed
        ws += H * bq * Nk * 4                         # f32 logits scratch
        ws += H * bq * Nk * (4 + 2)                   # live p (f32) + bisection copy
        ws += 2 * H * bq * Nk * att_itemsize          # att out block (dbl-buffered)
        ws += 2 * bq * E * (2 + 4)                    # ctx in + out blocks
        if ws <= vmem_limit * 2 // 3:
            return bq
    return min(Nq, 64)


def cross_multi_attention(context, img, params, num_heads, pad_mask=None,
                          block_q=None, return_attention=True,
                          att_dtype=jnp.bfloat16, bisect_dtype=None):
    """JAX/Pallas equivalent of Cross_MultiAttention.forward(context, img, pad_mask)."""
    B, Nq, E = context.shape
    _, Nk, _ = img.shape
    assert E % num_heads == 0, "emb_dim must be divisible by num_heads"
    depth = E // num_heads
    scale = float(E) ** (-0.5)          # matches PyTorch: emb_dim ** -0.5

    if bisect_dtype is None:
        bisect_dtype = _default_bisect_dtype()
    f32_bisect = jnp.dtype(bisect_dtype) == jnp.dtype(jnp.float32)
    n_iters = 20 if f32_bisect else 14

    # PyTorch Linear: y = x @ W^T + b, W: [out, in].  Scale folded into Q path.
    wqT = (params["wq"].T * scale).astype(jnp.bfloat16)
    bq = (params["bq"] * scale).reshape(1, E).astype(jnp.float32)
    wkvT = jnp.concatenate([params["wk"].T, params["wv"].T], axis=1).astype(jnp.bfloat16)
    bkv = jnp.concatenate([params["bk"], params["bv"]]).reshape(1, 2 * E).astype(jnp.float32)

    ctx_bf = context.astype(jnp.bfloat16)
    img_bf = img.astype(jnp.bfloat16)

    has_mask = pad_mask is not None
    att_itemsize = jnp.dtype(att_dtype).itemsize if return_attention else 0

    # VMEM budget: query hardware (v5e/v6e 128 MiB, v7x 64 MiB per TC), keep headroom.
    try:
        vmem_limit = int(pltpu.get_tpu_info().vmem_capacity_bytes) * 3 // 4
    except Exception:
        vmem_limit = 64 * 1024 * 1024

    if block_q is None:
        block_q = _pick_block_q(Nq, Nk, E, num_heads, att_itemsize, vmem_limit)
    n_q = pl.cdiv(Nq, block_q)

    inputs = [ctx_bf, img_bf]
    in_specs = [
        pl.BlockSpec((1, block_q, E), lambda b, qi: (b, qi, 0)),   # context q-tile
        pl.BlockSpec((1, Nk, E), lambda b, qi: (b, 0, 0)),         # full img (re-fetched only per batch)
    ]
    if has_mask:
        # PyTorch pad_mask is [B, Nk, Nq]; permute last two dims (shared by all heads).
        mask = jnp.transpose(pad_mask, (0, 2, 1)).astype(jnp.int8)  # [B, Nq, Nk]
        inputs.append(mask)
        in_specs.append(pl.BlockSpec((1, block_q, Nk), lambda b, qi: (b, qi, 0)))
    inputs += [wqT, wkvT, bq, bkv]
    # TODO(synk): pl.Buffered(1) on these grid-invariant blocks would drop their
    # second pipeline buffer and free VMEM (matters most under v7x's 64 MiB cap).
    in_specs += [
        pl.BlockSpec((E, E), lambda b, qi: (0, 0)),
        pl.BlockSpec((E, 2 * E), lambda b, qi: (0, 0)),
        pl.BlockSpec((1, E), lambda b, qi: (0, 0)),
        pl.BlockSpec((1, 2 * E), lambda b, qi: (0, 0)),
    ]

    out_shapes = [jax.ShapeDtypeStruct((B, Nq, E), jnp.float32)]
    out_specs = [pl.BlockSpec((1, block_q, E), lambda b, qi: (b, qi, 0))]
    if return_attention:
        out_shapes.append(jax.ShapeDtypeStruct((B, num_heads, Nq, Nk), att_dtype))
        out_specs.append(pl.BlockSpec((1, num_heads, block_q, Nk),
                                      lambda b, qi: (b, 0, qi, 0)))

    scratch_shapes = [
        pltpu.VMEM((Nk, 2 * E), jnp.bfloat16),              # K|V, persists across q-tiles
        pltpu.VMEM((num_heads, block_q, Nk), jnp.float32),  # per-head logits
    ]

    # Advisory cost estimate so XLA schedules surrounding ops sensibly.
    flops = (2 * B * Nq * E * E                       # Q projection
             + 2 * B * Nk * E * (2 * E)               # fused K|V projection (per batch)
             + 4 * B * num_heads * Nq * Nk * depth    # QK^T + PV
             + (3 * n_iters + 10) * B * num_heads * Nq * Nk)  # sparsemax VPU/XLU work
    bytes_accessed = (ctx_bf.size * 2 + img_bf.size * 2
                      + (B * Nq * Nk if has_mask else 0)
                      + (E * E + E * 2 * E) * 2 + (E + 2 * E) * 4
                      + B * Nq * E * 4
                      + B * num_heads * Nq * Nk * att_itemsize)
    cost = pl.CostEstimate(flops=int(flops), transcendentals=0,
                           bytes_accessed=int(bytes_accessed))

    kernel = functools.partial(_cross_attn_kernel, num_heads=num_heads, depth=depth,
                               has_mask=has_mask, return_att=return_attention,
                               n_iters=n_iters, bisect_dtype=bisect_dtype)

    results = pl.pallas_call(
        kernel,
        out_shape=tuple(out_shapes),
        grid_spec=pltpu.PrefetchScalarGridSpec(
            num_scalar_prefetch=0,
            grid=(B, n_q),
            in_specs=in_specs,
            out_specs=out_specs,
            scratch_shapes=scratch_shapes,
        ),
        compiler_params=pltpu.CompilerParams(
            # batch axis parallel (v7x megacore sharding); q axis must stay
            # "arbitrary": the K|V scratch carries state across q-tiles.
            dimension_semantics=("parallel", "arbitrary"),
            vmem_limit_bytes=vmem_limit,
        ),
        cost_estimate=cost,
    )(*inputs)

    if return_attention:
        return results[0], results[1]
    return results[0], None


# ---------------- pure-JAX reference (sort-based sparsemax, f32) ----------------
def _sparsemax_ref(z):
    zs = jnp.sort(z, axis=-1)[..., ::-1]
    cs = jnp.cumsum(zs, axis=-1)
    rng = jnp.arange(1, z.shape[-1] + 1, dtype=z.dtype)
    cond = 1.0 + rng * zs > cs
    kz = jnp.sum(cond.astype(jnp.int32), axis=-1, keepdims=True)
    cs_k = jnp.take_along_axis(cs, kz - 1, axis=-1)
    tau = (cs_k - 1.0) / kz.astype(z.dtype)
    return jnp.maximum(z - tau, 0.0)


def _reference(context, img, params, num_heads, pad_mask=None):
    B, Nq, E = context.shape
    depth = E // num_heads
    scale = float(E) ** (-0.5)
    Q = context @ params["wq"].T + params["bq"]
    K = img @ params["wk"].T + params["bk"]
    V = img @ params["wv"].T + params["bv"]
    Q = Q.reshape(B, Nq, num_heads, depth).transpose(0, 2, 1, 3)
    K = K.reshape(B, -1, num_heads, depth).transpose(0, 2, 1, 3)
    V = V.reshape(B, -1, num_heads, depth).transpose(0, 2, 1, 3)
    att = jnp.einsum("bnid,bnjd->bnij", Q, K) * scale
    if pad_mask is not None:
        m = jnp.transpose(pad_mask, (0, 2, 1))[:, None]
        att = jnp.where(m, -1000000000.0, att)
    att = _sparsemax_ref(att)
    out = jnp.einsum("bnij,bnjd->bnid", att, V)
    out = out.transpose(0, 2, 1, 3).reshape(B, Nq, E)
    return out, att


if __name__ == "__main__":
    B = 2
    in_channels = 4          # only used by the (unused-in-forward) conv layers
    emb_dim = 32
    num_heads = 4
    seq_ctx = 8              # query length (context)
    seq_img = 16             # key/value length (img tokens)

    key = jax.random.PRNGKey(0)
    kc, ki, k1, k2, k3, k4, k5, k6, km = jax.random.split(key, 9)
    context = jax.random.normal(kc, (B, seq_ctx, emb_dim), jnp.float32)
    img = jax.random.normal(ki, (B, seq_img, emb_dim), jnp.float32)

    params = {
        "wq": jax.random.normal(k1, (emb_dim, emb_dim), jnp.float32) * 0.1,
        "wk": jax.random.normal(k2, (emb_dim, emb_dim), jnp.float32) * 0.1,
        "wv": jax.random.normal(k3, (emb_dim, emb_dim), jnp.float32) * 0.1,
        "bq": jax.random.normal(k4, (emb_dim,), jnp.float32) * 0.1,
        "bk": jax.random.normal(k5, (emb_dim,), jnp.float32) * 0.1,
        "bv": jax.random.normal(k6, (emb_dim,), jnp.float32) * 0.1,
    }
    # TODO(synk): proj_in / proj_out Conv2d params exist in __init__ but forward()
    # never calls them, so they are intentionally not instantiated here.

    # --- no-mask variant (no dense zero mask is DMA'd) ---
    out, att = cross_multi_attention(context, img, params, num_heads, pad_mask=None)
    out = jax.block_until_ready(out)
    att = jax.block_until_ready(att)
    out_ref, att_ref = _reference(context, img, params, num_heads, pad_mask=None)
    assert out.shape == (B, seq_ctx, emb_dim)
    assert att.shape == (B, num_heads, seq_ctx, seq_img)
    # bf16 MXU path + bf16 att output: compare against the f32 reference with a
    # bf16-level tolerance.
    assert jnp.allclose(out, out_ref, atol=5e-2, rtol=5e-2)
    assert jnp.allclose(att.astype(jnp.float32), att_ref, atol=5e-2, rtol=5e-2)

    # --- masked variant (pad_mask is [B, Nk, Nq] as in the PyTorch forward) ---
    pad_mask = jax.random.bernoulli(km, 0.3, (B, seq_img, seq_ctx))
    pad_mask = pad_mask.at[:, 0, :].set(False)   # keep >=1 live key per query row
    out_m, att_m = cross_multi_attention(context, img, params, num_heads, pad_mask=pad_mask)
    out_m = jax.block_until_ready(out_m)
    att_m = jax.block_until_ready(att_m)
    out_mr, att_mr = _reference(context, img, params, num_heads, pad_mask=pad_mask)
    assert jnp.allclose(out_m, out_mr, atol=5e-2, rtol=5e-2)
    assert jnp.allclose(att_m.astype(jnp.float32), att_mr, atol=5e-2, rtol=5e-2)

    print("KERNEL_OK")
</pallas_src>

<mosaic_0001>
module attributes {stable_mosaic.version = 11 : i64} {
  func.func @_cross_attn_kernel(%arg0: i32, %arg1: i32, %arg2: memref<1x8x32xbf16, #tpu.memory_space<vmem>>, %arg3: memref<1x16x32xbf16, #tpu.memory_space<vmem>>, %arg4: memref<32x32xbf16, #tpu.memory_space<vmem>>, %arg5: memref<32x64xbf16, #tpu.memory_space<vmem>>, %arg6: memref<1x32xf32, #tpu.memory_space<vmem>>, %arg7: memref<1x64xf32, #tpu.memory_space<vmem>>, %arg8: memref<1x8x32xf32, #tpu.memory_space<vmem>>, %arg9: memref<1x4x8x16xbf16, #tpu.memory_space<vmem>>, %arg10: memref<16x64xbf16, #tpu.memory_space<vmem>>, %arg11: memref<4x8x16xf32, #tpu.memory_space<vmem>>) attributes {dimension_semantics = [#tpu.dimension_semantics<parallel>, #tpu.dimension_semantics<arbitrary>], iteration_bounds = array<i64: 2, 1>, scalar_prefetch = 0 : i64, scratch_operands = 2 : i64, tpu.core_type = #tpu.core_type<tc>, window_params = [{transform_indices = @transform_0, window_bounds = array<i64: 1, 8, 32>}, {transform_indices = @transform_1, window_bounds = array<i64: 1, 16, 32>}, {pipeline_mode = #tpu.pipeline_mode<synchronous>, transform_indices = @transform_2, window_bounds = array<i64: 32, 32>}, {pipeline_mode = #tpu.pipeline_mode<synchronous>, transform_indices = @transform_3, window_bounds = array<i64: 32, 64>}, {pipeline_mode = #tpu.pipeline_mode<synchronous>, transform_indices = @transform_4, window_bounds = array<i64: 1, 32>}, {pipeline_mode = #tpu.pipeline_mode<synchronous>, transform_indices = @transform_5, window_bounds = array<i64: 1, 64>}, {transform_indices = @transform_6, window_bounds = array<i64: 1, 8, 32>}, {transform_indices = @transform_7, window_bounds = array<i64: 1, 4, 8, 16>}]} {
    %c0_i32 = arith.constant 0 : i32
    %0 = arith.cmpi eq, %arg1, %c0_i32 : i32
    %1 = arith.extui %0 : i1 to i32
    %c0_i32_0 = arith.constant 0 : i32
    %2 = arith.cmpi ne, %1, %c0_i32_0 : i32
    scf.if %2 {
      %c0_108 = arith.constant 0 : index
      %c0_109 = arith.constant 0 : index
      %c0_110 = arith.constant 0 : index
      %370 = vector.load %arg3[%c0_108, %c0_109, %c0_110] : memref<1x16x32xbf16, #tpu.memory_space<vmem>>, vector<1x16x32xbf16>
      %371 = vector.shape_cast %370 : vector<1x16x32xbf16> to vector<16x32xbf16>
      %c0_111 = arith.constant 0 : index
      %c0_112 = arith.constant 0 : index
      %372 = vector.load %arg5[%c0_111, %c0_112] : memref<32x64xbf16, #tpu.memory_space<vmem>>, vector<32x64xbf16>
      %cst_113 = arith.constant dense<0.000000e+00> : vector<16x64xf32>
      %373 = tpu.matmul %371, %372, %cst_113 {dimension_numbers = #tpu.dot_dimension_numbers<[1], [0], [0], [1], [0, 0, 1, 1], [], []>} : vector<16x32xbf16>, vector<32x64xbf16>, vector<16x64xf32> -> vector<16x64xf32>
      %c0_114 = arith.constant 0 : index
      %c0_115 = arith.constant 0 : index
      %374 = vector.load %arg7[%c0_114, %c0_115] : memref<1x64xf32, #tpu.memory_space<vmem>>, vector<1x64xf32>
      %375 = vector.broadcast %374 : vector<1x64xf32> to vector<16x64xf32>
      %376 = arith.addf %373, %375 : vector<16x64xf32>
      %377 = arith.truncf %376 : vector<16x64xf32> to vector<16x64xbf16>
      %c0_116 = arith.constant 0 : index
      %c0_117 = arith.constant 0 : index
      %378 = vector.load %arg10[%c0_116, %c0_117] : memref<16x64xbf16, #tpu.memory_space<vmem>>, vector<16x64xbf16>
      tpu.vector_store %arg10[%c0_116, %c0_117], %377 {strides = array<i32>} : memref<16x64xbf16, #tpu.memory_space<vmem>>, vector<16x64xbf16>,
    } else {
    }
    %c0 = arith.constant 0 : index
    %c0_1 = arith.constant 0 : index
    %c0_2 = arith.constant 0 : index
    %3 = vector.load %arg2[%c0, %c0_1, %c0_2] : memref<1x8x32xbf16, #tpu.memory_space<vmem>>, vector<1x8x32xbf16>
    %4 = vector.shape_cast %3 : vector<1x8x32xbf16> to vector<8x32xbf16>
    %c0_3 = arith.constant 0 : index
    %c0_4 = arith.constant 0 : index
    %5 = vector.load %arg4[%c0_3, %c0_4] : memref<32x32xbf16, #tpu.memory_space<vmem>>, vector<32x32xbf16>
    %cst = arith.constant dense<0.000000e+00> : vector<8x32xf32>
    %6 = tpu.matmul %4, %5, %cst {dimension_numbers = #tpu.dot_dimension_numbers<[1], [0], [0], [1], [0, 0, 1, 1], [], []>} : vector<8x32xbf16>, vector<32x32xbf16>, vector<8x32xf32> -> vector<8x32xf32>
    %c0_5 = arith.constant 0 : index
    %c0_6 = arith.constant 0 : index
    %7 = vector.load %arg6[%c0_5, %c0_6] : memref<1x32xf32, #tpu.memory_space<vmem>>, vector<1x32xf32>
    %8 = vector.broadcast %7 : vector<1x32xf32> to vector<8x32xf32>
    %9 = arith.addf %6, %8 : vector<8x32xf32>
    %10 = arith.truncf %9 : vector<8x32xf32> to vector<8x32xbf16>
    %11 = vector.extract_strided_slice %10 {offsets = [0, 0], sizes = [8, 8], strides = [1, 1]} : vector<8x32xbf16> to vector<8x8xbf16>
    %c0_7 = arith.constant 0 : index
    %c0_8 = arith.constant 0 : index
    %12 = vector.load %arg10[%c0_7, %c0_8] : memref<16x64xbf16, #tpu.memory_space<vmem>>, vector<16x8xbf16>
    %cst_9 = arith.constant dense<0.000000e+00> : vector<8x16xf32>
    %13 = tpu.matmul %11, %12, %cst_9 {dimension_numbers = #tpu.dot_dimension_numbers<[1], [1], [0], [0], [0, 0, 1, 0], [], []>} : vector<8x8xbf16>, vector<16x8xbf16>, vector<8x16xf32> -> vector<8x16xf32>
    %c0_10 = arith.constant 0 : index
    %c0_11 = arith.constant 0 : index
    %c0_12 = arith.constant 0 : index
    %14 = vector.load %arg11[%c0_10, %c0_11, %c0_12] : memref<4x8x16xf32, #tpu.memory_space<vmem>>, vector<1x8x16xf32>
    %15 = vector.shape_cast %14 : vector<1x8x16xf32> to vector<8x16xf32>
    %16 = vector.shape_cast %13 : vector<8x16xf32> to vector<1x8x16xf32>
    tpu.vector_store %arg11[%c0_10, %c0_11, %c0_12], %16 {strides = array<i32>} : memref<4x8x16xf32, #tpu.memory_space<vmem>>, vector<1x8x16xf32>,
    %17 = vector.extract_strided_slice %10 {offsets = [0, 8], sizes = [8, 8], strides = [1, 1]} : vector<8x32xbf16> to vector<8x8xbf16>
    %c0_13 = arith.constant 0 : index
    %c8 = arith.constant 8 : index
    %18 = vector.load %arg10[%c0_13, %c8] : memref<16x64xbf16, #tpu.memory_space<vmem>>, vector<16x8xbf16>
    %cst_14 = arith.constant dense<0.000000e+00> : vector<8x16xf32>
    %19 = tpu.matmul %17, %18, %cst_14 {dimension_numbers = #tpu.dot_dimension_numbers<[1], [1], [0], [0], [0, 0, 1, 0], [], []>} : vector<8x8xbf16>, vector<16x8xbf16>, vector<8x16xf32> -> vector<8x16xf32>
    %c1 = arith.constant 1 : index
    %c0_15 = arith.constant 0 : index
    %c0_16 = arith.constant 0 : index
    %20 = vector.load %arg11[%c1, %c0_15, %c0_16] : memref<4x8x16xf32, #tpu.memory_space<vmem>>, vector<1x8x16xf32>
    %21 = vector.shape_cast %20 : vector<1x8x16xf32> to vector<8x16xf32>
    %22 = vector.shape_cast %19 : vector<8x16xf32> to vector<1x8x16xf32>
    tpu.vector_store %arg11[%c1, %c0_15, %c0_16], %22 {strides = array<i32>} : memref<4x8x16xf32, #tpu.memory_space<vmem>>, vector<1x8x16xf32>,
    %23 = vector.extract_strided_slice %10 {offsets = [0, 16], sizes = [8, 8], strides = [1, 1]} : vector<8x32xbf16> to vector<8x8xbf16>
    %c0_17 = arith.constant 0 : index
    %c16 = arith.constant 16 : index
    %24 = vector.load %arg10[%c0_17, %c16] : memref<16x64xbf16, #tpu.memory_space<vmem>>, vector<16x8xbf16>
    %cst_18 = arith.constant dense<0.000000e+00> : vector<8x16xf32>
    %25 = tpu.matmul %23, %24, %cst_18 {dimension_numbers = #tpu.dot_dimension_numbers<[1], [1], [0], [0], [0, 0, 1, 0], [], []>} : vector<8x8xbf16>, vector<16x8xbf16>, vector<8x16xf32> -> vector<8x16xf32>
    %c2 = arith.constant 2 : index
    %c0_19 = arith.constant 0 : index
    %c0_20 = arith.constant 0 : index
    %26 = vector.load %arg11[%c2, %c0_19, %c0_20] : memref<4x8x16xf32, #tpu.memory_space<vmem>>, vector<1x8x16xf32>
    %27 = vector.shape_cast %26 : vector<1x8x16xf32> to vector<8x16xf32>
    %28 = vector.shape_cast %25 : vector<8x16xf32> to vector<1x8x16xf32>
    tpu.vector_store %arg11[%c2, %c0_19, %c0_20], %28 {strides = array<i32>} : memref<4x8x16xf32, #tpu.memory_space<vmem>>, vector<1x8x16xf32>,
    %29 = vector.extract_strided_slice %10 {offsets = [0, 24], sizes = [8, 8], strides = [1, 1]} : vector<8x32xbf16> to vector<8x8xbf16>
    %c0_21 = arith.constant 0 : index
    %c24 = arith.constant 24 : index
    %30 = vector.load %arg10[%c0_21, %c24] : memref<16x64xbf16, #tpu.memory_space<vmem>>, vector<16x8xbf16>
    %cst_22 = arith.constant dense<0.000000e+00> : vector<8x16xf32>
    %31 = tpu.matmul %29, %30, %cst_22 {dimension_numbers = #tpu.dot_dimension_numbers<[1], [1], [0], [0], [0, 0, 1, 0], [], []>} : vector<8x8xbf16>, vector<16x8xbf16>, vector<8x16xf32> -> vector<8x16xf32>
    %c3 = arith.constant 3 : index
    %c0_23 = arith.constant 0 : index
    %c0_24 = arith.constant 0 : index
    %32 = vector.load %arg11[%c3, %c0_23, %c0_24] : memref<4x8x16xf32, #tpu.memory_space<vmem>>, vector<1x8x16xf32>
    %33 = vector.shape_cast %32 : vector<1x8x16xf32> to vector<8x16xf32>
    %34 = vector.shape_cast %31 : vector<8x16xf32> to vector<1x8x16xf32>
    tpu.vector_store %arg11[%c3, %c0_23, %c0_24], %34 {strides = array<i32>} : memref<4x8x16xf32, #tpu.memory_space<vmem>>, vector<1x8x16xf32>,
    %c0_25 = arith.constant 0 : index
    %c0_26 = arith.constant 0 : index
    %c0_27 = arith.constant 0 : index
    %35 = vector.load %arg11[%c0_25, %c0_26, %c0_27] : memref<4x8x16xf32, #tpu.memory_space<vmem>>, vector<4x8x16xf32>
    %cst_28 = arith.constant dense<0xFF800000> : vector<4x8xf32>
    %36 = vector.multi_reduction <maximumf>, %35, %cst_28 [2] : vector<4x8x16xf32> to vector<4x8xf32>
    %37 = vector.shape_cast %36 : vector<4x8xf32> to vector<4x8x1xf32>
    %38 = vector.broadcast %37 : vector<4x8x1xf32> to vector<4x8x16xf32>
    %39 = arith.subf %35, %38 : vector<4x8x16xf32>
    %cst_29 = arith.constant -1.000000e+00 : f32
    %40 = vector.broadcast %cst_29 : f32 to vector<4x8x1xf32>
    %cst_30 = arith.constant 0.000000e+00 : f32
    %41 = vector.broadcast %cst_30 : f32 to vector<4x8x1xf32>
    %cst_31 = arith.constant 5.000000e-01 : f32
    %cst_32 = arith.constant 0.000000e+00 : f32
    %c0_i32_33 = arith.constant 0 : i32
    %42 = arith.addf %40, %41 : vector<4x8x1xf32>
    %43 = vector.broadcast %cst_31 : f32 to vector<4x8x1xf32>
    %44 = arith.mulf %43, %42 : vector<4x8x1xf32>
    %45 = vector.broadcast %44 : vector<4x8x1xf32> to vector<4x8x16xf32>
    %46 = arith.subf %39, %45 : vector<4x8x16xf32>
    %47 = vector.broadcast %cst_32 : f32 to vector<4x8x16xf32>
    %48 = arith.maximumf %46, %47 : vector<4x8x16xf32>
    %cst_34 = arith.constant dense<0.000000e+00> : vector<4x8xf32>
    %49 = vector.multi_reduction <add>, %48, %cst_34 [2] : vector<4x8x16xf32> to vector<4x8xf32>
    %50 = vector.shape_cast %49 : vector<4x8xf32> to vector<4x8x1xf32>
    %cst_35 = arith.constant 1.000000e+00 : f32
    %51 = vector.broadcast %cst_35 : f32 to vector<4x8x1xf32>
    %52 = arith.cmpf oge, %50, %51 : vector<4x8x1xf32>
    %53 = arith.select %52, %44, %40 : vector<4x8x1xi1>, vector<4x8x1xf32>
    %54 = arith.select %52, %41, %44 : vector<4x8x1xi1>, vector<4x8x1xf32>
    %c1_i32 = arith.constant 1 : i32
    %55 = arith.addf %53, %54 : vector<4x8x1xf32>
    %56 = vector.broadcast %cst_31 : f32 to vector<4x8x1xf32>
    %57 = arith.mulf %56, %55 : vector<4x8x1xf32>
    %58 = vector.broadcast %57 : vector<4x8x1xf32> to vector<4x8x16xf32>
    %59 = arith.subf %39, %58 : vector<4x8x16xf32>
    %60 = vector.broadcast %cst_32 : f32 to vector<4x8x16xf32>
    %61 = arith.maximumf %59, %60 : vector<4x8x16xf32>
    %cst_36 = arith.constant dense<0.000000e+00> : vector<4x8xf32>
    %62 = vector.multi_reduction <add>, %61, %cst_36 [2] : vector<4x8x16xf32> to vector<4x8xf32>
    %63 = vector.shape_cast %62 : vector<4x8xf32> to vector<4x8x1xf32>
    %cst_37 = arith.constant 1.000000e+00 : f32
    %64 = vector.broadcast %cst_37 : f32 to vector<4x8x1xf32>
    %65 = arith.cmpf oge, %63, %64 : vector<4x8x1xf32>
    %66 = arith.select %65, %57, %53 : vector<4x8x1xi1>, vector<4x8x1xf32>
    %67 = arith.select %65, %54, %57 : vector<4x8x1xi1>, vector<4x8x1xf32>
    %c2_i32 = arith.constant 2 : i32
    %68 = arith.addf %66, %67 : vector<4x8x1xf32>
    %69 = vector.broadcast %cst_31 : f32 to vector<4x8x1xf32>
    %70 = arith.mulf %69, %68 : vector<4x8x1xf32>
    %71 = vector.broadcast %70 : vector<4x8x1xf32> to vector<4x8x16xf32>
    %72 = arith.subf %39, %71 : vector<4x8x16xf32>
    %73 = vector.broadcast %cst_32 : f32 to vector<4x8x16xf32>
    %74 = arith.maximumf %72, %73 : vector<4x8x16xf32>
    %cst_38 = arith.constant dense<0.000000e+00> : vector<4x8xf32>
    %75 = vector.multi_reduction <add>, %74, %cst_38 [2] : vector<4x8x16xf32> to vector<4x8xf32>
    %76 = vector.shape_cast %75 : vector<4x8xf32> to vector<4x8x1xf32>
    %cst_39 = arith.constant 1.000000e+00 : f32
    %77 = vector.broadcast %cst_39 : f32 to vector<4x8x1xf32>
    %78 = arith.cmpf oge, %76, %77 : vector<4x8x1xf32>
    %79 = arith.select %78, %70, %66 : vector<4x8x1xi1>, vector<4x8x1xf32>
    %80 = arith.select %78, %67, %70 : vector<4x8x1xi1>, vector<4x8x1xf32>
    %c3_i32 = arith.constant 3 : i32
    %81 = arith.addf %79, %80 : vector<4x8x1xf32>
    %82 = vector.broadcast %cst_31 : f32 to vector<4x8x1xf32>
    %83 = arith.mulf %82, %81 : vector<4x8x1xf32>
    %84 = vector.broadcast %83 : vector<4x8x1xf32> to vector<4x8x16xf32>
    %85 = arith.subf %39, %84 : vector<4x8x16xf32>
    %86 = vector.broadcast %cst_32 : f32 to vector<4x8x16xf32>
    %87 = arith.maximumf %85, %86 : vector<4x8x16xf32>
    %cst_40 = arith.constant dense<0.000000e+00> : vector<4x8xf32>
    %88 = vector.multi_reduction <add>, %87, %cst_40 [2] : vector<4x8x16xf32> to vector<4x8xf32>
    %89 = vector.shape_cast %88 : vector<4x8xf32> to vector<4x8x1xf32>
    %cst_41 = arith.constant 1.000000e+00 : f32
    %90 = vector.broadcast %cst_41 : f32 to vector<4x8x1xf32>
    %91 = arith.cmpf oge, %89, %90 : vector<4x8x1xf32>
    %92 = arith.select %91, %83, %79 : vector<4x8x1xi1>, vector<4x8x1xf32>
    %93 = arith.select %91, %80, %83 : vector<4x8x1xi1>, vector<4x8x1xf32>
    %c4_i32 = arith.constant 4 : i32
    %94 = arith.addf %92, %93 : vector<4x8x1xf32>
    %95 = vector.broadcast %cst_31 : f32 to vector<4x8x1xf32>
    %96 = arith.mulf %95, %94 : vector<4x8x1xf32>
    %97 = vector.broadcast %96 : vector<4x8x1xf32> to vector<4x8x16xf32>
    %98 = arith.subf %39, %97 : vector<4x8x16xf32>
    %99 = vector.broadcast %cst_32 : f32 to vector<4x8x16xf32>
    %100 = arith.maximumf %98, %99 : vector<4x8x16xf32>
    %cst_42 = arith.constant dense<0.000000e+00> : vector<4x8xf32>
    %101 = vector.multi_reduction <add>, %100, %cst_42 [2] : vector<4x8x16xf32> to vector<4x8xf32>
    %102 = vector.shape_cast %101 : vector<4x8xf32> to vector<4x8x1xf32>
    %cst_43 = arith.constant 1.000000e+00 : f32
    %103 = vector.broadcast %cst_43 : f32 to vector<4x8x1xf32>
    %104 = arith.cmpf oge, %102, %103 : vector<4x8x1xf32>
    %105 = arith.select %104, %96, %92 : vector<4x8x1xi1>, vector<4x8x1xf32>
    %106 = arith.select %104, %93, %96 : vector<4x8x1xi1>, vector<4x8x1xf32>
    %c5_i32 = arith.constant 5 : i32
    %107 = arith.addf %105, %106 : vector<4x8x1xf32>
    %108 = vector.broadcast %cst_31 : f32 to vector<4x8x1xf32>
    %109 = arith.mulf %108, %107 : vector<4x8x1xf32>
    %110 = vector.broadcast %109 : vector<4x8x1xf32> to vector<4x8x16xf32>
    %111 = arith.subf %39, %110 : vector<4x8x16xf32>
    %112 = vector.broadcast %cst_32 : f32 to vector<4x8x16xf32>
    %113 = arith.maximumf %111, %112 : vector<4x8x16xf32>
    %cst_44 = arith.constant dense<0.000000e+00> : vector<4x8xf32>
    %114 = vector.multi_reduction <add>, %113, %cst_44 [2] : vector<4x8x16xf32> to vector<4x8xf32>
    %115 = vector.shape_cast %114 : vector<4x8xf32> to vector<4x8x1xf32>
    %cst_45 = arith.constant 1.000000e+00 : f32
    %116 = vector.broadcast %cst_45 : f32 to vector<4x8x1xf32>
    %117 = arith.cmpf oge, %115, %116 : vector<4x8x1xf32>
    %118 = arith.select %117, %109, %105 : vector<4x8x1xi1>, vector<4x8x1xf32>
    %119 = arith.select %117, %106, %109 : vector<4x8x1xi1>, vector<4x8x1xf32>
    %c6_i32 = arith.constant 6 : i32
    %120 = arith.addf %118, %119 : vector<4x8x1xf32>
    %121 = vector.broadcast %cst_31 : f32 to vector<4x8x1xf32>
    %122 = arith.mulf %121, %120 : vector<4x8x1xf32>
    %123 = vector.broadcast %122 : vector<4x8x1xf32> to vector<4x8x16xf32>
    %124 = arith.subf %39, %123 : vector<4x8x16xf32>
    %125 = vector.broadcast %cst_32 : f32 to vector<4x8x16xf32>
    %126 = arith.maximumf %124, %125 : vector<4x8x16xf32>
    %cst_46 = arith.constant dense<0.000000e+00> : vector<4x8xf32>
    %127 = vector.multi_reduction <add>, %126, %cst_46 [2] : vector<4x8x16xf32> to vector<4x8xf32>
    %128 = vector.shape_cast %127 : vector<4x8xf32> to vector<4x8x1xf32>
    %cst_47 = arith.constant 1.000000e+00 : f32
    %129 = vector.broadcast %cst_47 : f32 to vector<4x8x1xf32>
    %130 = arith.cmpf oge, %128, %129 : vector<4x8x1xf32>
    %131 = arith.select %130, %122, %118 : vector<4x8x1xi1>, vector<4x8x1xf32>
    %132 = arith.select %130, %119, %122 : vector<4x8x1xi1>, vector<4x8x1xf32>
    %c7_i32 = arith.constant 7 : i32
    %133 = arith.addf %131, %132 : vector<4x8x1xf32>
    %134 = vector.broadcast %cst_31 : f32 to vector<4x8x1xf32>
    %135 = arith.mulf %134, %133 : vector<4x8x1xf32>
    %136 = vector.broadcast %135 : vector<4x8x1xf32> to vector<4x8x16xf32>
    %137 = arith.subf %39, %136 : vector<4x8x16xf32>
    %138 = vector.broadcast %cst_32 : f32 to vector<4x8x16xf32>
    %139 = arith.maximumf %137, %138 : vector<4x8x16xf32>
    %cst_48 = arith.constant dense<0.000000e+00> : vector<4x8xf32>
    %140 = vector.multi_reduction <add>, %139, %cst_48 [2] : vector<4x8x16xf32> to vector<4x8xf32>
    %141 = vector.shape_cast %140 : vector<4x8xf32> to vector<4x8x1xf32>
    %cst_49 = arith.constant 1.000000e+00 : f32
    %142 = vector.broadcast %cst_49 : f32 to vector<4x8x1xf32>
    %143 = arith.cmpf oge, %141, %142 : vector<4x8x1xf32>
    %144 = arith.select %143, %135, %131 : vector<4x8x1xi1>, vector<4x8x1xf32>
    %145 = arith.select %143, %132, %135 : vector<4x8x1xi1>, vector<4x8x1xf32>
    %c8_i32 = arith.constant 8 : i32
    %146 = arith.addf %144, %145 : vector<4x8x1xf32>
    %147 = vector.broadcast %cst_31 : f32 to vector<4x8x1xf32>
    %148 = arith.mulf %147, %146 : vector<4x8x1xf32>
    %149 = vector.broadcast %148 : vector<4x8x1xf32> to vector<4x8x16xf32>
    %150 = arith.subf %39, %149 : vector<4x8x16xf32>
    %151 = vector.broadcast %cst_32 : f32 to vector<4x8x16xf32>
    %152 = arith.maximumf %150, %151 : vector<4x8x16xf32>
    %cst_50 = arith.constant dense<0.000000e+00> : vector<4x8xf32>
    %153 = vector.multi_reduction <add>, %152, %cst_50 [2] : vector<4x8x16xf32> to vector<4x8xf32>
    %154 = vector.shape_cast %153 : vector<4x8xf32> to vector<4x8x1xf32>
    %cst_51 = arith.constant 1.000000e+00 : f32
    %155 = vector.broadcast %cst_51 : f32 to vector<4x8x1xf32>
    %156 = arith.cmpf oge, %154, %155 : vector<4x8x1xf32>
    %157 = arith.select %156, %148, %144 : vector<4x8x1xi1>, vector<4x8x1xf32>
    %158 = arith.select %156, %145, %148 : vector<4x8x1xi1>, vector<4x8x1xf32>
    %c9_i32 = arith.constant 9 : i32
    %159 = arith.addf %157, %158 : vector<4x8x1xf32>
    %160 = vector.broadcast %cst_31 : f32 to vector<4x8x1xf32>
    %161 = arith.mulf %160, %159 : vector<4x8x1xf32>
    %162 = vector.broadcast %161 : vector<4x8x1xf32> to vector<4x8x16xf32>
    %163 = arith.subf %39, %162 : vector<4x8x16xf32>
    %164 = vector.broadcast %cst_32 : f32 to vector<4x8x16xf32>
    %165 = arith.maximumf %163, %164 : vector<4x8x16xf32>
    %cst_52 = arith.constant dense<0.000000e+00> : vector<4x8xf32>
    %166 = vector.multi_reduction <add>, %165, %cst_52 [2] : vector<4x8x16xf32> to vector<4x8xf32>
    %167 = vector.shape_cast %166 : vector<4x8xf32> to vector<4x8x1xf32>
    %cst_53 = arith.constant 1.000000e+00 : f32
    %168 = vector.broadcast %cst_53 : f32 to vector<4x8x1xf32>
    %169 = arith.cmpf oge, %167, %168 : vector<4x8x1xf32>
    %170 = arith.select %169, %161, %157 : vector<4x8x1xi1>, vector<4x8x1xf32>
    %171 = arith.select %169, %158, %161 : vector<4x8x1xi1>, vector<4x8x1xf32>
    %c10_i32 = arith.constant 10 : i32
    %172 = arith.addf %170, %171 : vector<4x8x1xf32>
    %173 = vector.broadcast %cst_31 : f32 to vector<4x8x1xf32>
    %174 = arith.mulf %173, %172 : vector<4x8x1xf32>
    %175 = vector.broadcast %174 : vector<4x8x1xf32> to vector<4x8x16xf32>
    %176 = arith.subf %39, %175 : vector<4x8x16xf32>
    %177 = vector.broadcast %cst_32 : f32 to vector<4x8x16xf32>
    %178 = arith.maximumf %176, %177 : vector<4x8x16xf32>
    %cst_54 = arith.constant dense<0.000000e+00> : vector<4x8xf32>
    %179 = vector.multi_reduction <add>, %178, %cst_54 [2] : vector<4x8x16xf32> to vector<4x8xf32>
    %180 = vector.shape_cast %179 : vector<4x8xf32> to vector<4x8x1xf32>
    %cst_55 = arith.constant 1.000000e+00 : f32
    %181 = vector.broadcast %cst_55 : f32 to vector<4x8x1xf32>
    %182 = arith.cmpf oge, %180, %181 : vector<4x8x1xf32>
    %183 = arith.select %182, %174, %170 : vector<4x8x1xi1>, vector<4x8x1xf32>
    %184 = arith.select %182, %171, %174 : vector<4x8x1xi1>, vector<4x8x1xf32>
    %c11_i32 = arith.constant 11 : i32
    %185 = arith.addf %183, %184 : vector<4x8x1xf32>
    %186 = vector.broadcast %cst_31 : f32 to vector<4x8x1xf32>
    %187 = arith.mulf %186, %185 : vector<4x8x1xf32>
    %188 = vector.broadcast %187 : vector<4x8x1xf32> to vector<4x8x16xf32>
    %189 = arith.subf %39, %188 : vector<4x8x16xf32>
    %190 = vector.broadcast %cst_32 : f32 to vector<4x8x16xf32>
    %191 = arith.maximumf %189, %190 : vector<4x8x16xf32>
    %cst_56 = arith.constant dense<0.000000e+00> : vector<4x8xf32>
    %192 = vector.multi_reduction <add>, %191, %cst_56 [2] : vector<4x8x16xf32> to vector<4x8xf32>
    %193 = vector.shape_cast %192 : vector<4x8xf32> to vector<4x8x1xf32>
    %cst_57 = arith.constant 1.000000e+00 : f32
    %194 = vector.broadcast %cst_57 : f32 to vector<4x8x1xf32>
    %195 = arith.cmpf oge, %193, %194 : vector<4x8x1xf32>
    %196 = arith.select %195, %187, %183 : vector<4x8x1xi1>, vector<4x8x1xf32>
    %197 = arith.select %195, %184, %187 : vector<4x8x1xi1>, vector<4x8x1xf32>
    %c12_i32 = arith.constant 12 : i32
    %198 = arith.addf %196, %197 : vector<4x8x1xf32>
    %199 = vector.broadcast %cst_31 : f32 to vector<4x8x1xf32>
    %200 = arith.mulf %199, %198 : vector<4x8x1xf32>
    %201 = vector.broadcast %200 : vector<4x8x1xf32> to vector<4x8x16xf32>
    %202 = arith.subf %39, %201 : vector<4x8x16xf32>
    %203 = vector.broadcast %cst_32 : f32 to vector<4x8x16xf32>
    %204 = arith.maximumf %202, %203 : vector<4x8x16xf32>
    %cst_58 = arith.constant dense<0.000000e+00> : vector<4x8xf32>
    %205 = vector.multi_reduction <add>, %204, %cst_58 [2] : vector<4x8x16xf32> to vector<4x8xf32>
    %206 = vector.shape_cast %205 : vector<4x8xf32> to vector<4x8x1xf32>
    %cst_59 = arith.constant 1.000000e+00 : f32
    %207 = vector.broadcast %cst_59 : f32 to vector<4x8x1xf32>
    %208 = arith.cmpf oge, %206, %207 : vector<4x8x1xf32>
    %209 = arith.select %208, %200, %196 : vector<4x8x1xi1>, vector<4x8x1xf32>
    %210 = arith.select %208, %197, %200 : vector<4x8x1xi1>, vector<4x8x1xf32>
    %c13_i32 = arith.constant 13 : i32
    %211 = arith.addf %209, %210 : vector<4x8x1xf32>
    %212 = vector.broadcast %cst_31 : f32 to vector<4x8x1xf32>
    %213 = arith.mulf %212, %211 : vector<4x8x1xf32>
    %214 = vector.broadcast %213 : vector<4x8x1xf32> to vector<4x8x16xf32>
    %215 = arith.subf %39, %214 : vector<4x8x16xf32>
    %216 = vector.broadcast %cst_32 : f32 to vector<4x8x16xf32>
    %217 = arith.maximumf %215, %216 : vector<4x8x16xf32>
    %cst_60 = arith.constant dense<0.000000e+00> : vector<4x8xf32>
    %218 = vector.multi_reduction <add>, %217, %cst_60 [2] : vector<4x8x16xf32> to vector<4x8xf32>
    %219 = vector.shape_cast %218 : vector<4x8xf32> to vector<4x8x1xf32>
    %cst_61 = arith.constant 1.000000e+00 : f32
    %220 = vector.broadcast %cst_61 : f32 to vector<4x8x1xf32>
    %221 = arith.cmpf oge, %219, %220 : vector<4x8x1xf32>
    %222 = arith.select %221, %213, %209 : vector<4x8x1xi1>, vector<4x8x1xf32>
    %223 = arith.select %221, %210, %213 : vector<4x8x1xi1>, vector<4x8x1xf32>
    %c14_i32 = arith.constant 14 : i32
    %224 = arith.addf %222, %223 : vector<4x8x1xf32>
    %225 = vector.broadcast %cst_31 : f32 to vector<4x8x1xf32>
    %226 = arith.mulf %225, %224 : vector<4x8x1xf32>
    %227 = vector.broadcast %226 : vector<4x8x1xf32> to vector<4x8x16xf32>
    %228 = arith.subf %39, %227 : vector<4x8x16xf32>
    %229 = vector.broadcast %cst_32 : f32 to vector<4x8x16xf32>
    %230 = arith.maximumf %228, %229 : vector<4x8x16xf32>
    %cst_62 = arith.constant dense<0.000000e+00> : vector<4x8xf32>
    %231 = vector.multi_reduction <add>, %230, %cst_62 [2] : vector<4x8x16xf32> to vector<4x8xf32>
    %232 = vector.shape_cast %231 : vector<4x8xf32> to vector<4x8x1xf32>
    %cst_63 = arith.constant 1.000000e+00 : f32
    %233 = vector.broadcast %cst_63 : f32 to vector<4x8x1xf32>
    %234 = arith.cmpf oge, %232, %233 : vector<4x8x1xf32>
    %235 = arith.select %234, %226, %222 : vector<4x8x1xi1>, vector<4x8x1xf32>
    %236 = arith.select %234, %223, %226 : vector<4x8x1xi1>, vector<4x8x1xf32>
    %c15_i32 = arith.constant 15 : i32
    %237 = arith.addf %235, %236 : vector<4x8x1xf32>
    %238 = vector.broadcast %cst_31 : f32 to vector<4x8x1xf32>
    %239 = arith.mulf %238, %237 : vector<4x8x1xf32>
    %240 = vector.broadcast %239 : vector<4x8x1xf32> to vector<4x8x16xf32>
    %241 = arith.subf %39, %240 : vector<4x8x16xf32>
    %242 = vector.broadcast %cst_32 : f32 to vector<4x8x16xf32>
    %243 = arith.maximumf %241, %242 : vector<4x8x16xf32>
    %cst_64 = arith.constant dense<0.000000e+00> : vector<4x8xf32>
    %244 = vector.multi_reduction <add>, %243, %cst_64 [2] : vector<4x8x16xf32> to vector<4x8xf32>
    %245 = vector.shape_cast %244 : vector<4x8xf32> to vector<4x8x1xf32>
    %cst_65 = arith.constant 1.000000e+00 : f32
    %246 = vector.broadcast %cst_65 : f32 to vector<4x8x1xf32>
    %247 = arith.cmpf oge, %245, %246 : vector<4x8x1xf32>
    %248 = arith.select %247, %239, %235 : vector<4x8x1xi1>, vector<4x8x1xf32>
    %249 = arith.select %247, %236, %239 : vector<4x8x1xi1>, vector<4x8x1xf32>
    %c16_i32 = arith.constant 16 : i32
    %250 = arith.addf %248, %249 : vector<4x8x1xf32>
    %251 = vector.broadcast %cst_31 : f32 to vector<4x8x1xf32>
    %252 = arith.mulf %251, %250 : vector<4x8x1xf32>
    %253 = vector.broadcast %252 : vector<4x8x1xf32> to vector<4x8x16xf32>
    %254 = arith.subf %39, %253 : vector<4x8x16xf32>
    %255 = vector.broadcast %cst_32 : f32 to vector<4x8x16xf32>
    %256 = arith.maximumf %254, %255 : vector<4x8x16xf32>
    %cst_66 = arith.constant dense<0.000000e+00> : vector<4x8xf32>
    %257 = vector.multi_reduction <add>, %256, %cst_66 [2] : vector<4x8x16xf32> to vector<4x8xf32>
    %258 = vector.shape_cast %257 : vector<4x8xf32> to vector<4x8x1xf32>
    %cst_67 = arith.constant 1.000000e+00 : f32
    %259 = vector.broadcast %cst_67 : f32 to vector<4x8x1xf32>
    %260 = arith.cmpf oge, %258, %259 : vector<4x8x1xf32>
    %261 = arith.select %260, %252, %248 : vector<4x8x1xi1>, vector<4x8x1xf32>
    %262 = arith.select %260, %249, %252 : vector<4x8x1xi1>, vector<4x8x1xf32>
    %c17_i32 = arith.constant 17 : i32
    %263 = arith.addf %261, %262 : vector<4x8x1xf32>
    %264 = vector.broadcast %cst_31 : f32 to vector<4x8x1xf32>
    %265 = arith.mulf %264, %263 : vector<4x8x1xf32>
    %266 = vector.broadcast %265 : vector<4x8x1xf32> to vector<4x8x16xf32>
    %267 = arith.subf %39, %266 : vector<4x8x16xf32>
    %268 = vector.broadcast %cst_32 : f32 to vector<4x8x16xf32>
    %269 = arith.maximumf %267, %268 : vector<4x8x16xf32>
    %cst_68 = arith.constant dense<0.000000e+00> : vector<4x8xf32>
    %270 = vector.multi_reduction <add>, %269, %cst_68 [2] : vector<4x8x16xf32> to vector<4x8xf32>
    %271 = vector.shape_cast %270 : vector<4x8xf32> to vector<4x8x1xf32>
    %cst_69 = arith.constant 1.000000e+00 : f32
    %272 = vector.broadcast %cst_69 : f32 to vector<4x8x1xf32>
    %273 = arith.cmpf oge, %271, %272 : vector<4x8x1xf32>
    %274 = arith.select %273, %265, %261 : vector<4x8x1xi1>, vector<4x8x1xf32>
    %275 = arith.select %273, %262, %265 : vector<4x8x1xi1>, vector<4x8x1xf32>
    %c18_i32 = arith.constant 18 : i32
    %276 = arith.addf %274, %275 : vector<4x8x1xf32>
    %277 = vector.broadcast %cst_31 : f32 to vector<4x8x1xf32>
    %278 = arith.mulf %277, %276 : vector<4x8x1xf32>
    %279 = vector.broadcast %278 : vector<4x8x1xf32> to vector<4x8x16xf32>
    %280 = arith.subf %39, %279 : vector<4x8x16xf32>
    %281 = vector.broadcast %cst_32 : f32 to vector<4x8x16xf32>
    %282 = arith.maximumf %280, %281 : vector<4x8x16xf32>
    %cst_70 = arith.constant dense<0.000000e+00> : vector<4x8xf32>
    %283 = vector.multi_reduction <add>, %282, %cst_70 [2] : vector<4x8x16xf32> to vector<4x8xf32>
    %284 = vector.shape_cast %283 : vector<4x8xf32> to vector<4x8x1xf32>
    %cst_71 = arith.constant 1.000000e+00 : f32
    %285 = vector.broadcast %cst_71 : f32 to vector<4x8x1xf32>
    %286 = arith.cmpf oge, %284, %285 : vector<4x8x1xf32>
    %287 = arith.select %286, %278, %274 : vector<4x8x1xi1>, vector<4x8x1xf32>
    %288 = arith.select %286, %275, %278 : vector<4x8x1xi1>, vector<4x8x1xf32>
    %c19_i32 = arith.constant 19 : i32
    %289 = arith.addf %287, %288 : vector<4x8x1xf32>
    %290 = vector.broadcast %cst_31 : f32 to vector<4x8x1xf32>
    %291 = arith.mulf %290, %289 : vector<4x8x1xf32>
    %292 = vector.broadcast %291 : vector<4x8x1xf32> to vector<4x8x16xf32>
    %293 = arith.subf %39, %292 : vector<4x8x16xf32>
    %294 = vector.broadcast %cst_32 : f32 to vector<4x8x16xf32>
    %295 = arith.maximumf %293, %294 : vector<4x8x16xf32>
    %cst_72 = arith.constant dense<0.000000e+00> : vector<4x8xf32>
    %296 = vector.multi_reduction <add>, %295, %cst_72 [2] : vector<4x8x16xf32> to vector<4x8xf32>
    %297 = vector.shape_cast %296 : vector<4x8xf32> to vector<4x8x1xf32>
    %cst_73 = arith.constant 1.000000e+00 : f32
    %298 = vector.broadcast %cst_73 : f32 to vector<4x8x1xf32>
    %299 = arith.cmpf oge, %297, %298 : vector<4x8x1xf32>
    %300 = arith.select %299, %291, %287 : vector<4x8x1xi1>, vector<4x8x1xf32>
    %301 = arith.select %299, %288, %291 : vector<4x8x1xi1>, vector<4x8x1xf32>
    %302 = arith.addf %300, %301 : vector<4x8x1xf32>
    %cst_74 = arith.constant 5.000000e-01 : f32
    %303 = vector.broadcast %cst_74 : f32 to vector<4x8x1xf32>
    %304 = arith.mulf %303, %302 : vector<4x8x1xf32>
    %305 = vector.broadcast %304 : vector<4x8x1xf32> to vector<4x8x16xf32>
    %306 = arith.cmpf oge, %39, %305 : vector<4x8x16xf32>
    %307 = arith.extui %306 : vector<4x8x16xi1> to vector<4x8x16xi32>
    %308 = arith.sitofp %307 : vector<4x8x16xi32> to vector<4x8x16xf32>
    %cst_75 = arith.constant dense<0.000000e+00> : vector<4x8xf32>
    %309 = vector.multi_reduction <add>, %308, %cst_75 [2] : vector<4x8x16xf32> to vector<4x8xf32>
    %310 = vector.shape_cast %309 : vector<4x8xf32> to vector<4x8x1xf32>
    %cst_76 = arith.constant 1.000000e+00 : f32
    %311 = vector.broadcast %cst_76 : f32 to vector<4x8x1xf32>
    %312 = arith.maximumf %310, %311 : vector<4x8x1xf32>
    %313 = arith.mulf %39, %308 : vector<4x8x16xf32>
    %cst_77 = arith.constant dense<0.000000e+00> : vector<4x8xf32>
    %314 = vector.multi_reduction <add>, %313, %cst_77 [2] : vector<4x8x16xf32> to vector<4x8xf32>
    %315 = vector.shape_cast %314 : vector<4x8xf32> to vector<4x8x1xf32>
    %cst_78 = arith.constant 1.000000e+00 : f32
    %316 = vector.broadcast %cst_78 : f32 to vector<4x8x1xf32>
    %317 = arith.subf %315, %316 : vector<4x8x1xf32>
    %318 = arith.divf %317, %312 : vector<4x8x1xf32>
    %319 = vector.broadcast %318 : vector<4x8x1xf32> to vector<4x8x16xf32>
    %320 = arith.cmpf oge, %39, %319 : vector<4x8x16xf32>
    %321 = arith.extui %320 : vector<4x8x16xi1> to vector<4x8x16xi32>
    %322 = arith.sitofp %321 : vector<4x8x16xi32> to vector<4x8x16xf32>
    %cst_79 = arith.constant dense<0.000000e+00> : vector<4x8xf32>
    %323 = vector.multi_reduction <add>, %322, %cst_79 [2] : vector<4x8x16xf32> to vector<4x8xf32>
    %324 = vector.shape_cast %323 : vector<4x8xf32> to vector<4x8x1xf32>
    %cst_80 = arith.constant 1.000000e+00 : f32
    %325 = vector.broadcast %cst_80 : f32 to vector<4x8x1xf32>
    %326 = arith.maximumf %324, %325 : vector<4x8x1xf32>
    %327 = arith.mulf %39, %322 : vector<4x8x16xf32>
    %cst_81 = arith.constant dense<0.000000e+00> : vector<4x8xf32>
    %328 = vector.multi_reduction <add>, %327, %cst_81 [2] : vector<4x8x16xf32> to vector<4x8xf32>
    %329 = vector.shape_cast %328 : vector<4x8xf32> to vector<4x8x1xf32>
    %cst_82 = arith.constant 1.000000e+00 : f32
    %330 = vector.broadcast %cst_82 : f32 to vector<4x8x1xf32>
    %331 = arith.subf %329, %330 : vector<4x8x1xf32>
    %332 = arith.divf %331, %326 : vector<4x8x1xf32>
    %333 = vector.broadcast %332 : vector<4x8x1xf32> to vector<4x8x16xf32>
    %334 = arith.subf %39, %333 : vector<4x8x16xf32>
    %cst_83 = arith.constant 0.000000e+00 : f32
    %335 = vector.broadcast %cst_83 : f32 to vector<4x8x16xf32>
    %336 = arith.maximumf %334, %335 : vector<4x8x16xf32>
    %337 = arith.truncf %336 : vector<4x8x16xf32> to vector<4x8x16xbf16>
    %c0_84 = arith.constant 0 : index
    %c0_85 = arith.constant 0 : index
    %c0_86 = arith.constant 0 : index
    %c0_87 = arith.constant 0 : index
    %338 = vector.load %arg9[%c0_84, %c0_85, %c0_86, %c0_87] : memref<1x4x8x16xbf16, #tpu.memory_space<vmem>>, vector<1x4x8x16xbf16>
    %339 = vector.shape_cast %338 : vector<1x4x8x16xbf16> to vector<4x8x16xbf16>
    %340 = vector.shape_cast %337 : vector<4x8x16xbf16> to vector<1x4x8x16xbf16>
    tpu.vector_store %arg9[%c0_84, %c0_85, %c0_86, %c0_87], %340 {strides = array<i32>} : memref<1x4x8x16xbf16, #tpu.memory_space<vmem>>, vector<1x4x8x16xbf16>,
    %341 = arith.truncf %336 : vector<4x8x16xf32> to vector<4x8x16xbf16>
    %c0_88 = arith.constant 0 : index
    %c32 = arith.constant 32 : index
    %342 = vector.load %arg10[%c0_88, %c32] : memref<16x64xbf16, #tpu.memory_space<vmem>>, vector<16x8xbf16>
    %343 = vector.extract_strided_slice %341 {offsets = [0, 0, 0], sizes = [1, 8, 16], strides = [1, 1, 1]} : vector<4x8x16xbf16> to vector<1x8x16xbf16>
    %344 = vector.shape_cast %343 : vector<1x8x16xbf16> to vector<8x16xbf16>
    %cst_89 = arith.constant dense<0.000000e+00> : vector<8x8xf32>
    %345 = tpu.matmul %344, %342, %cst_89 {dimension_numbers = #tpu.dot_dimension_numbers<[1], [0], [0], [1], [0, 0, 1, 1], [], []>} : vector<8x16xbf16>, vector<16x8xbf16>, vector<8x8xf32> -> vector<8x8xf32>
    %c0_90 = arith.constant 0 : index
    %c0_91 = arith.constant 0 : index
    %c0_92 = arith.constant 0 : index
    %346 = vector.load %arg8[%c0_90, %c0_91, %c0_92] : memref<1x8x32xf32, #tpu.memory_space<vmem>>, vector<1x8x8xf32>
    %347 = vector.shape_cast %346 : vector<1x8x8xf32> to vector<8x8xf32>
    %348 = vector.shape_cast %345 : vector<8x8xf32> to vector<1x8x8xf32>
    tpu.vector_store %arg8[%c0_90, %c0_91, %c0_92], %348 {strides = array<i32>} : memref<1x8x32xf32, #tpu.memory_space<vmem>>, vector<1x8x8xf32>,
    %c0_93 = arith.constant 0 : index
    %c40 = arith.constant 40 : index
    %349 = vector.load %arg10[%c0_93, %c40] : memref<16x64xbf16, #tpu.memory_space<vmem>>, vector<16x8xbf16>
    %350 = vector.extract_strided_slice %341 {offsets = [1, 0, 0], sizes = [1, 8, 16], strides = [1, 1, 1]} : vector<4x8x16xbf16> to vector<1x8x16xbf16>
    %351 = vector.shape_cast %350 : vector<1x8x16xbf16> to vector<8x16xbf16>
    %cst_94 = arith.constant dense<0.000000e+00> : vector<8x8xf32>
    %352 = tpu.matmul %351, %349, %cst_94 {dimension_numbers = #tpu.dot_dimension_numbers<[1], [0], [0], [1], [0, 0, 1, 1], [], []>} : vector<8x16xbf16>, vector<16x8xbf16>, vector<8x8xf32> -> vector<8x8xf32>
    %c0_95 = arith.constant 0 : index
    %c0_96 = arith.constant 0 : index
    %c8_97 = arith.constant 8 : index
    %353 = vector.load %arg8[%c0_95, %c0_96, %c8_97] : memref<1x8x32xf32, #tpu.memory_space<vmem>>, vector<1x8x8xf32>
    %354 = vector.shape_cast %353 : vector<1x8x8xf32> to vector<8x8xf32>
    %355 = vector.shape_cast %352 : vector<8x8xf32> to vector<1x8x8xf32>
    tpu.vector_store %arg8[%c0_95, %c0_96, %c8_97], %355 {strides = array<i32>} : memref<1x8x32xf32, #tpu.memory_space<vmem>>, vector<1x8x8xf32>,
    %c0_98 = arith.constant 0 : index
    %c48 = arith.constant 48 : index
    %356 = vector.load %arg10[%c0_98, %c48] : memref<16x64xbf16, #tpu.memory_space<vmem>>, vector<16x8xbf16>
    %357 = vector.extract_strided_slice %341 {offsets = [2, 0, 0], sizes = [1, 8, 16], strides = [1, 1, 1]} : vector<4x8x16xbf16> to vector<1x8x16xbf16>
    %358 = vector.shape_cast %357 : vector<1x8x16xbf16> to vector<8x16xbf16>
    %cst_99 = arith.constant dense<0.000000e+00> : vector<8x8xf32>
    %359 = tpu.matmul %358, %356, %cst_99 {dimension_numbers = #tpu.dot_dimension_numbers<[1], [0], [0], [1], [0, 0, 1, 1], [], []>} : vector<8x16xbf16>, vector<16x8xbf16>, vector<8x8xf32> -> vector<8x8xf32>
    %c0_100 = arith.constant 0 : index
    %c0_101 = arith.constant 0 : index
    %c16_102 = arith.constant 16 : index
    %360 = vector.load %arg8[%c0_100, %c0_101, %c16_102] : memref<1x8x32xf32, #tpu.memory_space<vmem>>, vector<1x8x8xf32>
    %361 = vector.shape_cast %360 : vector<1x8x8xf32> to vector<8x8xf32>
    %362 = vector.shape_cast %359 : vector<8x8xf32> to vector<1x8x8xf32>
    tpu.vector_store %arg8[%c0_100, %c0_101, %c16_102], %362 {strides = array<i32>} : memref<1x8x32xf32, #tpu.memory_space<vmem>>, vector<1x8x8xf32>,
    %c0_103 = arith.constant 0 : index
    %c56 = arith.constant 56 : index
    %363 = vector.load %arg10[%c0_103, %c56] : memref<16x64xbf16, #tpu.memory_space<vmem>>, vector<16x8xbf16>
    %364 = vector.extract_strided_slice %341 {offsets = [3, 0, 0], sizes = [1, 8, 16], strides = [1, 1, 1]} : vector<4x8x16xbf16> to vector<1x8x16xbf16>
    %365 = vector.shape_cast %364 : vector<1x8x16xbf16> to vector<8x16xbf16>
    %cst_104 = arith.constant dense<0.000000e+00> : vector<8x8xf32>
    %366 = tpu.matmul %365, %363, %cst_104 {dimension_numbers = #tpu.dot_dimension_numbers<[1], [0], [0], [1], [0, 0, 1, 1], [], []>} : vector<8x16xbf16>, vector<16x8xbf16>, vector<8x8xf32> -> vector<8x8xf32>
    %c0_105 = arith.constant 0 : index
    %c0_106 = arith.constant 0 : index
    %c24_107 = arith.constant 24 : index
    %367 = vector.load %arg8[%c0_105, %c0_106, %c24_107] : memref<1x8x32xf32, #tpu.memory_space<vmem>>, vector<1x8x8xf32>
    %368 = vector.shape_cast %367 : vector<1x8x8xf32> to vector<8x8xf32>
    %369 = vector.shape_cast %366 : vector<8x8xf32> to vector<1x8x8xf32>
    tpu.vector_store %arg8[%c0_105, %c0_106, %c24_107], %369 {strides = array<i32>} : memref<1x8x32xf32, #tpu.memory_space<vmem>>, vector<1x8x8xf32>,
    return
  }
  func.func @transform_0(%arg0: i32, %arg1: i32) -> (i32, i32, i32) {
    %c0_i32 = arith.constant 0 : i32
    %c0_i32_0 = arith.constant 0 : i32
    return %arg0, %arg1, %c0_i32 : i32, i32, i32
  }
  func.func @transform_1(%arg0: i32, %arg1: i32) -> (i32, i32, i32) {
    %c0_i32 = arith.constant 0 : i32
    %c0_i32_0 = arith.constant 0 : i32
    %c0_i32_1 = arith.constant 0 : i32
    return %arg0, %c0_i32, %c0_i32_0 : i32, i32, i32
  }
  func.func @transform_2(%arg0: i32, %arg1: i32) -> (i32, i32) {
    %c0_i32 = arith.constant 0 : i32
    %c0_i32_0 = arith.constant 0 : i32
    %c0_i32_1 = arith.constant 0 : i32
    return %c0_i32, %c0_i32_0 : i32, i32
  }
  func.func @transform_3(%arg0: i32, %arg1: i32) -> (i32, i32) {
    %c0_i32 = arith.constant 0 : i32
    %c0_i32_0 = arith.constant 0 : i32
    %c0_i32_1 = arith.constant 0 : i32
    return %c0_i32, %c0_i32_0 : i32, i32
  }
  func.func @transform_4(%arg0: i32, %arg1: i32) -> (i32, i32) {
    %c0_i32 = arith.constant 0 : i32
    %c0_i32_0 = arith.constant 0 : i32
    %c0_i32_1 = arith.constant 0 : i32
    return %c0_i32, %c0_i32_0 : i32, i32
  }
  func.func @transform_5(%arg0: i32, %arg1: i32) -> (i32, i32) {
    %c0_i32 = arith.constant 0 : i32
    %c0_i32_0 = arith.constant 0 : i32
    %c0_i32_1 = arith.constant 0 : i32
    return %c0_i32, %c0_i32_0 : i32, i32
  }
  func.func @transform_6(%arg0: i32, %arg1: i32) -> (i32, i32, i32) {
    %c0_i32 = arith.constant 0 : i32
    %c0_i32_0 = arith.constant 0 : i32
    return %arg0, %arg1, %c0_i32 : i32, i32, i32
  }
  func.func @transform_7(%arg0: i32, %arg1: i32) -> (i32, i32, i32, i32) {
    %c0_i32 = arith.constant 0 : i32
    %c0_i32_0 = arith.constant 0 : i32
    %c0_i32_1 = arith.constant 0 : i32
    return %arg0, %c0_i32, %arg1, %c0_i32_0 : i32, i32, i32, i32
  }
}

</mosaic_0001>

<bundles_post_ra>
// kernel: tpu_custom_call.1
= control target key start
LH: loop header
LB: loop body
LE: loop exit
PB: predicated region body
PF: predicated region fallthrough
CT: control target
= control target key end

     0   :  { %s3512_s0 = inlined_call_operand.hbm [shape: bf16[2,8,32], index: 0, kind: input, shape index: {}]   ;;  %s3513_s1 = inlined_call_operand.hbm [shape: bf16[2,16,32], index: 1, kind: input, shape index: {}]   ;;  %s3514_s2 = inlined_call_operand.hbm [shape: bf16[32,32], index: 2, kind: input, shape index: {}]   ;;  %s3515_s3 = inlined_call_operand.hbm [shape: bf16[32,64], index: 3, kind: input, shape index: {}]   ;;  %s3516_s4 = inlined_call_operand.hbm [shape: f32[1,32], index: 4, kind: input, shape index: {}]   ;;  %s3517_s5 = inlined_call_operand.hbm [shape: f32[1,64], index: 5, kind: input, shape index: {}]   ;;  %s3518_s6 = inlined_call_operand.hbm [shape: f32[2,8,32], index: 6, kind: output, shape index: {0}]   ;;  %s3519_s7 = inlined_call_operand.hbm [shape: bf16[2,4,8,16], index: 7, kind: output, shape index: {1}]  }
   0x1   :  { %3526 = sst [smem:[#allocation25_spill]] %s3512_s0 }
   0x2   :  { %3527 = sst [smem:[#allocation26_spill]] %s3514_s2 }
   0x3   :  { %3528 = sst [smem:[#allocation27_spill]] %s3515_s3 }
   0x4   :  { %3529 = sst [smem:[#allocation28_spill]] %s3516_s4 }
   0x5   :  { %3530 = sst [smem:[#allocation29_spill]] %s3518_s6 }
   0x6   :  { %13 = vsyncpa [#allocation5], 0 }
   0x7   :  { %15 = vsyncpa [#allocation5 + $0x1], 0 }
   0x8   :  { %16 = vsyncpa [#allocation8], 0 }
   0x9   :  { %18 = vsyncpa [#allocation8 + $0x1], 0 }
   0xa   :  { %19 = vsyncpa [#allocation11], 0 }
   0xb   :  { %20 = vsyncpa [#allocation14], 0 }
   0xc   :  { %21 = vsyncpa [#allocation6], 0 }
   0xd   :  { %23 = vsyncpa [#allocation6 + $0x1], 0 }
   0xe   :  { %24 = vsyncpa [#allocation17], 0 }
   0xf   :  { %26 = vsyncpa [#allocation17 + $0x1], 0  ;;  %s2831_s24 = smov 0   ;;  %s2833_s25 = smov 0  }
  0x10   :  { %s2835_s26 = smov 0   ;;  %s2837_s27 = smov 0  }
  0x11   :  { %s2839_s28 = smov 0   ;;  %s2841_s29 = smov 0  }
  0x12 LB: > { %s2862_s30 = sadd.s32 4294967295, %s2763_s29   ;;  %p2157_p0 = scmp.ge.s32.totalorder %s2763_s29, 1  ;;  %s2763_s29 = sphi %s2841_s29, %s32_s29   ;;  %s2759_s28 = sphi %s2839_s28, %s3562_s28   ;;  %s2755_s27 = sphi %s2837_s27, %s3561_s27   ;;  %s2751_s26 = sphi %s2835_s26, %s3560_s26   ;;  %s2747_s25 = sphi %s2833_s25, %s3559_s25   ;;  %s2743_s24 = sphi %s2831_s24, %s3558_s24  }
  0x13   : > { %p3521_p1 = scmp.eq.s32.totalorder %s2862_s30, 0  ;;  %p243_p2 = scmp.lt.s32.totalorder %s2763_s29, 3 }
  0x14   : > { %s2765_s9 = smov [#allocation9]   ;;  %s2766_s12 = smov [#allocation10]  }
  0x15   : > { %p2867_p3 = pnand %p2157_p0, %p243_p2  ;;  %s255_s10 = sshll.u32 %s2765_s9, 4  ;;  %s2871_s10 = int_to_ptr.vmem [resolvable:$true] %s255_s10 }
  0x16   : > { %s268_s13 = sshll.u32 %s2766_s12, 4  ;;  %s2767_s14 = smov [#allocation12]   ;;  %s2882_s13 = int_to_ptr.vmem [resolvable:$true] %s268_s13 }
  0x17   : > { %s3531_s8 = scalar_select %p2867_p3, 1, 0 }
  0x18   : > { %p2333_p4 = pneg %p2867_p3  ;;  %s2884_s15 = sshll.u32 %s2767_s14, 4  ;;  %s283_s15 = int_to_ptr.vmem [resolvable:$true] %s2884_s15 }
  0x19   : > { %s3533_s2 = sld [smem:[#allocation26_spill]] }
  0x1a   : > { %p2878_p6 = pnand %p2333_p4, %p3521_p1 }
  0x1c   : > { %p2894_p8 = pneg %p2878_p6 }
  0x1f   : > { %s2461_s18 = scalar_lea.hbm %s3533_s2, 256 }
  0x20   : > { %p2462_p7 = scmp.ne.s32.totalorder %s3533_s2, %s2461_s18  ;;  %p2468_p11 = scmp.lt.u32.totalorder %s2461_s18, %s3533_s2 }
  0x22   : > { %p2464_p9 = pnand %p2894_p8, %p2462_p7 }
  0x24   : > { %p2465_p10 = pneg %p2464_p9 }
  0x26   : > { %p2470_p12 = pnand %p2468_p11, %p2465_p10 }
  0x28   : > { %2473 = shalt.err (!%p2470_p12)
}
  0x29   : > { %s2474_s9 = scalar_lea.vmem %s2871_s10, 256  ;;  %p2482_p4 = scmp.lt.s32.totalorder %s2871_s10, %s2871_s10 }
  0x2a   : > { %p2475_p13 = scmp.ne.s32.totalorder %s2871_s10, %s2474_s9  ;;  %p2483_p5 = scmp.lt.s32.totalorder %s2474_s9, %s2474_s9 }
  0x2c   : > { %p2477_p0 = pnand %p2475_p13, %p2894_p8  ;;  %p2484_p7 = por %p2483_p5, %p2482_p4 }
  0x2e   : > { %p2478_p2 = pneg %p2477_p0 }
  0x30   : > { %p2485_p9 = pnand %p2484_p7, %p2478_p2 }
  0x32   : > { %2488 = shalt.err (!%p2485_p9)
}
  0x33   : > { %s3523_s12 = smov 64   ;;  %s3524_s14 = smov 4  }
  0x34   : > { %2336 = dma.hbm_to_vmem [thread:$0]  (!%p2878_p6), %s3533_s2, 256, %s2871_s10, [#allocation8], %s3523_s12, %s3523_s12, %s3524_s14  }
  0x35   : > { %s3535_s3 = sld [smem:[#allocation27_spill]] }
  0x3b   : > { %s2489_s20 = scalar_lea.hbm %s3535_s3, 256 }
  0x3c   : > { %p2490_p5 = scmp.ne.s32.totalorder %s3535_s3, %s2489_s20  ;;  %p2496_p12 = scmp.lt.u32.totalorder %s2489_s20, %s3535_s3 }
  0x3e   : > { %p2492_p10 = pnand %p2490_p5, %p2894_p8 }
  0x40   : > { %p2493_p11 = pneg %p2492_p10 }
  0x42   : > { %p2498_p13 = pnand %p2496_p12, %p2493_p11 }
  0x44   : > { %2501 = shalt.err (!%p2498_p13)
}
  0x45   : > { %s2502_s10 = scalar_lea.vmem %s2882_s13, 256  ;;  %p2510_p7 = scmp.lt.s32.totalorder %s2882_s13, %s2882_s13 }
  0x46   : > { %p2503_p0 = scmp.ne.s32.totalorder %s2882_s13, %s2502_s10  ;;  %p2511_p9 = scmp.lt.s32.totalorder %s2502_s10, %s2502_s10 }
  0x48   : > { %p2505_p2 = pnand %p2503_p0, %p2894_p8  ;;  %p2512_p5 = por %p2511_p9, %p2510_p7 }
  0x4a   : > { %p2506_p4 = pneg %p2505_p2 }
  0x4c   : > { %p2513_p10 = pnand %p2512_p5, %p2506_p4 }
  0x4e   : > { %2516 = shalt.err (!%p2513_p10)
}
  0x4f   : > { %2339 = dma.hbm_to_vmem [thread:$0]  (!%p2878_p6), %s3535_s3, 256, %s2882_s13, [#allocation11], %s3523_s12, %s3523_s12, %s3524_s14  }
  0x50   : > { %s3536_s4 = sld [smem:[#allocation28_spill]] }
  0x56   : > { %s2517_s19 = scalar_lea.hbm %s3536_s4, 16 }
  0x57   : > { %p2518_p11 = scmp.ne.s32.totalorder %s3536_s4, %s2517_s19  ;;  %p2524_p0 = scmp.lt.u32.totalorder %s2517_s19, %s3536_s4 }
  0x59   : > { %p2520_p12 = pnand %p2518_p11, %p2894_p8 }
  0x5b   : > { %p2521_p13 = pneg %p2520_p12 }
  0x5d   : > { %p2526_p2 = pnand %p2524_p0, %p2521_p13 }
  0x5f   : > { %2529 = shalt.err (!%p2526_p2)
}
  0x60   : > { %s2530_s10 = scalar_lea.vmem %s283_s15, 16  ;;  %s2537_s13 = scalar_lea.vmem %s283_s15, 32 }
  0x61   : > { %p2531_p4 = scmp.ne.s32.totalorder %s283_s15, %s2530_s10  ;;  %p2538_p5 = scmp.lt.s32.totalorder %s283_s15, %s283_s15 }
  0x62   : > { %p2539_p10 = scmp.lt.s32.totalorder %s2537_s13, %s2530_s10 }
  0x63   : > { %p2533_p7 = pnand %p2531_p4, %p2894_p8 }
  0x64   : > { %p2540_p1 = por %p2539_p10, %p2538_p5 }
  0x65   : > { %p2534_p9 = pneg %p2533_p7 }
  0x67   : > { %p2541_p3 = pnand %p2540_p1, %p2534_p9 }
  0x69   : > { %2544 = shalt.err (!%p2541_p3)
}
  0x6a   : > { %2342 = dma.hbm_to_vmem [thread:$0]  (!%p2878_p6), %s3536_s4, 16, %s283_s15, [#allocation11]  }
  0x6b   : > { %s2770_s17 = smov [#allocation13]   ;;  %s2545_s22 = scalar_lea.hbm %s3517_s5, 16 }
  0x6c   : > { %s293_s18 = sshll.u32 %s2770_s17, 4  ;;  %p2546_p11 = scmp.ne.s32.totalorder %s3517_s5, %s2545_s22  ;;  %s294_s18 = int_to_ptr.vmem [resolvable:$true] %s293_s18 }
  0x6d   : > { %p2552_p12 = scmp.lt.u32.totalorder %s2545_s22, %s3517_s5 }
  0x6e   : > { %p2548_p1 = pnand %p2546_p11, %p2894_p8 }
  0x70   : > { %p2549_p3 = pneg %p2548_p1 }
  0x72   : > { %p2554_p13 = pnand %p2552_p12, %p2549_p3 }
  0x74   : > { %2557 = shalt.err (!%p2554_p13)
}
  0x75   : > { %s2558_s15 = scalar_lea.vmem %s294_s18, 16  ;;  %s2565_s6 = scalar_lea.vmem %s294_s18, 32 }
  0x76   : > { %p2559_p0 = scmp.ne.s32.totalorder %s294_s18, %s2558_s15  ;;  %p2566_p7 = scmp.lt.s32.totalorder %s294_s18, %s294_s18 }
  0x77   : > { %p2567_p9 = scmp.lt.s32.totalorder %s2565_s6, %s2558_s15 }
  0x78   : > { %p2561_p2 = pnand %p2559_p0, %p2894_p8 }
  0x79   : > { %p2568_p5 = por %p2567_p9, %p2566_p7 }
  0x7a   : > { %p2562_p4 = pneg %p2561_p2 }
  0x7c   : > { %p2569_p10 = pnand %p2568_p5, %p2562_p4 }
  0x7e   : > { %2572 = shalt.err (!%p2569_p10)
}
  0x7f   : > { %2345 = dma.hbm_to_vmem [thread:$0]  (!%p2878_p6), %s3517_s5, 16, %s294_s18, [#allocation14]  }
  0x80   : > { %s2156_s21 = sadd.s32 4294967294, %s2763_s29   ;;  %s44_s19 = sadd.s32 1, %s2759_s28 }
  0x81   : > { %p46_p8 = scmp.ge.s32.totalorder %s44_s19, 2  ;;  %s53_s11 = sadd.s32 1, %s2751_s26 }
  0x82   : > { %p60_p11 = scmp.ne.s32.totalorder %s2751_s26, %s2747_s25  ;;  %p61_p1 = scmp.eq.s32.totalorder %s2763_s29, 0 }
  0x83   : > { %s3564_s19 = smov (%p46_p8, %s44_s19), 0  ;;  %p66_p12 = scmp.ne.s32.totalorder %s2747_s25, %s2743_s24 }
  0x84   : > { %p2989_p3 = por %p61_p1, %p60_p11  ;;  %s48_s18 = ssub.s32 %s2759_s28, %s3564_s19 }
  0x85   : > { %p202_p6 = scmp.eq.s32.totalorder %s2862_s30, 1  ;;  %p51_p13 = scmp.eq.s32.totalorder %s48_s18, 0 }
  0x86   : > { %p3538_p0 = scmp.eq.s32.totalorder %s2862_s30, 0  ;;  %p208_p7 = scmp.eq.s32.totalorder %s2156_s21, 1 }
  0x87   : > { %p3004_p4 = por %p202_p6, %p60_p11  ;;  %p2364_p5 = scmp.lt.s32.totalorder %s2763_s29, 2 }
  0x88   : > { %p3000_p2 = por %p3538_p0, %p66_p12  ;;  %p3011_p9 = por %p208_p7, %p66_p12 }
  0x89   : > { %s3540_s23 = scalar_select %p3004_p4, 1, 0 }
  0x8a   : > { %s3009_s9 = scalar_select %p51_p13, %s2751_s26, %s53_s11  }
  0x8b   : > { %s3541_s10 = scalar_select %p3011_p9, 1, 0 }
  0x8c   : > { %s3017_s13 = sand.u32 1, %s2751_s26   ;;  %s2164_s15 = sshll.u32 %s2759_s28, 6 }
  0x8d   : > { %s2163_s6 = sshll.u32 %s3017_s13, 2  ;;  %s3542_s0 = sld [smem:[#allocation25_spill]] }
  0x8e   : > { %s308_s21 = scalar_lea.vmem [#allocation4], %s2163_s6  ;;  %p3028_p10 = pnand %p2364_p5, %p2989_p3 }
  0x8f   : > { %s316_s11 = sshll.u32 %s308_s21, 4  ;;  %s305_s2 = scalar_lea.sflag [#allocation5], %s3017_s13  ;;  %s3032_s11 = int_to_ptr.vmem [resolvable:$true] %s316_s11 }
  0x90   : > { %p2575_p11 = pneg %p3028_p10 }
  0x93   : > { %s3024_s18 = scalar_lea.hbm %s3542_s0, %s2164_s15  ;;  %s2578_s6 = scalar_lea.hbm %s3542_s0, 128 }
  0x94   : > { %s2573_s16 = scalar_lea.hbm %s3024_s18, 64  ;;  %p2579_p3 = scmp.lt.u32.totalorder %s3024_s18, %s3542_s0 }
  0x95   : > { %p2574_p8 = scmp.ne.s32.totalorder %s3024_s18, %s2573_s16  ;;  %p2580_p6 = scmp.lt.u32.totalorder %s2578_s6, %s2573_s16 }
  0x96   : > { %p2582_p0 = scmp.lt.u32.totalorder %s2573_s16, %s3024_s18 }
  0x97   : > { %p2576_p1 = pnand %p2575_p11, %p2574_p8  ;;  %p2581_p13 = por %p2580_p6, %p2579_p3 }
  0x99   : > { %p2577_p12 = pneg %p2576_p1  ;;  %p2583_p7 = por %p2582_p0, %p2581_p13 }
  0x9b   : > { %p2584_p5 = pnand %p2583_p7, %p2577_p12 }
  0x9d   : > { %2587 = shalt.err (!%p2584_p5)
}
  0x9e   : > { %s2588_s14 = scalar_lea.vmem %s3032_s11, 64  ;;  %s2771_s15 = smov [#allocation4]  }
  0x9f   : > { %p2589_p8 = scmp.ne.s32.totalorder %s3032_s11, %s2588_s14  ;;  %s2593_s20 = sshll.u32 %s2771_s15, 4  ;;  %s2594_s20 = int_to_ptr.vmem [resolvable:$false] %s2593_s20 }
  0xa0   : > { %s2595_s17 = scalar_lea.vmem %s2594_s20, 128  ;;  %p2596_p4 = scmp.lt.s32.totalorder %s3032_s11, %s2594_s20 }
  0xa1   : > { %p2591_p1 = pnand %p2589_p8, %p2575_p11  ;;  %p2597_p3 = scmp.lt.s32.totalorder %s2595_s17, %s2588_s14 }
  0xa3   : > { %p2592_p9 = pneg %p2591_p1  ;;  %p2598_p6 = por %p2597_p3, %p2596_p4 }
  0xa5   : > { %p2599_p13 = pnand %p2598_p6, %p2592_p9 }
  0xa7   : > { %2602 = shalt.err (!%p2599_p13)
}
  0xa8   : > { %2349 = dma.hbm_to_vmem [thread:$0]  (!%p3028_p10), %s3024_s18, 64, %s3032_s11, %s305_s2  }
  0xa9   : > { %s2221_s16 = sshll.u32 %s2759_s28, 7  ;;  %s3544_s6 = sshll.u32 %s3017_s13, 3 }
  0xaa   : > { %s327_s21 = scalar_lea.vmem [#allocation7], %s3544_s6  ;;  %s323_s20 = sand.u32 1, %s2763_s29  }
  0xab   : > { %s334_s15 = sshll.u32 %s327_s21, 4  ;;  %s3070_s0 = scalar_lea.hbm %s3513_s1, %s2221_s16  ;;  %s3064_s15 = int_to_ptr.vmem [resolvable:$true] %s334_s15 }
  0xac   : > { %s3072_s3 = scalar_lea.sflag [#allocation8], %s323_s20  ;;  %s2603_s4 = scalar_lea.hbm %s3070_s0, 128 }
  0xad   : > { %p2604_p4 = scmp.ne.s32.totalorder %s3070_s0, %s2603_s4  ;;  %s2608_s18 = scalar_lea.hbm %s3513_s1, 256 }
  0xae   : > { %p2609_p0 = scmp.lt.u32.totalorder %s3070_s0, %s3513_s1  ;;  %p2610_p7 = scmp.lt.u32.totalorder %s2608_s18, %s2603_s4 }
  0xaf   : > { %p2606_p9 = pnand %p2604_p4, %p2575_p11  ;;  %p2612_p8 = scmp.lt.u32.totalorder %s2603_s4, %s3070_s0 }
  0xb0   : > { %p2611_p5 = por %p2610_p7, %p2609_p0 }
  0xb1   : > { %p2607_p12 = pneg %p2606_p9 }
  0xb2   : > { %p2613_p1 = por %p2612_p8, %p2611_p5 }
  0xb4   : > { %p2614_p3 = pnand %p2613_p1, %p2607_p12 }
  0xb6   : > { %2617 = shalt.err (!%p2614_p3)
}
  0xb7   : > { %s2618_s16 = scalar_lea.vmem %s3064_s15, 128  ;;  %s2772_s21 = smov [#allocation7]  }
  0xb8   : > { %p2619_p6 = scmp.ne.s32.totalorder %s3064_s15, %s2618_s16  ;;  %s2623_s20 = sshll.u32 %s2772_s21, 4  ;;  %s2624_s20 = int_to_ptr.vmem [resolvable:$false] %s2623_s20 }
  0xb9   : > { %s2625_s14 = scalar_lea.vmem %s2624_s20, 256  ;;  %p2626_p9 = scmp.lt.s32.totalorder %s3064_s15, %s2624_s20 }
  0xba   : > { %p2621_p13 = pnand %p2619_p6, %p2575_p11  ;;  %p2627_p0 = scmp.lt.s32.totalorder %s2625_s14, %s2618_s16 }
  0xbc   : > { %p2622_p4 = pneg %p2621_p13  ;;  %p2628_p7 = por %p2627_p0, %p2626_p9 }
  0xbe   : > { %p2629_p5 = pnand %p2628_p7, %p2622_p4 }
  0xc0   : > { %2632 = shalt.err (!%p2629_p5)
}
  0xc1   : > { %s3545_s4 = smov 4   ;;  %s3546_s17 = smov 64  }
  0xc2   : > { %2352 = dma.hbm_to_vmem [thread:$0]  (!%p3028_p10), %s3070_s0, 128, %s3064_s15, %s3072_s3, %s3546_s17, %s3546_s17, %s3545_s4  }
  0xc3   : > { %p3547_p11 = scmp.ne.s32.totalorder %s3531_s8, 0 }
  0xc4   : > { %s3104_s2 = sand.u32 (!%p3547_p11), 1, %s2747_s25  }
  0xc5   : > { %346 = sbr.rel (%p3547_p11) target bundleno = 4688 (0x1250), region = 44  ;;  %s2169_s13 = sshll.u32 (!%p3547_p11), %s3104_s2, 2 }
  0xc6   : > { %s349_s18 = scalar_lea.sflag (!%p3547_p11), [#allocation5], %s3104_s2  ;;  %s3108_s11 = scalar_lea.vmem (!%p3547_p11), [#allocation4], %s2169_s13 }
  0xcc   : > { %2714 = dma.done.wait (%p3000_p2), %s349_s18, 64  }
  0xcd   : > { %2716 = vsyncadd (%p3000_p2), %s349_s18, 4294967232  ;;  %s357_s0 = sand.u32 1, %s2862_s30   ;;  %s2170_s3 = sshll.u32 %s3104_s2, 3 }
  0xce   : > { %s358_s8 = scalar_lea.sflag [#allocation8], %s357_s0  ;;  %s361_s12 = scalar_lea.vmem [#allocation7], %s2170_s3 }
  0xcf   : > { %2718 = dma.done.wait (%p3000_p2), %s358_s8, 128  }
  0xd0   : > { %2720 = vsyncadd (%p3000_p2), %s358_s8, 4294967168  ;;  %p3548_p10 = scmp.eq.s32.totalorder %s2862_s30, 0 }
  0xd2   : > { %2722 = dma.done.wait (%p3548_p10), [#allocation8], 256   ;;  %p3549_p12 = pmov %p3548_p10 }
  0xd3   : > { %p3550_p8 = pmov %p3548_p10 }
  0xd4   : > { %2724 = vsyncadd (%p3549_p12), [#allocation8], 4294967040 }
  0xd5   : > { %2726 = dma.done.wait (%p3550_p8), [#allocation11], 272   ;;  %p3551_p1 = pmov %p3550_p8 }
  0xd7   : > { %2728 = vsyncadd (%p3551_p1), [#allocation11], 4294967024  ;;  %p3552_p3 = pmov %p3551_p1 }
  0xd8   : > { %p3553_p6 = pmov %p3551_p1 }
  0xd9   : > { %2730 = dma.done.wait (%p3552_p3), [#allocation14], 16  }
  0xda   : > { %2732 = vsyncadd (%p3553_p6), [#allocation14], 4294967280  ;;  %v2773_v0 = vmov 0.0   ;;  %vm2774_vm0 = vmmov 0   ;;  %v2440_v1 = vld [vmem:[#allocation10] sm:$0xff]   ;;  %v2441_v2 = vld [vmem:[#allocation10 + $0x8] sm:$0xff]  }
  0xdb   : > { %2245 = vmatprep.subr.bf16.mxu0 %v2773_v0  ;;  %2253 = vmatprep.subr.bf16.mxu1 %v2773_v0  ;;  %v2442_v3 = vld [vmem:[#allocation9] sm:$0xff]   ;;  %v2444_v4 = vld [vmem:[#allocation9 + $0x8] sm:$0xff]   ;;  %v2443_v5 = vld [vmem:[%s361_s12] sm:$0xff]   ;;  %vm453_vm1 = vcmask 261120   ;;  %vm499_vm2 = vcmask 523264   ;;  %s2775_s30 = smov 120  }
  0xdc   : > { %2249 = vmatprep.mubr.msk.bf16.mxu0 %vm2774_vm0, %v2773_v0  ;;  %2257 = vmatprep.mubr.msk.bf16.mxu1 %vm2774_vm0, %v2773_v0  ;;  %v501_v6 = vld [vmem:[%s3108_s11] sm:$0xf]  ;;  %v2177_v7 = vld [vmem:[#allocation13] ss:$0 sm:$0xff]  ;;  %v2182_v9 = vld [vmem:[#allocation12] ss:$0 sm:$0xff] }
  0xdd   : > { %2246 = vmatpush3.bf16.msra.mxu0 %v2440_v1  ;;  %2254 = vmatpush3.bf16.msra.mxu1 %v2442_v3  ;;  %vm571_vm3 = vcmask 64512   ;;  %s2776_s22 = smov 104   ;;  %s2777_s15 = smov 112   ;;  %vm618_vm4 = vcmask 130048  }
  0xde   : > { %2247 = vmatprep.subr.bf16.mxu0 %v2773_v0  ;;  %2255 = vmatprep.subr.bf16.mxu1 %v2773_v0  ;;  %s2780_s6 = smov 96   ;;  %s2781_s16 = smov 80  }
  0xdf   : > { %s2782_s21 = smov 72   ;;  %s2783_s20 = smov 88  }
  0xe0   : > { %s2176_s14 = sshll.u32 %s3104_s2, 4  ;;  %s3418_s17 = scalar_lea.vmem [#allocation15], %s2170_s3 }
  0xe1   : > { %2248 = vmatpush3.bf16.msra.mxu0 %v2441_v2  ;;  %2256 = vmatpush3.bf16.msra.mxu1 %v2444_v4  ;;  %s3395_s4 = scalar_lea.vmem [#allocation16], %s2176_s14  ;;  %s2222_s13 = sshll.u32 %s2755_s27, 8 }
  0xe2   : > { %2261 = vmatprep.subr.bf16.mxu0 %v2773_v0  ;;  %2267 = vmatprep.subr.bf16.mxu1 %v2773_v0  ;;  %s1977_s18 = sshll.u32 %s3395_s4, 4  ;;  %s3427_s8 = scalar_lea.hbm %s3519_s7, %s2222_s13  ;;  %s3429_s18 = int_to_ptr.vmem [resolvable:$true] %s1977_s18 }
  0xe3   : > { %s2784_s3 = smov 8   ;;  %s1949_s12 = scalar_lea.sflag [#allocation17], %s3104_s2 }
  0xe4   : > { %2250 = vmatmul.mubr.msk.bf16.vlgmr.msra.gmra.mrb[0].mxu0 %vm453_vm1, %v2443_v5  ;;  %2258 = vmatmul.mubr.msk.bf16.vlgmr.msra.gmra.mrb[0].mxu1 %vm453_vm1, %v501_v6  ;;  %p3554_p13 = scmp.ne.s32.totalorder %s3540_s23, 0 }
  0xe5   : > { %2263 = vmatprep.mubr.msk.bf16.mxu0 %vm2774_vm0, %v2773_v0  ;;  %2269 = vmatprep.mubr.msk.bf16.mxu1 %vm2774_vm0, %v2773_v0 }
 0x1b7   : > { %v491_v8 = vpop.f32.mrb[0].mxu0  ;;  %v563_v12 = vpop.f32.mrb[0].mxu1 }
 0x1b8   : > { %v2251_v10 = vpop.f32.mrb[1].mxu0  ;;  %v492_v13 = vadd.f32 %v2177_v7, %v491_v8  ;;  %v564_v16 = vadd.f32 %v2182_v9, %v563_v12  ;;  %v2259_v17 = vpop.f32.mrb[1].mxu1 }
 0x1b9   : > { %v494_v11 = vpop.f32.mrb[2].mxu0  ;;  %v566_v18 = vpop.f32.mrb[2].mxu1  ;;  %v2779_v17 = vmov -0.5  }
 0x1ba   : > { %v495_v14 = vadd.f32 %v2177_v7, %v494_v11  ;;  %v2252_v15 = vpop.f32.mrb[3].mxu0  ;;  %v569_v20 = vpack.c.bf16 %v564_v16, %v564_v16  ;;  %v2260_v21 = vpop.f32.mrb[3].mxu1 }
 0x1bb   : > { %v2778_v15 = vmov -1.0  }
 0x1bc   : > { %v498_v19 = vpack.c.bf16 %v495_v14, %v492_v13  ;;  %622 = vrot.lane.b32.xlu1 %v569_v20, %s2775_s30 }
 0x1be   : > { %500 = vst.msk [vmem:[#allocation2] sm:$0xff] %vm499_vm2, %v498_v19 }
 0x1c5   : > { %v729_v22 = vld [vmem:[#allocation2] sm:$0xff] }
 0x1c6   : > { %733 = vrot.lane.b32.xlu1 %v729_v22, %s2776_s22  ;;  %625 = vrot.lane.b32.xlu0 %v729_v22, %s2775_s30  ;;  %v576_v23 = vsel %vm571_vm3, %v729_v22, 0  ;;  %s2633_s30 = scalar_lea.vmem %s3429_s18, 256 }
 0x1c7   : > { %2262 = vmatpush3.bf16.xpose.msra.mxu0 %v576_v23  ;;  %p2634_p2 = scmp.ne.s32.totalorder %s3429_s18, %s2633_s30 }
 0x1c8   : > { %2273 = vmatprep.subr.bf16.mxu0 %v2773_v0 }
 0x1c9   : > { %p2635_p4 = pnand %p2634_p2, %p3554_p13 }
 0x1ca   : > { %730 = vrot.lane.b32.xlu1 %v569_v20, %s2776_s22  ;;  %679 = vrot.lane.b32.xlu0 %v729_v22, %s2777_s15  ;;  %s2785_s22 = smov [#allocation16]  }
 0x1cb   : > { %p2636_p9 = pneg %p2635_p4 }
 0x1ce   : > { %676 = vrot.lane.b32.xlu0 %v569_v20, %s2777_s15  ;;  %2264 = vmatmul.mubr.msk.bf16.vlgmr.msra.gmra.mrb[4].mxu0 %vm571_vm3, %v569_v20  ;;  %s2637_s15 = sshll.u32 %s2785_s22, 4  ;;  %s2638_s15 = int_to_ptr.vmem [resolvable:$false] %s2637_s15 }
 0x1cf   : > { %2275 = vmatprep.mubr.msk.bf16.mxu0 %vm2774_vm0, %v2773_v0  ;;  %p2640_p0 = scmp.lt.s32.totalorder %s3429_s18, %s2638_s15 }
 0x22e   : > { %v623_v24 = vpop.permute.xlu1 %622 }
 0x238   : > { %v626_v25 = vpop.permute.xlu0 %625  ;;  %v734_v29 = vpop.permute.xlu1 %733 }
 0x239   : > { %v631_v26 = vsel %vm571_vm3, %v626_v25, 0  ;;  %v739_v30 = vsel %vm571_vm3, %v734_v29, 0 }
 0x23a   : > { %2268 = vmatpush3.bf16.xpose.msra.mxu1 %v631_v26 }
 0x23b   : > { %2279 = vmatprep.subr.bf16.mxu1 %v2773_v0 }
 0x23c   : > { %v680_v27 = vpop.permute.xlu0 %679  ;;  %v731_v32 = vpop.permute.xlu1 %730 }
 0x23d   : > { %v685_v28 = vsel %vm571_vm3, %v680_v27, 0 }
 0x23e   : > { %2274 = vmatpush3.bf16.xpose.msra.mxu0 %v685_v28 }
 0x23f   : > { %2285 = vmatprep.subr.bf16.mxu0 %v2773_v0 }
 0x240   : > { %v677_v31 = vpop.permute.xlu0 %676 }
 0x241   : > { %2270 = vmatmul.mubr.msk.bf16.vlgmr.msra.gmra.mrb[4].mxu1 %vm571_vm3, %v623_v24 }
 0x242   : > { %2280 = vmatpush3.bf16.xpose.msra.mxu1 %v739_v30  ;;  %2281 = vmatprep.mubr.msk.bf16.mxu1 %vm2774_vm0, %v2773_v0 }
 0x243   : > { %2291 = vmatprep.subr.bf16.mxu1 %v2773_v0 }
 0x245   : > { %2276 = vmatmul.mubr.msk.bf16.vlgmr.msra.gmra.mrb[8].mxu0 %vm571_vm3, %v677_v31 }
 0x246   : > { %2287 = vmatprep.mubr.msk.bf16.mxu0 %vm2774_vm0, %v2773_v0 }
 0x249   : > { %2282 = vmatmul.mubr.msk.bf16.vlgmr.msra.gmra.mrb[8].mxu1 %vm571_vm3, %v731_v32 }
 0x24a   : > { %2293 = vmatprep.mubr.msk.bf16.mxu1 %vm2774_vm0, %v2773_v0 }
 0x2a1   : > { %v612_v33 = vpop.f32.mrb[4].mxu0 }
 0x2a2   : > { %619 = vst.msk [vmem:[#allocation3] sm:$0xff] %vm618_vm4, %v612_v33  ;;  %v2265_v34 = vpop.f32.mrb[5].mxu0 }
 0x2a3   : > { %v615_v35 = vpop.f32.mrb[6].mxu0 }
 0x2a4   : > { %v2266_v36 = vpop.f32.mrb[7].mxu0 }
 0x2a9   : > { %v783_v37 = vld [vmem:[#allocation3] sm:$0xff] }
 0x2aa   : > { %v787_v38 = vsel %vm618_vm4, %v783_v37, -inf }
 0x2ab   : > { %788 = vmax.xlane.f32.xlu0 %v787_v38 }
 0x314   : > { %v667_v39 = vpop.f32.mrb[4].mxu1 }
 0x315   : > { %674 = vst.msk [vmem:[#allocation3 + $0x8] sm:$0xff] %vm618_vm4, %v667_v39  ;;  %v2271_v40 = vpop.f32.mrb[5].mxu1 }
 0x316   : > { %v670_v41 = vpop.f32.mrb[6].mxu1 }
 0x317   : > { %v2272_v42 = vpop.f32.mrb[7].mxu1 }
 0x318   : > { %v721_v43 = vpop.f32.mrb[8].mxu0 }
 0x319   : > { %728 = vst.msk [vmem:[#allocation3 + $0x10] sm:$0xff] %vm618_vm4, %v721_v43  ;;  %v2277_v44 = vpop.f32.mrb[9].mxu0 }
 0x31a   : > { %v724_v45 = vpop.f32.mrb[10].mxu0 }
 0x31b   : > { %v2278_v46 = vpop.f32.mrb[11].mxu0 }
 0x31c   : > { %v775_v47 = vpop.f32.mrb[8].mxu1  ;;  %v784_v48 = vld [vmem:[#allocation3 + $0x8] sm:$0xff] }
 0x31d   : > { %782 = vst.msk [vmem:[#allocation3 + $0x18] sm:$0xff] %vm618_vm4, %v775_v47  ;;  %v2283_v49 = vpop.f32.mrb[9].mxu1  ;;  %v790_v50 = vsel %vm618_vm4, %v784_v48, -inf }
 0x31e   : > { %791 = vmax.xlane.f32.xlu1 %v790_v50  ;;  %v778_v51 = vpop.f32.mrb[10].mxu1 }
 0x31f   : > { %v2284_v52 = vpop.f32.mrb[11].mxu1 }
 0x320   : > { %v785_v53 = vld [vmem:[#allocation3 + $0x10] sm:$0xff] }
 0x321   : > { %v793_v54 = vsel %vm618_vm4, %v785_v53, -inf }
 0x322   : > { %794 = vmax.xlane.f32.xlu0 %v793_v54 }
 0x324   : > { %v786_v55 = vld [vmem:[#allocation3 + $0x18] sm:$0xff] }
 0x325   : > { %v796_v56 = vsel %vm618_vm4, %v786_v55, -inf }
 0x326   : > { %797 = vmax.xlane.f32.xlu0 %v796_v56 }
 0x338   : > { %v789_v57 = vpop.xlane.xlu0 %788 }
 0x339   : > { %v3177_v58 = vsub.f32 %v783_v37, %v789_v57 }
 0x33b   : > { %v2190_v59 = vadd.f32 0.5, %v3177_v58 }
 0x33d   : > { %v807_v60 = vmax.f32 %v2190_v59, 0.0 }
 0x33f   : > { %v811_v61 = vsel %vm618_vm4, %v807_v60, 0.0 }
 0x340   : > { %812 = vadd.xlane.f32.xlu1 %v811_v61 }
 0x3ab   : > { %v792_v62 = vpop.xlane.xlu1 %791 }
 0x3ac   : > { %v3181_v63 = vsub.f32 %v784_v48, %v792_v62 }
 0x3ae   : > { %v2191_v1 = vadd.f32 0.5, %v3181_v63 }
 0x3af   : > { %v795_v2 = vpop.xlane.xlu0 %794 }
 0x3b0   : > { %v3184_v3 = vsub.f32 %v785_v53, %v795_v2  ;;  %v808_v4 = vmax.f32 %v2191_v1, 0.0 }
 0x3b2   : > { %v814_v5 = vsel %vm618_vm4, %v808_v4, 0.0  ;;  %v2192_v6 = vadd.f32 0.5, %v3184_v3 }
 0x3b3   : > { %815 = vadd.xlane.f32.xlu0 %v814_v5  ;;  %v798_v7 = vpop.xlane.xlu0 %797 }
 0x3b4   : > { %v3188_v8 = vsub.f32 %v786_v55, %v798_v7  ;;  %v809_v9 = vmax.f32 %v2192_v6, 0.0 }
 0x3b6   : > { %v817_v10 = vsel %vm618_vm4, %v809_v9, 0.0  ;;  %v2193_v11 = vadd.f32 0.5, %v3188_v8 }
 0x3b7   : > { %818 = vadd.xlane.f32.xlu1 %v817_v10 }
 0x3b8   : > { %v810_v12 = vmax.f32 %v2193_v11, 0.0 }
 0x3ba   : > { %v820_v13 = vsel %vm618_vm4, %v810_v12, 0.0 }
 0x3bb   : > { %821 = vadd.xlane.f32.xlu0 %v820_v13 }
 0x3cd   : > { %v813_v14 = vpop.xlane.xlu1 %812 }
 0x3ce   : > { %vm823_vm5 = vcmp.ge.f32.partialorder %v813_v14, 1.0 }
 0x3cf   : > { %v827_v16 = vsel %vm823_vm5, -0.5, %v2778_v15  ;;  %v831_v18 = vsel %vm823_vm5, 0.0, %v2779_v17 }
 0x3d0   : > { %v835_v19 = vadd.f32 %v831_v18, %v827_v16 }
 0x3d2   : > { %v839_v20 = vmul.f32 0.5, %v835_v19 }
 0x3d4   : > { %v843_v21 = vsub.f32 %v3177_v58, %v839_v20 }
 0x3d6   : > { %v847_v22 = vmax.f32 %v843_v21, 0.0 }
 0x3d8   : > { %v851_v23 = vsel %vm618_vm4, %v847_v22, 0.0 }
 0x3d9   : > { %852 = vadd.xlane.f32.xlu1 %v851_v23 }
 0x440   : > { %v816_v24 = vpop.xlane.xlu0 %815 }
 0x441   : > { %vm824_vm6 = vcmp.ge.f32.partialorder %v816_v24, 1.0 }
 0x442   : > { %v828_v25 = vsel %vm824_vm6, -0.5, %v2778_v15  ;;  %v832_v26 = vsel %vm824_vm6, 0.0, %v2779_v17 }
 0x443   : > { %v836_v27 = vadd.f32 %v832_v26, %v828_v25 }
 0x444   : > { %v819_v28 = vpop.xlane.xlu1 %818 }
 0x445   : > { %v840_v29 = vmul.f32 0.5, %v836_v27  ;;  %vm825_vm7 = vcmp.ge.f32.partialorder %v819_v28, 1.0 }
 0x446   : > { %v829_v30 = vsel %vm825_vm7, -0.5, %v2778_v15  ;;  %v833_v31 = vsel %vm825_vm7, 0.0, %v2779_v17 }
 0x447   : > { %v837_v32 = vadd.f32 %v833_v31, %v829_v30  ;;  %v844_v33 = vsub.f32 %v3181_v63, %v840_v29 }
 0x448   : > { %v822_v34 = vpop.xlane.xlu0 %821 }
 0x449   : > { %v841_v35 = vmul.f32 0.5, %v837_v32  ;;  %vm826_vm8 = vcmp.ge.f32.partialorder %v822_v34, 1.0  ;;  %v848_v36 = vmax.f32 %v844_v33, 0.0 }
 0x44a   : > { %v830_v37 = vsel %vm826_vm8, -0.5, %v2778_v15  ;;  %v834_v38 = vsel %vm826_vm8, 0.0, %v2779_v17 }
 0x44b   : > { %v838_v39 = vadd.f32 %v834_v38, %v830_v37  ;;  %v854_v40 = vsel %vm618_vm4, %v848_v36, 0.0  ;;  %v845_v41 = vsub.f32 %v3184_v3, %v841_v35 }
 0x44c   : > { %855 = vadd.xlane.f32.xlu0 %v854_v40 }
 0x44d   : > { %v842_v42 = vmul.f32 0.5, %v838_v39  ;;  %v849_v43 = vmax.f32 %v845_v41, 0.0 }
 0x44f   : > { %v857_v44 = vsel %vm618_vm4, %v849_v43, 0.0  ;;  %v846_v45 = vsub.f32 %v3188_v8, %v842_v42 }
 0x450   : > { %858 = vadd.xlane.f32.xlu1 %v857_v44 }
 0x451   : > { %v850_v46 = vmax.f32 %v846_v45, 0.0 }
 0x453   : > { %v860_v47 = vsel %vm618_vm4, %v850_v46, 0.0 }
 0x454   : > { %861 = vadd.xlane.f32.xlu0 %v860_v47 }
 0x466   : > { %v853_v48 = vpop.xlane.xlu1 %852 }
 0x467   : > { %vm863_vm9 = vcmp.ge.f32.partialorder %v853_v48, 1.0 }
 0x468   : > { %v867_v49 = vsel %vm863_vm9, %v839_v20, %v827_v16  ;;  %v871_v50 = vsel %vm863_vm9, %v831_v18, %v839_v20 }
 0x469   : > { %v875_v51 = vadd.f32 %v871_v50, %v867_v49 }
 0x46b   : > { %v879_v52 = vmul.f32 0.5, %v875_v51 }
 0x46d   : > { %v883_v53 = vsub.f32 %v3177_v58, %v879_v52 }
 0x46f   : > { %v887_v54 = vmax.f32 %v883_v53, 0.0 }
 0x471   : > { %v891_v55 = vsel %vm618_vm4, %v887_v54, 0.0 }
 0x472   : > { %892 = vadd.xlane.f32.xlu1 %v891_v55 }
 0x4d9   : > { %v856_v56 = vpop.xlane.xlu0 %855 }
 0x4da   : > { %vm864_vm10 = vcmp.ge.f32.partialorder %v856_v56, 1.0 }
 0x4db   : > { %v868_v57 = vsel %vm864_vm10, %v840_v29, %v828_v25  ;;  %v872_v59 = vsel %vm864_vm10, %v832_v26, %v840_v29 }
 0x4dc   : > { %v876_v60 = vadd.f32 %v872_v59, %v868_v57 }
 0x4dd   : > { %v859_v61 = vpop.xlane.xlu1 %858 }
 0x4de   : > { %v880_v62 = vmul.f32 0.5, %v876_v60  ;;  %vm865_vm11 = vcmp.ge.f32.partialorder %v859_v61, 1.0 }
 0x4df   : > { %v869_v1 = vsel %vm865_vm11, %v841_v35, %v829_v30  ;;  %v873_v2 = vsel %vm865_vm11, %v833_v31, %v841_v35 }
 0x4e0   : > { %v877_v4 = vadd.f32 %v873_v2, %v869_v1  ;;  %v884_v5 = vsub.f32 %v3181_v63, %v880_v62 }
 0x4e1   : > { %v862_v6 = vpop.xlane.xlu0 %861 }
 0x4e2   : > { %v881_v7 = vmul.f32 0.5, %v877_v4  ;;  %vm866_vm12 = vcmp.ge.f32.partialorder %v862_v6, 1.0  ;;  %v888_v9 = vmax.f32 %v884_v5, 0.0 }
 0x4e3   : > { %v870_v10 = vsel %vm866_vm12, %v842_v42, %v830_v37  ;;  %v874_v11 = vsel %vm866_vm12, %v834_v38, %v842_v42 }
 0x4e4   : > { %v878_v12 = vadd.f32 %v874_v11, %v870_v10  ;;  %v894_v13 = vsel %vm618_vm4, %v888_v9, 0.0  ;;  %v885_v14 = vsub.f32 %v3184_v3, %v881_v7 }
 0x4e5   : > { %895 = vadd.xlane.f32.xlu0 %v894_v13 }
 0x4e6   : > { %v882_v15 = vmul.f32 0.5, %v878_v12  ;;  %v889_v16 = vmax.f32 %v885_v14, 0.0 }
 0x4e8   : > { %v897_v17 = vsel %vm618_vm4, %v889_v16, 0.0  ;;  %v886_v18 = vsub.f32 %v3188_v8, %v882_v15 }
 0x4e9   : > { %898 = vadd.xlane.f32.xlu1 %v897_v17 }
 0x4ea   : > { %v890_v19 = vmax.f32 %v886_v18, 0.0 }
 0x4ec   : > { %v900_v20 = vsel %vm618_vm4, %v890_v19, 0.0 }
 0x4ed   : > { %901 = vadd.xlane.f32.xlu0 %v900_v20 }
 0x4ff   : > { %v893_v21 = vpop.xlane.xlu1 %892 }
 0x500   : > { %vm903_vm13 = vcmp.ge.f32.partialorder %v893_v21, 1.0 }
 0x501   : > { %v907_v22 = vsel %vm903_vm13, %v879_v52, %v867_v49  ;;  %v911_v23 = vsel %vm903_vm13, %v871_v50, %v879_v52 }
 0x502   : > { %v915_v24 = vadd.f32 %v911_v23, %v907_v22 }
 0x504   : > { %v919_v25 = vmul.f32 0.5, %v915_v24 }
 0x506   : > { %v923_v26 = vsub.f32 %v3177_v58, %v919_v25 }
 0x508   : > { %v927_v27 = vmax.f32 %v923_v26, 0.0 }
 0x50a   : > { %v931_v28 = vsel %vm618_vm4, %v927_v27, 0.0 }
 0x50b   : > { %932 = vadd.xlane.f32.xlu1 %v931_v28 }
 0x572   : > { %v896_v29 = vpop.xlane.xlu0 %895 }
 0x573   : > { %vm904_vm14 = vcmp.ge.f32.partialorder %v896_v29, 1.0 }
 0x574   : > { %v908_v30 = vsel %vm904_vm14, %v880_v62, %v868_v57  ;;  %v912_v31 = vsel %vm904_vm14, %v872_v59, %v880_v62 }
 0x575   : > { %v916_v32 = vadd.f32 %v912_v31, %v908_v30 }
 0x576   : > { %v899_v33 = vpop.xlane.xlu1 %898 }
 0x577   : > { %v920_v34 = vmul.f32 0.5, %v916_v32  ;;  %vm905_vm15 = vcmp.ge.f32.partialorder %v899_v33, 1.0 }
 0x578   : > { %v909_v35 = vsel %vm905_vm15, %v881_v7, %v869_v1  ;;  %v913_v36 = vsel %vm905_vm15, %v873_v2, %v881_v7 }
 0x579   : > { %v917_v37 = vadd.f32 %v913_v36, %v909_v35  ;;  %v924_v38 = vsub.f32 %v3181_v63, %v920_v34 }
 0x57a   : > { %v902_v39 = vpop.xlane.xlu0 %901 }
 0x57b   : > { %v921_v40 = vmul.f32 0.5, %v917_v37  ;;  %vm906_vm1 = vcmp.ge.f32.partialorder %v902_v39, 1.0  ;;  %v928_v41 = vmax.f32 %v924_v38, 0.0 }
 0x57c   : > { %v910_v42 = vsel %vm906_vm1, %v882_v15, %v870_v10  ;;  %v914_v43 = vsel %vm906_vm1, %v874_v11, %v882_v15 }
 0x57d   : > { %v918_v44 = vadd.f32 %v914_v43, %v910_v42  ;;  %v934_v45 = vsel %vm618_vm4, %v928_v41, 0.0  ;;  %v925_v46 = vsub.f32 %v3184_v3, %v921_v40 }
 0x57e   : > { %935 = vadd.xlane.f32.xlu0 %v934_v45 }
 0x57f   : > { %v922_v47 = vmul.f32 0.5, %v918_v44  ;;  %v929_v48 = vmax.f32 %v925_v46, 0.0 }
 0x581   : > { %v937_v49 = vsel %vm618_vm4, %v929_v48, 0.0  ;;  %v926_v50 = vsub.f32 %v3188_v8, %v922_v47 }
 0x582   : > { %938 = vadd.xlane.f32.xlu1 %v937_v49 }
 0x583   : > { %v930_v51 = vmax.f32 %v926_v50, 0.0 }
 0x585   : > { %v940_v52 = vsel %vm618_vm4, %v930_v51, 0.0 }
 0x586   : > { %941 = vadd.xlane.f32.xlu0 %v940_v52 }
 0x598   : > { %v933_v53 = vpop.xlane.xlu1 %932 }
 0x599   : > { %vm943_vm2 = vcmp.ge.f32.partialorder %v933_v53, 1.0 }
 0x59a   : > { %v947_v54 = vsel %vm943_vm2, %v919_v25, %v907_v22  ;;  %v951_v55 = vsel %vm943_vm2, %v911_v23, %v919_v25 }
 0x59b   : > { %v955_v56 = vadd.f32 %v951_v55, %v947_v54 }
 0x59d   : > { %v959_v57 = vmul.f32 0.5, %v955_v56 }
 0x59f   : > { %v963_v59 = vsub.f32 %v3177_v58, %v959_v57 }
 0x5a1   : > { %v967_v60 = vmax.f32 %v963_v59, 0.0 }
 0x5a3   : > { %v971_v61 = vsel %vm618_vm4, %v967_v60, 0.0 }
 0x5a4   : > { %972 = vadd.xlane.f32.xlu1 %v971_v61 }
 0x60b   : > { %v936_v62 = vpop.xlane.xlu0 %935 }
 0x60c   : > { %vm944_vm5 = vcmp.ge.f32.partialorder %v936_v62, 1.0 }
 0x60d   : > { %v948_v1 = vsel %vm944_vm5, %v920_v34, %v908_v30  ;;  %v952_v2 = vsel %vm944_vm5, %v912_v31, %v920_v34 }
 0x60e   : > { %v956_v4 = vadd.f32 %v952_v2, %v948_v1 }
 0x60f   : > { %v939_v5 = vpop.xlane.xlu1 %938 }
 0x610   : > { %v960_v6 = vmul.f32 0.5, %v956_v4  ;;  %vm945_vm6 = vcmp.ge.f32.partialorder %v939_v5, 1.0 }
 0x611   : > { %v949_v7 = vsel %vm945_vm6, %v921_v40, %v909_v35  ;;  %v953_v9 = vsel %vm945_vm6, %v913_v36, %v921_v40 }
 0x612   : > { %v957_v10 = vadd.f32 %v953_v9, %v949_v7  ;;  %v964_v11 = vsub.f32 %v3181_v63, %v960_v6 }
 0x613   : > { %v942_v12 = vpop.xlane.xlu0 %941 }
 0x614   : > { %v961_v13 = vmul.f32 0.5, %v957_v10  ;;  %vm946_vm7 = vcmp.ge.f32.partialorder %v942_v12, 1.0  ;;  %v968_v14 = vmax.f32 %v964_v11, 0.0 }
 0x615   : > { %v950_v15 = vsel %vm946_vm7, %v922_v47, %v910_v42  ;;  %v954_v16 = vsel %vm946_vm7, %v914_v43, %v922_v47 }
 0x616   : > { %v958_v17 = vadd.f32 %v954_v16, %v950_v15  ;;  %v974_v18 = vsel %vm618_vm4, %v968_v14, 0.0  ;;  %v965_v19 = vsub.f32 %v3184_v3, %v961_v13 }
 0x617   : > { %975 = vadd.xlane.f32.xlu0 %v974_v18 }
 0x618   : > { %v962_v20 = vmul.f32 0.5, %v958_v17  ;;  %v969_v21 = vmax.f32 %v965_v19, 0.0 }
 0x61a   : > { %v977_v22 = vsel %vm618_vm4, %v969_v21, 0.0  ;;  %v966_v23 = vsub.f32 %v3188_v8, %v962_v20 }
 0x61b   : > { %978 = vadd.xlane.f32.xlu1 %v977_v22 }
 0x61c   : > { %v970_v24 = vmax.f32 %v966_v23, 0.0 }
 0x61e   : > { %v980_v25 = vsel %vm618_vm4, %v970_v24, 0.0 }
 0x61f   : > { %981 = vadd.xlane.f32.xlu0 %v980_v25 }
 0x631   : > { %v973_v26 = vpop.xlane.xlu1 %972 }
 0x632   : > { %vm983_vm8 = vcmp.ge.f32.partialorder %v973_v26, 1.0 }
 0x633   : > { %v987_v27 = vsel %vm983_vm8, %v959_v57, %v947_v54  ;;  %v991_v28 = vsel %vm983_vm8, %v951_v55, %v959_v57 }
 0x634   : > { %v995_v29 = vadd.f32 %v991_v28, %v987_v27 }
 0x636   : > { %v999_v30 = vmul.f32 0.5, %v995_v29 }
 0x638   : > { %v1003_v31 = vsub.f32 %v3177_v58, %v999_v30 }
 0x63a   : > { %v1007_v32 = vmax.f32 %v1003_v31, 0.0 }
 0x63c   : > { %v1011_v33 = vsel %vm618_vm4, %v1007_v32, 0.0 }
 0x63d   : > { %1012 = vadd.xlane.f32.xlu1 %v1011_v33 }
 0x6a4   : > { %v976_v34 = vpop.xlane.xlu0 %975 }
 0x6a5   : > { %vm984_vm9 = vcmp.ge.f32.partialorder %v976_v34, 1.0 }
 0x6a6   : > { %v988_v35 = vsel %vm984_vm9, %v960_v6, %v948_v1  ;;  %v992_v36 = vsel %vm984_vm9, %v952_v2, %v960_v6 }
 0x6a7   : > { %v996_v37 = vadd.f32 %v992_v36, %v988_v35 }
 0x6a8   : > { %v979_v38 = vpop.xlane.xlu1 %978 }
 0x6a9   : > { %v1000_v39 = vmul.f32 0.5, %v996_v37  ;;  %vm985_vm10 = vcmp.ge.f32.partialorder %v979_v38, 1.0 }
 0x6aa   : > { %v989_v40 = vsel %vm985_vm10, %v961_v13, %v949_v7  ;;  %v993_v41 = vsel %vm985_vm10, %v953_v9, %v961_v13 }
 0x6ab   : > { %v997_v42 = vadd.f32 %v993_v41, %v989_v40  ;;  %v1004_v43 = vsub.f32 %v3181_v63, %v1000_v39 }
 0x6ac   : > { %v982_v44 = vpop.xlane.xlu0 %981 }
 0x6ad   : > { %v1001_v45 = vmul.f32 0.5, %v997_v42  ;;  %vm986_vm11 = vcmp.ge.f32.partialorder %v982_v44, 1.0  ;;  %v1008_v46 = vmax.f32 %v1004_v43, 0.0 }
 0x6ae   : > { %v990_v47 = vsel %vm986_vm11, %v962_v20, %v950_v15  ;;  %v994_v48 = vsel %vm986_vm11, %v954_v16, %v962_v20 }
 0x6af   : > { %v998_v49 = vadd.f32 %v994_v48, %v990_v47  ;;  %v1014_v50 = vsel %vm618_vm4, %v1008_v46, 0.0  ;;  %v1005_v51 = vsub.f32 %v3184_v3, %v1001_v45 }
 0x6b0   : > { %1015 = vadd.xlane.f32.xlu0 %v1014_v50 }
 0x6b1   : > { %v1002_v52 = vmul.f32 0.5, %v998_v49  ;;  %v1009_v53 = vmax.f32 %v1005_v51, 0.0 }
 0x6b3   : > { %v1017_v54 = vsel %vm618_vm4, %v1009_v53, 0.0  ;;  %v1006_v55 = vsub.f32 %v3188_v8, %v1002_v52 }
 0x6b4   : > { %1018 = vadd.xlane.f32.xlu1 %v1017_v54 }
 0x6b5   : > { %v1010_v56 = vmax.f32 %v1006_v55, 0.0 }
 0x6b7   : > { %v1020_v57 = vsel %vm618_vm4, %v1010_v56, 0.0 }
 0x6b8   : > { %1021 = vadd.xlane.f32.xlu0 %v1020_v57 }
 0x6ca   : > { %v1013_v59 = vpop.xlane.xlu1 %1012 }
 0x6cb   : > { %vm1023_vm12 = vcmp.ge.f32.partialorder %v1013_v59, 1.0 }
 0x6cc   : > { %v1027_v60 = vsel %vm1023_vm12, %v999_v30, %v987_v27  ;;  %v1031_v61 = vsel %vm1023_vm12, %v991_v28, %v999_v30 }
 0x6cd   : > { %v1035_v62 = vadd.f32 %v1031_v61, %v1027_v60 }
 0x6cf   : > { %v1039_v1 = vmul.f32 0.5, %v1035_v62 }
 0x6d1   : > { %v1043_v2 = vsub.f32 %v3177_v58, %v1039_v1 }
 0x6d3   : > { %v1047_v4 = vmax.f32 %v1043_v2, 0.0 }
 0x6d5   : > { %v1051_v5 = vsel %vm618_vm4, %v1047_v4, 0.0 }
 0x6d6   : > { %1052 = vadd.xlane.f32.xlu1 %v1051_v5 }
 0x73d   : > { %v1016_v6 = vpop.xlane.xlu0 %1015 }
 0x73e   : > { %vm1024_vm13 = vcmp.ge.f32.partialorder %v1016_v6, 1.0 }
 0x73f   : > { %v1028_v7 = vsel %vm1024_vm13, %v1000_v39, %v988_v35  ;;  %v1032_v9 = vsel %vm1024_vm13, %v992_v36, %v1000_v39 }
 0x740   : > { %v1036_v10 = vadd.f32 %v1032_v9, %v1028_v7 }
 0x741   : > { %v1019_v11 = vpop.xlane.xlu1 %1018 }
 0x742   : > { %v1040_v12 = vmul.f32 0.5, %v1036_v10  ;;  %vm1025_vm14 = vcmp.ge.f32.partialorder %v1019_v11, 1.0 }
 0x743   : > { %v1029_v13 = vsel %vm1025_vm14, %v1001_v45, %v989_v40  ;;  %v1033_v14 = vsel %vm1025_vm14, %v993_v41, %v1001_v45 }
 0x744   : > { %v1037_v15 = vadd.f32 %v1033_v14, %v1029_v13  ;;  %v1044_v16 = vsub.f32 %v3181_v63, %v1040_v12 }
 0x745   : > { %v1022_v17 = vpop.xlane.xlu0 %1021 }
 0x746   : > { %v1041_v18 = vmul.f32 0.5, %v1037_v15  ;;  %vm1026_vm15 = vcmp.ge.f32.partialorder %v1022_v17, 1.0  ;;  %v1048_v19 = vmax.f32 %v1044_v16, 0.0 }
 0x747   : > { %v1030_v20 = vsel %vm1026_vm15, %v1002_v52, %v990_v47  ;;  %v1034_v21 = vsel %vm1026_vm15, %v994_v48, %v1002_v52 }
 0x748   : > { %v1038_v22 = vadd.f32 %v1034_v21, %v1030_v20  ;;  %v1054_v23 = vsel %vm618_vm4, %v1048_v19, 0.0  ;;  %v1045_v24 = vsub.f32 %v3184_v3, %v1041_v18 }
 0x749   : > { %1055 = vadd.xlane.f32.xlu0 %v1054_v23 }
 0x74a   : > { %v1042_v25 = vmul.f32 0.5, %v1038_v22  ;;  %v1049_v26 = vmax.f32 %v1045_v24, 0.0 }
 0x74c   : > { %v1057_v27 = vsel %vm618_vm4, %v1049_v26, 0.0  ;;  %v1046_v28 = vsub.f32 %v3188_v8, %v1042_v25 }
 0x74d   : > { %1058 = vadd.xlane.f32.xlu1 %v1057_v27 }
 0x74e   : > { %v1050_v29 = vmax.f32 %v1046_v28, 0.0 }
 0x750   : > { %v1060_v30 = vsel %vm618_vm4, %v1050_v29, 0.0 }
 0x751   : > { %1061 = vadd.xlane.f32.xlu0 %v1060_v30 }
 0x763   : > { %v1053_v31 = vpop.xlane.xlu1 %1052 }
 0x764   : > { %vm1063_vm1 = vcmp.ge.f32.partialorder %v1053_v31, 1.0 }
 0x765   : > { %v1067_v32 = vsel %vm1063_vm1, %v1039_v1, %v1027_v60  ;;  %v1071_v33 = vsel %vm1063_vm1, %v1031_v61, %v1039_v1 }
 0x766   : > { %v1075_v34 = vadd.f32 %v1071_v33, %v1067_v32 }
 0x768   : > { %v1079_v35 = vmul.f32 0.5, %v1075_v34 }
 0x76a   : > { %v1083_v36 = vsub.f32 %v3177_v58, %v1079_v35 }
 0x76c   : > { %v1087_v37 = vmax.f32 %v1083_v36, 0.0 }
 0x76e   : > { %v1091_v38 = vsel %vm618_vm4, %v1087_v37, 0.0 }
 0x76f   : > { %1092 = vadd.xlane.f32.xlu1 %v1091_v38 }
 0x7d6   : > { %v1056_v39 = vpop.xlane.xlu0 %1055 }
 0x7d7   : > { %vm1064_vm2 = vcmp.ge.f32.partialorder %v1056_v39, 1.0 }
 0x7d8   : > { %v1068_v40 = vsel %vm1064_vm2, %v1040_v12, %v1028_v7  ;;  %v1072_v41 = vsel %vm1064_vm2, %v1032_v9, %v1040_v12 }
 0x7d9   : > { %v1076_v42 = vadd.f32 %v1072_v41, %v1068_v40 }
 0x7da   : > { %v1059_v43 = vpop.xlane.xlu1 %1058 }
 0x7db   : > { %v1080_v44 = vmul.f32 0.5, %v1076_v42  ;;  %vm1065_vm5 = vcmp.ge.f32.partialorder %v1059_v43, 1.0 }
 0x7dc   : > { %v1069_v45 = vsel %vm1065_vm5, %v1041_v18, %v1029_v13  ;;  %v1073_v46 = vsel %vm1065_vm5, %v1033_v14, %v1041_v18 }
 0x7dd   : > { %v1077_v47 = vadd.f32 %v1073_v46, %v1069_v45  ;;  %v1084_v48 = vsub.f32 %v3181_v63, %v1080_v44 }
 0x7de   : > { %v1062_v49 = vpop.xlane.xlu0 %1061 }
 0x7df   : > { %v1081_v50 = vmul.f32 0.5, %v1077_v47  ;;  %vm1066_vm6 = vcmp.ge.f32.partialorder %v1062_v49, 1.0  ;;  %v1088_v51 = vmax.f32 %v1084_v48, 0.0 }
 0x7e0   : > { %v1070_v52 = vsel %vm1066_vm6, %v1042_v25, %v1030_v20  ;;  %v1074_v53 = vsel %vm1066_vm6, %v1034_v21, %v1042_v25 }
 0x7e1   : > { %v1078_v54 = vadd.f32 %v1074_v53, %v1070_v52  ;;  %v1094_v55 = vsel %vm618_vm4, %v1088_v51, 0.0  ;;  %v1085_v56 = vsub.f32 %v3184_v3, %v1081_v50 }
 0x7e2   : > { %1095 = vadd.xlane.f32.xlu0 %v1094_v55 }
 0x7e3   : > { %v1082_v57 = vmul.f32 0.5, %v1078_v54  ;;  %v1089_v59 = vmax.f32 %v1085_v56, 0.0 }
 0x7e5   : > { %v1097_v60 = vsel %vm618_vm4, %v1089_v59, 0.0  ;;  %v1086_v61 = vsub.f32 %v3188_v8, %v1082_v57 }
 0x7e6   : > { %1098 = vadd.xlane.f32.xlu1 %v1097_v60 }
 0x7e7   : > { %v1090_v62 = vmax.f32 %v1086_v61, 0.0 }
 0x7e9   : > { %v1100_v1 = vsel %vm618_vm4, %v1090_v62, 0.0 }
 0x7ea   : > { %1101 = vadd.xlane.f32.xlu0 %v1100_v1 }
 0x7fc   : > { %v1093_v2 = vpop.xlane.xlu1 %1092 }
 0x7fd   : > { %vm1103_vm7 = vcmp.ge.f32.partialorder %v1093_v2, 1.0 }
 0x7fe   : > { %v1107_v4 = vsel %vm1103_vm7, %v1079_v35, %v1067_v32  ;;  %v1111_v5 = vsel %vm1103_vm7, %v1071_v33, %v1079_v35 }
 0x7ff   : > { %v1115_v6 = vadd.f32 %v1111_v5, %v1107_v4 }
 0x801   : > { %v1119_v7 = vmul.f32 0.5, %v1115_v6 }
 0x803   : > { %v1123_v9 = vsub.f32 %v3177_v58, %v1119_v7 }
 0x805   : > { %v1127_v10 = vmax.f32 %v1123_v9, 0.0 }
 0x807   : > { %v1131_v11 = vsel %vm618_vm4, %v1127_v10, 0.0 }
 0x808   : > { %1132 = vadd.xlane.f32.xlu1 %v1131_v11 }
 0x86f   : > { %v1096_v12 = vpop.xlane.xlu0 %1095 }
 0x870   : > { %vm1104_vm8 = vcmp.ge.f32.partialorder %v1096_v12, 1.0 }
 0x871   : > { %v1108_v13 = vsel %vm1104_vm8, %v1080_v44, %v1068_v40  ;;  %v1112_v14 = vsel %vm1104_vm8, %v1072_v41, %v1080_v44 }
 0x872   : > { %v1116_v15 = vadd.f32 %v1112_v14, %v1108_v13 }
 0x873   : > { %v1099_v16 = vpop.xlane.xlu1 %1098 }
 0x874   : > { %v1120_v17 = vmul.f32 0.5, %v1116_v15  ;;  %vm1105_vm9 = vcmp.ge.f32.partialorder %v1099_v16, 1.0 }
 0x875   : > { %v1109_v18 = vsel %vm1105_vm9, %v1081_v50, %v1069_v45  ;;  %v1113_v19 = vsel %vm1105_vm9, %v1073_v46, %v1081_v50 }
 0x876   : > { %v1117_v20 = vadd.f32 %v1113_v19, %v1109_v18  ;;  %v1124_v21 = vsub.f32 %v3181_v63, %v1120_v17 }
 0x877   : > { %v1102_v22 = vpop.xlane.xlu0 %1101 }
 0x878   : > { %v1121_v23 = vmul.f32 0.5, %v1117_v20  ;;  %vm1106_vm10 = vcmp.ge.f32.partialorder %v1102_v22, 1.0  ;;  %v1128_v24 = vmax.f32 %v1124_v21, 0.0 }
 0x879   : > { %v1110_v25 = vsel %vm1106_vm10, %v1082_v57, %v1070_v52  ;;  %v1114_v26 = vsel %vm1106_vm10, %v1074_v53, %v1082_v57 }
 0x87a   : > { %v1118_v27 = vadd.f32 %v1114_v26, %v1110_v25  ;;  %v1134_v28 = vsel %vm618_vm4, %v1128_v24, 0.0  ;;  %v1125_v29 = vsub.f32 %v3184_v3, %v1121_v23 }
 0x87b   : > { %1135 = vadd.xlane.f32.xlu0 %v1134_v28 }
 0x87c   : > { %v1122_v30 = vmul.f32 0.5, %v1118_v27  ;;  %v1129_v31 = vmax.f32 %v1125_v29, 0.0 }
 0x87e   : > { %v1137_v32 = vsel %vm618_vm4, %v1129_v31, 0.0  ;;  %v1126_v33 = vsub.f32 %v3188_v8, %v1122_v30 }
 0x87f   : > { %1138 = vadd.xlane.f32.xlu1 %v1137_v32 }
 0x880   : > { %v1130_v34 = vmax.f32 %v1126_v33, 0.0 }
 0x882   : > { %v1140_v35 = vsel %vm618_vm4, %v1130_v34, 0.0 }
 0x883   : > { %1141 = vadd.xlane.f32.xlu0 %v1140_v35 }
 0x895   : > { %v1133_v36 = vpop.xlane.xlu1 %1132 }
 0x896   : > { %vm1143_vm11 = vcmp.ge.f32.partialorder %v1133_v36, 1.0 }
 0x897   : > { %v1147_v37 = vsel %vm1143_vm11, %v1119_v7, %v1107_v4  ;;  %v1151_v38 = vsel %vm1143_vm11, %v1111_v5, %v1119_v7 }
 0x898   : > { %v1155_v39 = vadd.f32 %v1151_v38, %v1147_v37 }
 0x89a   : > { %v1159_v40 = vmul.f32 0.5, %v1155_v39 }
 0x89c   : > { %v1163_v41 = vsub.f32 %v3177_v58, %v1159_v40 }
 0x89e   : > { %v1167_v42 = vmax.f32 %v1163_v41, 0.0 }
 0x8a0   : > { %v1171_v43 = vsel %vm618_vm4, %v1167_v42, 0.0 }
 0x8a1   : > { %1172 = vadd.xlane.f32.xlu1 %v1171_v43 }
 0x908   : > { %v1136_v44 = vpop.xlane.xlu0 %1135 }
 0x909   : > { %vm1144_vm12 = vcmp.ge.f32.partialorder %v1136_v44, 1.0 }
 0x90a   : > { %v1148_v45 = vsel %vm1144_vm12, %v1120_v17, %v1108_v13  ;;  %v1152_v46 = vsel %vm1144_vm12, %v1112_v14, %v1120_v17 }
 0x90b   : > { %v1156_v47 = vadd.f32 %v1152_v46, %v1148_v45 }
 0x90c   : > { %v1139_v48 = vpop.xlane.xlu1 %1138 }
 0x90d   : > { %v1160_v49 = vmul.f32 0.5, %v1156_v47  ;;  %vm1145_vm13 = vcmp.ge.f32.partialorder %v1139_v48, 1.0 }
 0x90e   : > { %v1149_v50 = vsel %vm1145_vm13, %v1121_v23, %v1109_v18  ;;  %v1153_v51 = vsel %vm1145_vm13, %v1113_v19, %v1121_v23 }
 0x90f   : > { %v1157_v52 = vadd.f32 %v1153_v51, %v1149_v50  ;;  %v1164_v53 = vsub.f32 %v3181_v63, %v1160_v49 }
 0x910   : > { %v1142_v54 = vpop.xlane.xlu0 %1141 }
 0x911   : > { %v1161_v55 = vmul.f32 0.5, %v1157_v52  ;;  %vm1146_vm14 = vcmp.ge.f32.partialorder %v1142_v54, 1.0  ;;  %v1168_v56 = vmax.f32 %v1164_v53, 0.0 }
 0x912   : > { %v1150_v57 = vsel %vm1146_vm14, %v1122_v30, %v1110_v25  ;;  %v1154_v59 = vsel %vm1146_vm14, %v1114_v26, %v1122_v30 }
 0x913   : > { %v1158_v60 = vadd.f32 %v1154_v59, %v1150_v57  ;;  %v1174_v61 = vsel %vm618_vm4, %v1168_v56, 0.0  ;;  %v1165_v62 = vsub.f32 %v3184_v3, %v1161_v55 }
 0x914   : > { %1175 = vadd.xlane.f32.xlu0 %v1174_v61 }
 0x915   : > { %v1162_v1 = vmul.f32 0.5, %v1158_v60  ;;  %v1169_v2 = vmax.f32 %v1165_v62, 0.0 }
 0x917   : > { %v1177_v4 = vsel %vm618_vm4, %v1169_v2, 0.0  ;;  %v1166_v5 = vsub.f32 %v3188_v8, %v1162_v1 }
 0x918   : > { %1178 = vadd.xlane.f32.xlu1 %v1177_v4 }
 0x919   : > { %v1170_v6 = vmax.f32 %v1166_v5, 0.0 }
 0x91b   : > { %v1180_v7 = vsel %vm618_vm4, %v1170_v6, 0.0 }
 0x91c   : > { %1181 = vadd.xlane.f32.xlu0 %v1180_v7 }
 0x92e   : > { %v1173_v9 = vpop.xlane.xlu1 %1172 }
 0x92f   : > { %vm1183_vm15 = vcmp.ge.f32.partialorder %v1173_v9, 1.0 }
 0x930   : > { %v1187_v10 = vsel %vm1183_vm15, %v1159_v40, %v1147_v37  ;;  %v1191_v11 = vsel %vm1183_vm15, %v1151_v38, %v1159_v40 }
 0x931   : > { %v1195_v12 = vadd.f32 %v1191_v11, %v1187_v10 }
 0x933   : > { %v1199_v13 = vmul.f32 0.5, %v1195_v12 }
 0x935   : > { %v1203_v14 = vsub.f32 %v3177_v58, %v1199_v13 }
 0x937   : > { %v1207_v15 = vmax.f32 %v1203_v14, 0.0 }
 0x939   : > { %v1211_v16 = vsel %vm618_vm4, %v1207_v15, 0.0 }
 0x93a   : > { %1212 = vadd.xlane.f32.xlu1 %v1211_v16 }
 0x9a1   : > { %v1176_v17 = vpop.xlane.xlu0 %1175 }
 0x9a2   : > { %vm1184_vm1 = vcmp.ge.f32.partialorder %v1176_v17, 1.0 }
 0x9a3   : > { %v1188_v18 = vsel %vm1184_vm1, %v1160_v49, %v1148_v45  ;;  %v1192_v19 = vsel %vm1184_vm1, %v1152_v46, %v1160_v49 }
 0x9a4   : > { %v1196_v20 = vadd.f32 %v1192_v19, %v1188_v18 }
 0x9a5   : > { %v1179_v21 = vpop.xlane.xlu1 %1178 }
 0x9a6   : > { %v1200_v22 = vmul.f32 0.5, %v1196_v20  ;;  %vm1185_vm2 = vcmp.ge.f32.partialorder %v1179_v21, 1.0 }
 0x9a7   : > { %v1189_v23 = vsel %vm1185_vm2, %v1161_v55, %v1149_v50  ;;  %v1193_v24 = vsel %vm1185_vm2, %v1153_v51, %v1161_v55 }
 0x9a8   : > { %v1197_v25 = vadd.f32 %v1193_v24, %v1189_v23  ;;  %v1204_v26 = vsub.f32 %v3181_v63, %v1200_v22 }
 0x9a9   : > { %v1182_v27 = vpop.xlane.xlu0 %1181 }
 0x9aa   : > { %v1201_v28 = vmul.f32 0.5, %v1197_v25  ;;  %vm1186_vm5 = vcmp.ge.f32.partialorder %v1182_v27, 1.0  ;;  %v1208_v29 = vmax.f32 %v1204_v26, 0.0 }
 0x9ab   : > { %v1190_v30 = vsel %vm1186_vm5, %v1162_v1, %v1150_v57  ;;  %v1194_v31 = vsel %vm1186_vm5, %v1154_v59, %v1162_v1 }
 0x9ac   : > { %v1198_v32 = vadd.f32 %v1194_v31, %v1190_v30  ;;  %v1214_v33 = vsel %vm618_vm4, %v1208_v29, 0.0  ;;  %v1205_v34 = vsub.f32 %v3184_v3, %v1201_v28 }
 0x9ad   : > { %1215 = vadd.xlane.f32.xlu0 %v1214_v33 }
 0x9ae   : > { %v1202_v35 = vmul.f32 0.5, %v1198_v32  ;;  %v1209_v36 = vmax.f32 %v1205_v34, 0.0 }
 0x9b0   : > { %v1217_v37 = vsel %vm618_vm4, %v1209_v36, 0.0  ;;  %v1206_v38 = vsub.f32 %v3188_v8, %v1202_v35 }
 0x9b1   : > { %1218 = vadd.xlane.f32.xlu1 %v1217_v37 }
 0x9b2   : > { %v1210_v39 = vmax.f32 %v1206_v38, 0.0 }
 0x9b4   : > { %v1220_v40 = vsel %vm618_vm4, %v1210_v39, 0.0 }
 0x9b5   : > { %1221 = vadd.xlane.f32.xlu0 %v1220_v40 }
 0x9c7   : > { %v1213_v41 = vpop.xlane.xlu1 %1212 }
 0x9c8   : > { %vm1223_vm6 = vcmp.ge.f32.partialorder %v1213_v41, 1.0 }
 0x9c9   : > { %v1227_v42 = vsel %vm1223_vm6, %v1199_v13, %v1187_v10  ;;  %v1231_v43 = vsel %vm1223_vm6, %v1191_v11, %v1199_v13 }
 0x9ca   : > { %v1235_v44 = vadd.f32 %v1231_v43, %v1227_v42 }
 0x9cc   : > { %v1239_v45 = vmul.f32 0.5, %v1235_v44 }
 0x9ce   : > { %v1243_v46 = vsub.f32 %v3177_v58, %v1239_v45 }
 0x9d0   : > { %v1247_v47 = vmax.f32 %v1243_v46, 0.0 }
 0x9d2   : > { %v1251_v48 = vsel %vm618_vm4, %v1247_v47, 0.0 }
 0x9d3   : > { %1252 = vadd.xlane.f32.xlu1 %v1251_v48 }
 0xa3a   : > { %v1216_v49 = vpop.xlane.xlu0 %1215 }
 0xa3b   : > { %vm1224_vm7 = vcmp.ge.f32.partialorder %v1216_v49, 1.0 }
 0xa3c   : > { %v1228_v50 = vsel %vm1224_vm7, %v1200_v22, %v1188_v18  ;;  %v1232_v51 = vsel %vm1224_vm7, %v1192_v19, %v1200_v22 }
 0xa3d   : > { %v1236_v52 = vadd.f32 %v1232_v51, %v1228_v50 }
 0xa3e   : > { %v1219_v53 = vpop.xlane.xlu1 %1218 }
 0xa3f   : > { %v1240_v54 = vmul.f32 0.5, %v1236_v52  ;;  %vm1225_vm8 = vcmp.ge.f32.partialorder %v1219_v53, 1.0 }
 0xa40   : > { %v1229_v55 = vsel %vm1225_vm8, %v1201_v28, %v1189_v23  ;;  %v1233_v56 = vsel %vm1225_vm8, %v1193_v24, %v1201_v28 }
 0xa41   : > { %v1237_v57 = vadd.f32 %v1233_v56, %v1229_v55  ;;  %v1244_v59 = vsub.f32 %v3181_v63, %v1240_v54 }
 0xa42   : > { %v1222_v60 = vpop.xlane.xlu0 %1221 }
 0xa43   : > { %v1241_v61 = vmul.f32 0.5, %v1237_v57  ;;  %vm1226_vm9 = vcmp.ge.f32.partialorder %v1222_v60, 1.0  ;;  %v1248_v62 = vmax.f32 %v1244_v59, 0.0 }
 0xa44   : > { %v1230_v1 = vsel %vm1226_vm9, %v1202_v35, %v1190_v30  ;;  %v1234_v2 = vsel %vm1226_vm9, %v1194_v31, %v1202_v35 }
 0xa45   : > { %v1238_v4 = vadd.f32 %v1234_v2, %v1230_v1  ;;  %v1254_v5 = vsel %vm618_vm4, %v1248_v62, 0.0  ;;  %v1245_v6 = vsub.f32 %v3184_v3, %v1241_v61 }
 0xa46   : > { %1255 = vadd.xlane.f32.xlu0 %v1254_v5 }
 0xa47   : > { %v1242_v7 = vmul.f32 0.5, %v1238_v4  ;;  %v1249_v9 = vmax.f32 %v1245_v6, 0.0 }
 0xa49   : > { %v1257_v10 = vsel %vm618_vm4, %v1249_v9, 0.0  ;;  %v1246_v11 = vsub.f32 %v3188_v8, %v1242_v7 }
 0xa4a   : > { %1258 = vadd.xlane.f32.xlu1 %v1257_v10 }
 0xa4b   : > { %v1250_v12 = vmax.f32 %v1246_v11, 0.0 }
 0xa4d   : > { %v1260_v13 = vsel %vm618_vm4, %v1250_v12, 0.0 }
 0xa4e   : > { %1261 = vadd.xlane.f32.xlu0 %v1260_v13 }
 0xa60   : > { %v1253_v14 = vpop.xlane.xlu1 %1252 }
 0xa61   : > { %vm1263_vm10 = vcmp.ge.f32.partialorder %v1253_v14, 1.0 }
 0xa62   : > { %v1267_v15 = vsel %vm1263_vm10, %v1239_v45, %v1227_v42  ;;  %v1271_v16 = vsel %vm1263_vm10, %v1231_v43, %v1239_v45 }
 0xa63   : > { %v1275_v17 = vadd.f32 %v1271_v16, %v1267_v15 }
 0xa65   : > { %v1279_v18 = vmul.f32 0.5, %v1275_v17 }
 0xa67   : > { %v1283_v19 = vsub.f32 %v3177_v58, %v1279_v18 }
 0xa69   : > { %v1287_v20 = vmax.f32 %v1283_v19, 0.0 }
 0xa6b   : > { %v1291_v21 = vsel %vm618_vm4, %v1287_v20, 0.0 }
 0xa6c   : > { %1292 = vadd.xlane.f32.xlu1 %v1291_v21 }
 0xad3   : > { %v1256_v22 = vpop.xlane.xlu0 %1255 }
 0xad4   : > { %vm1264_vm11 = vcmp.ge.f32.partialorder %v1256_v22, 1.0 }
 0xad5   : > { %v1268_v23 = vsel %vm1264_vm11, %v1240_v54, %v1228_v50  ;;  %v1272_v24 = vsel %vm1264_vm11, %v1232_v51, %v1240_v54 }
 0xad6   : > { %v1276_v25 = vadd.f32 %v1272_v24, %v1268_v23 }
 0xad7   : > { %v1259_v26 = vpop.xlane.xlu1 %1258 }
 0xad8   : > { %v1280_v27 = vmul.f32 0.5, %v1276_v25  ;;  %vm1265_vm12 = vcmp.ge.f32.partialorder %v1259_v26, 1.0 }
 0xad9   : > { %v1269_v28 = vsel %vm1265_vm12, %v1241_v61, %v1229_v55  ;;  %v1273_v29 = vsel %vm1265_vm12, %v1233_v56, %v1241_v61 }
 0xada   : > { %v1277_v30 = vadd.f32 %v1273_v29, %v1269_v28  ;;  %v1284_v31 = vsub.f32 %v3181_v63, %v1280_v27 }
 0xadb   : > { %v1262_v32 = vpop.xlane.xlu0 %1261 }
 0xadc   : > { %v1281_v33 = vmul.f32 0.5, %v1277_v30  ;;  %vm1266_vm13 = vcmp.ge.f32.partialorder %v1262_v32, 1.0  ;;  %v1288_v34 = vmax.f32 %v1284_v31, 0.0 }
 0xadd   : > { %v1270_v35 = vsel %vm1266_vm13, %v1242_v7, %v1230_v1  ;;  %v1274_v36 = vsel %vm1266_vm13, %v1234_v2, %v1242_v7 }
 0xade   : > { %v1278_v37 = vadd.f32 %v1274_v36, %v1270_v35  ;;  %v1294_v38 = vsel %vm618_vm4, %v1288_v34, 0.0  ;;  %v1285_v39 = vsub.f32 %v3184_v3, %v1281_v33 }
 0xadf   : > { %1295 = vadd.xlane.f32.xlu0 %v1294_v38 }
 0xae0   : > { %v1282_v40 = vmul.f32 0.5, %v1278_v37  ;;  %v1289_v41 = vmax.f32 %v1285_v39, 0.0 }
 0xae2   : > { %v1297_v42 = vsel %vm618_vm4, %v1289_v41, 0.0  ;;  %v1286_v43 = vsub.f32 %v3188_v8, %v1282_v40 }
 0xae3   : > { %1298 = vadd.xlane.f32.xlu1 %v1297_v42 }
 0xae4   : > { %v1290_v44 = vmax.f32 %v1286_v43, 0.0 }
 0xae6   : > { %v1300_v45 = vsel %vm618_vm4, %v1290_v44, 0.0 }
 0xae7   : > { %1301 = vadd.xlane.f32.xlu0 %v1300_v45 }
 0xaf9   : > { %v1293_v46 = vpop.xlane.xlu1 %1292 }
 0xafa   : > { %vm1303_vm14 = vcmp.ge.f32.partialorder %v1293_v46, 1.0 }
 0xafb   : > { %v1307_v47 = vsel %vm1303_vm14, %v1279_v18, %v1267_v15  ;;  %v1311_v48 = vsel %vm1303_vm14, %v1271_v16, %v1279_v18 }
 0xafc   : > { %v1315_v49 = vadd.f32 %v1311_v48, %v1307_v47 }
 0xafe   : > { %v1319_v50 = vmul.f32 0.5, %v1315_v49 }
 0xb00   : > { %v1323_v51 = vsub.f32 %v3177_v58, %v1319_v50 }
 0xb02   : > { %v1327_v52 = vmax.f32 %v1323_v51, 0.0 }
 0xb04   : > { %v1331_v53 = vsel %vm618_vm4, %v1327_v52, 0.0 }
 0xb05   : > { %1332 = vadd.xlane.f32.xlu1 %v1331_v53 }
 0xb6c   : > { %v1296_v54 = vpop.xlane.xlu0 %1295 }
 0xb6d   : > { %vm1304_vm15 = vcmp.ge.f32.partialorder %v1296_v54, 1.0 }
 0xb6e   : > { %v1308_v55 = vsel %vm1304_vm15, %v1280_v27, %v1268_v23  ;;  %v1312_v56 = vsel %vm1304_vm15, %v1272_v24, %v1280_v27 }
 0xb6f   : > { %v1316_v57 = vadd.f32 %v1312_v56, %v1308_v55 }
 0xb70   : > { %v1299_v59 = vpop.xlane.xlu1 %1298 }
 0xb71   : > { %v1320_v60 = vmul.f32 0.5, %v1316_v57  ;;  %vm1305_vm1 = vcmp.ge.f32.partialorder %v1299_v59, 1.0 }
 0xb72   : > { %v1309_v61 = vsel %vm1305_vm1, %v1281_v33, %v1269_v28  ;;  %v1313_v62 = vsel %vm1305_vm1, %v1273_v29, %v1281_v33 }
 0xb73   : > { %v1317_v1 = vadd.f32 %v1313_v62, %v1309_v61  ;;  %v1324_v2 = vsub.f32 %v3181_v63, %v1320_v60 }
 0xb74   : > { %v1302_v4 = vpop.xlane.xlu0 %1301 }
 0xb75   : > { %v1321_v5 = vmul.f32 0.5, %v1317_v1  ;;  %vm1306_vm2 = vcmp.ge.f32.partialorder %v1302_v4, 1.0  ;;  %v1328_v6 = vmax.f32 %v1324_v2, 0.0 }
 0xb76   : > { %v1310_v7 = vsel %vm1306_vm2, %v1282_v40, %v1270_v35  ;;  %v1314_v9 = vsel %vm1306_vm2, %v1274_v36, %v1282_v40 }
 0xb77   : > { %v1318_v10 = vadd.f32 %v1314_v9, %v1310_v7  ;;  %v1334_v11 = vsel %vm618_vm4, %v1328_v6, 0.0  ;;  %v1325_v12 = vsub.f32 %v3184_v3, %v1321_v5 }
 0xb78   : > { %1335 = vadd.xlane.f32.xlu0 %v1334_v11 }
 0xb79   : > { %v1322_v13 = vmul.f32 0.5, %v1318_v10  ;;  %v1329_v14 = vmax.f32 %v1325_v12, 0.0 }
 0xb7b   : > { %v1337_v15 = vsel %vm618_vm4, %v1329_v14, 0.0  ;;  %v1326_v16 = vsub.f32 %v3188_v8, %v1322_v13 }
 0xb7c   : > { %1338 = vadd.xlane.f32.xlu1 %v1337_v15 }
 0xb7d   : > { %v1330_v17 = vmax.f32 %v1326_v16, 0.0 }
 0xb7f   : > { %v1340_v18 = vsel %vm618_vm4, %v1330_v17, 0.0 }
 0xb80   : > { %1341 = vadd.xlane.f32.xlu0 %v1340_v18 }
 0xb92   : > { %v1333_v19 = vpop.xlane.xlu1 %1332 }
 0xb93   : > { %vm1343_vm5 = vcmp.ge.f32.partialorder %v1333_v19, 1.0 }
 0xb94   : > { %v1347_v20 = vsel %vm1343_vm5, %v1319_v50, %v1307_v47  ;;  %v1351_v21 = vsel %vm1343_vm5, %v1311_v48, %v1319_v50 }
 0xb95   : > { %v1355_v22 = vadd.f32 %v1351_v21, %v1347_v20 }
 0xb97   : > { %v1359_v23 = vmul.f32 0.5, %v1355_v22 }
 0xb99   : > { %v1363_v24 = vsub.f32 %v3177_v58, %v1359_v23 }
 0xb9b   : > { %v1367_v25 = vmax.f32 %v1363_v24, 0.0 }
 0xb9d   : > { %v1371_v26 = vsel %vm618_vm4, %v1367_v25, 0.0 }
 0xb9e   : > { %1372 = vadd.xlane.f32.xlu1 %v1371_v26 }
 0xc05   : > { %v1336_v27 = vpop.xlane.xlu0 %1335 }
 0xc06   : > { %vm1344_vm6 = vcmp.ge.f32.partialorder %v1336_v27, 1.0 }
 0xc07   : > { %v1348_v28 = vsel %vm1344_vm6, %v1320_v60, %v1308_v55  ;;  %v1352_v29 = vsel %vm1344_vm6, %v1312_v56, %v1320_v60 }
 0xc08   : > { %v1356_v30 = vadd.f32 %v1352_v29, %v1348_v28 }
 0xc09   : > { %v1339_v31 = vpop.xlane.xlu1 %1338 }
 0xc0a   : > { %v1360_v32 = vmul.f32 0.5, %v1356_v30  ;;  %vm1345_vm7 = vcmp.ge.f32.partialorder %v1339_v31, 1.0 }
 0xc0b   : > { %v1349_v33 = vsel %vm1345_vm7, %v1321_v5, %v1309_v61  ;;  %v1353_v34 = vsel %vm1345_vm7, %v1313_v62, %v1321_v5 }
 0xc0c   : > { %v1357_v35 = vadd.f32 %v1353_v34, %v1349_v33  ;;  %v1364_v36 = vsub.f32 %v3181_v63, %v1360_v32 }
 0xc0d   : > { %v1342_v37 = vpop.xlane.xlu0 %1341 }
 0xc0e   : > { %v1361_v38 = vmul.f32 0.5, %v1357_v35  ;;  %vm1346_vm8 = vcmp.ge.f32.partialorder %v1342_v37, 1.0  ;;  %v1368_v39 = vmax.f32 %v1364_v36, 0.0 }
 0xc0f   : > { %v1350_v40 = vsel %vm1346_vm8, %v1322_v13, %v1310_v7  ;;  %v1354_v41 = vsel %vm1346_vm8, %v1314_v9, %v1322_v13 }
 0xc10   : > { %v1358_v42 = vadd.f32 %v1354_v41, %v1350_v40  ;;  %v1374_v43 = vsel %vm618_vm4, %v1368_v39, 0.0  ;;  %v1365_v44 = vsub.f32 %v3184_v3, %v1361_v38 }
 0xc11   : > { %1375 = vadd.xlane.f32.xlu0 %v1374_v43 }
 0xc12   : > { %v1362_v45 = vmul.f32 0.5, %v1358_v42  ;;  %v1369_v46 = vmax.f32 %v1365_v44, 0.0 }
 0xc14   : > { %v1377_v47 = vsel %vm618_vm4, %v1369_v46, 0.0  ;;  %v1366_v48 = vsub.f32 %v3188_v8, %v1362_v45 }
 0xc15   : > { %1378 = vadd.xlane.f32.xlu1 %v1377_v47 }
 0xc16   : > { %v1370_v49 = vmax.f32 %v1366_v48, 0.0 }
 0xc18   : > { %v1380_v50 = vsel %vm618_vm4, %v1370_v49, 0.0 }
 0xc19   : > { %1381 = vadd.xlane.f32.xlu0 %v1380_v50 }
 0xc2b   : > { %v1373_v51 = vpop.xlane.xlu1 %1372 }
 0xc2c   : > { %vm1383_vm9 = vcmp.ge.f32.partialorder %v1373_v51, 1.0 }
 0xc2d   : > { %v1387_v52 = vsel %vm1383_vm9, %v1359_v23, %v1347_v20  ;;  %v1391_v53 = vsel %vm1383_vm9, %v1351_v21, %v1359_v23 }
 0xc2e   : > { %v1395_v54 = vadd.f32 %v1391_v53, %v1387_v52 }
 0xc30   : > { %v1399_v55 = vmul.f32 0.5, %v1395_v54 }
 0xc32   : > { %v1403_v56 = vsub.f32 %v3177_v58, %v1399_v55 }
 0xc34   : > { %v1407_v57 = vmax.f32 %v1403_v56, 0.0 }
 0xc36   : > { %v1411_v59 = vsel %vm618_vm4, %v1407_v57, 0.0 }
 0xc37   : > { %1412 = vadd.xlane.f32.xlu1 %v1411_v59 }
 0xc9e   : > { %v1376_v60 = vpop.xlane.xlu0 %1375 }
 0xc9f   : > { %vm1384_vm10 = vcmp.ge.f32.partialorder %v1376_v60, 1.0 }
 0xca0   : > { %v1388_v61 = vsel %vm1384_vm10, %v1360_v32, %v1348_v28  ;;  %v1392_v62 = vsel %vm1384_vm10, %v1352_v29, %v1360_v32 }
 0xca1   : > { %v1396_v1 = vadd.f32 %v1392_v62, %v1388_v61 }
 0xca2   : > { %v1379_v2 = vpop.xlane.xlu1 %1378 }
 0xca3   : > { %v1400_v4 = vmul.f32 0.5, %v1396_v1  ;;  %vm1385_vm11 = vcmp.ge.f32.partialorder %v1379_v2, 1.0 }
 0xca4   : > { %v1389_v5 = vsel %vm1385_vm11, %v1361_v38, %v1349_v33  ;;  %v1393_v6 = vsel %vm1385_vm11, %v1353_v34, %v1361_v38 }
 0xca5   : > { %v1397_v7 = vadd.f32 %v1393_v6, %v1389_v5  ;;  %v1404_v9 = vsub.f32 %v3181_v63, %v1400_v4 }
 0xca6   : > { %v1382_v10 = vpop.xlane.xlu0 %1381 }
 0xca7   : > { %v1401_v11 = vmul.f32 0.5, %v1397_v7  ;;  %vm1386_vm12 = vcmp.ge.f32.partialorder %v1382_v10, 1.0  ;;  %v1408_v12 = vmax.f32 %v1404_v9, 0.0 }
 0xca8   : > { %v1390_v13 = vsel %vm1386_vm12, %v1362_v45, %v1350_v40  ;;  %v1394_v14 = vsel %vm1386_vm12, %v1354_v41, %v1362_v45 }
 0xca9   : > { %v1398_v15 = vadd.f32 %v1394_v14, %v1390_v13  ;;  %v1414_v16 = vsel %vm618_vm4, %v1408_v12, 0.0  ;;  %v1405_v17 = vsub.f32 %v3184_v3, %v1401_v11 }
 0xcaa   : > { %1415 = vadd.xlane.f32.xlu0 %v1414_v16 }
 0xcab   : > { %v1402_v18 = vmul.f32 0.5, %v1398_v15  ;;  %v1409_v19 = vmax.f32 %v1405_v17, 0.0 }
 0xcad   : > { %v1417_v20 = vsel %vm618_vm4, %v1409_v19, 0.0  ;;  %v1406_v21 = vsub.f32 %v3188_v8, %v1402_v18 }
 0xcae   : > { %1418 = vadd.xlane.f32.xlu1 %v1417_v20 }
 0xcaf   : > { %v1410_v22 = vmax.f32 %v1406_v21, 0.0 }
 0xcb1   : > { %v1420_v23 = vsel %vm618_vm4, %v1410_v22, 0.0 }
 0xcb2   : > { %1421 = vadd.xlane.f32.xlu0 %v1420_v23 }
 0xcc4   : > { %v1413_v24 = vpop.xlane.xlu1 %1412 }
 0xcc5   : > { %vm1423_vm13 = vcmp.ge.f32.partialorder %v1413_v24, 1.0 }
 0xcc6   : > { %v1427_v25 = vsel %vm1423_vm13, %v1399_v55, %v1387_v52  ;;  %v1431_v26 = vsel %vm1423_vm13, %v1391_v53, %v1399_v55 }
 0xcc7   : > { %v1435_v27 = vadd.f32 %v1431_v26, %v1427_v25 }
 0xcc9   : > { %v1439_v28 = vmul.f32 0.5, %v1435_v27 }
 0xccb   : > { %v1443_v29 = vsub.f32 %v3177_v58, %v1439_v28 }
 0xccd   : > { %v1447_v30 = vmax.f32 %v1443_v29, 0.0 }
 0xccf   : > { %v1451_v31 = vsel %vm618_vm4, %v1447_v30, 0.0 }
 0xcd0   : > { %1452 = vadd.xlane.f32.xlu1 %v1451_v31 }
 0xd37   : > { %v1416_v32 = vpop.xlane.xlu0 %1415 }
 0xd38   : > { %vm1424_vm14 = vcmp.ge.f32.partialorder %v1416_v32, 1.0 }
 0xd39   : > { %v1428_v33 = vsel %vm1424_vm14, %v1400_v4, %v1388_v61  ;;  %v1432_v34 = vsel %vm1424_vm14, %v1392_v62, %v1400_v4 }
 0xd3a   : > { %v1436_v35 = vadd.f32 %v1432_v34, %v1428_v33 }
 0xd3b   : > { %v1419_v36 = vpop.xlane.xlu1 %1418 }
 0xd3c   : > { %v1440_v37 = vmul.f32 0.5, %v1436_v35  ;;  %vm1425_vm15 = vcmp.ge.f32.partialorder %v1419_v36, 1.0 }
 0xd3d   : > { %v1429_v38 = vsel %vm1425_vm15, %v1401_v11, %v1389_v5  ;;  %v1433_v39 = vsel %vm1425_vm15, %v1393_v6, %v1401_v11 }
 0xd3e   : > { %v1437_v40 = vadd.f32 %v1433_v39, %v1429_v38  ;;  %v1444_v41 = vsub.f32 %v3181_v63, %v1440_v37 }
 0xd3f   : > { %v1422_v42 = vpop.xlane.xlu0 %1421 }
 0xd40   : > { %v1441_v43 = vmul.f32 0.5, %v1437_v40  ;;  %vm1426_vm1 = vcmp.ge.f32.partialorder %v1422_v42, 1.0  ;;  %v1448_v44 = vmax.f32 %v1444_v41, 0.0 }
 0xd41   : > { %v1430_v45 = vsel %vm1426_vm1, %v1402_v18, %v1390_v13  ;;  %v1434_v46 = vsel %vm1426_vm1, %v1394_v14, %v1402_v18 }
 0xd42   : > { %v1438_v47 = vadd.f32 %v1434_v46, %v1430_v45  ;;  %v1454_v48 = vsel %vm618_vm4, %v1448_v44, 0.0  ;;  %v1445_v49 = vsub.f32 %v3184_v3, %v1441_v43 }
 0xd43   : > { %1455 = vadd.xlane.f32.xlu0 %v1454_v48 }
 0xd44   : > { %v1442_v50 = vmul.f32 0.5, %v1438_v47  ;;  %v1449_v51 = vmax.f32 %v1445_v49, 0.0 }
 0xd46   : > { %v1457_v52 = vsel %vm618_vm4, %v1449_v51, 0.0  ;;  %v1446_v53 = vsub.f32 %v3188_v8, %v1442_v50 }
 0xd47   : > { %1458 = vadd.xlane.f32.xlu1 %v1457_v52 }
 0xd48   : > { %v1450_v54 = vmax.f32 %v1446_v53, 0.0 }
 0xd4a   : > { %v1460_v55 = vsel %vm618_vm4, %v1450_v54, 0.0 }
 0xd4b   : > { %1461 = vadd.xlane.f32.xlu0 %v1460_v55 }
 0xd5d   : > { %v1453_v56 = vpop.xlane.xlu1 %1452 }
 0xd5e   : > { %vm1463_vm2 = vcmp.ge.f32.partialorder %v1453_v56, 1.0 }
 0xd5f   : > { %v1467_v57 = vsel %vm1463_vm2, %v1439_v28, %v1427_v25  ;;  %v1471_v59 = vsel %vm1463_vm2, %v1431_v26, %v1439_v28 }
 0xd60   : > { %v1475_v60 = vadd.f32 %v1471_v59, %v1467_v57 }
 0xd62   : > { %v1479_v61 = vmul.f32 0.5, %v1475_v60 }
 0xd64   : > { %v1483_v62 = vsub.f32 %v3177_v58, %v1479_v61 }
 0xd66   : > { %v1487_v1 = vmax.f32 %v1483_v62, 0.0 }
 0xd68   : > { %v1491_v2 = vsel %vm618_vm4, %v1487_v1, 0.0 }
 0xd69   : > { %1492 = vadd.xlane.f32.xlu1 %v1491_v2 }
 0xdd0   : > { %v1456_v4 = vpop.xlane.xlu0 %1455 }
 0xdd1   : > { %vm1464_vm5 = vcmp.ge.f32.partialorder %v1456_v4, 1.0 }
 0xdd2   : > { %v1468_v5 = vsel %vm1464_vm5, %v1440_v37, %v1428_v33  ;;  %v1472_v6 = vsel %vm1464_vm5, %v1432_v34, %v1440_v37 }
 0xdd3   : > { %v1476_v7 = vadd.f32 %v1472_v6, %v1468_v5 }
 0xdd4   : > { %v1459_v9 = vpop.xlane.xlu1 %1458 }
 0xdd5   : > { %v1480_v10 = vmul.f32 0.5, %v1476_v7  ;;  %vm1465_vm6 = vcmp.ge.f32.partialorder %v1459_v9, 1.0 }
 0xdd6   : > { %v1469_v11 = vsel %vm1465_vm6, %v1441_v43, %v1429_v38  ;;  %v1473_v12 = vsel %vm1465_vm6, %v1433_v39, %v1441_v43 }
 0xdd7   : > { %v1477_v13 = vadd.f32 %v1473_v12, %v1469_v11  ;;  %v1484_v14 = vsub.f32 %v3181_v63, %v1480_v10 }
 0xdd8   : > { %v1462_v15 = vpop.xlane.xlu0 %1461 }
 0xdd9   : > { %v1481_v16 = vmul.f32 0.5, %v1477_v13  ;;  %vm1466_vm7 = vcmp.ge.f32.partialorder %v1462_v15, 1.0  ;;  %v1488_v17 = vmax.f32 %v1484_v14, 0.0 }
 0xdda   : > { %v1470_v18 = vsel %vm1466_vm7, %v1442_v50, %v1430_v45  ;;  %v1474_v19 = vsel %vm1466_vm7, %v1434_v46, %v1442_v50 }
 0xddb   : > { %v1478_v20 = vadd.f32 %v1474_v19, %v1470_v18  ;;  %v1494_v21 = vsel %vm618_vm4, %v1488_v17, 0.0  ;;  %v1485_v22 = vsub.f32 %v3184_v3, %v1481_v16 }
 0xddc   : > { %1495 = vadd.xlane.f32.xlu0 %v1494_v21 }
 0xddd   : > { %v1482_v23 = vmul.f32 0.5, %v1478_v20  ;;  %v1489_v24 = vmax.f32 %v1485_v22, 0.0 }
 0xddf   : > { %v1497_v25 = vsel %vm618_vm4, %v1489_v24, 0.0  ;;  %v1486_v26 = vsub.f32 %v3188_v8, %v1482_v23 }
 0xde0   : > { %1498 = vadd.xlane.f32.xlu1 %v1497_v25 }
 0xde1   : > { %v1490_v27 = vmax.f32 %v1486_v26, 0.0 }
 0xde3   : > { %v1500_v28 = vsel %vm618_vm4, %v1490_v27, 0.0 }
 0xde4   : > { %1501 = vadd.xlane.f32.xlu0 %v1500_v28 }
 0xdf6   : > { %v1493_v29 = vpop.xlane.xlu1 %1492 }
 0xdf7   : > { %vm1503_vm8 = vcmp.ge.f32.partialorder %v1493_v29, 1.0 }
 0xdf8   : > { %v1507_v30 = vsel %vm1503_vm8, %v1479_v61, %v1467_v57  ;;  %v1511_v31 = vsel %vm1503_vm8, %v1471_v59, %v1479_v61 }
 0xdf9   : > { %v1515_v32 = vadd.f32 %v1511_v31, %v1507_v30 }
 0xdfb   : > { %v1519_v33 = vmul.f32 0.5, %v1515_v32 }
 0xdfd   : > { %v1523_v34 = vsub.f32 %v3177_v58, %v1519_v33 }
 0xdff   : > { %v1527_v35 = vmax.f32 %v1523_v34, 0.0 }
 0xe01   : > { %v1531_v36 = vsel %vm618_vm4, %v1527_v35, 0.0 }
 0xe02   : > { %1532 = vadd.xlane.f32.xlu1 %v1531_v36 }
 0xe69   : > { %v1496_v37 = vpop.xlane.xlu0 %1495 }
 0xe6a   : > { %vm1504_vm9 = vcmp.ge.f32.partialorder %v1496_v37, 1.0 }
 0xe6b   : > { %v1508_v38 = vsel %vm1504_vm9, %v1480_v10, %v1468_v5  ;;  %v1512_v39 = vsel %vm1504_vm9, %v1472_v6, %v1480_v10 }
 0xe6c   : > { %v1516_v40 = vadd.f32 %v1512_v39, %v1508_v38 }
 0xe6d   : > { %v1499_v41 = vpop.xlane.xlu1 %1498 }
 0xe6e   : > { %v1520_v42 = vmul.f32 0.5, %v1516_v40  ;;  %vm1505_vm10 = vcmp.ge.f32.partialorder %v1499_v41, 1.0 }
 0xe6f   : > { %v1509_v43 = vsel %vm1505_vm10, %v1481_v16, %v1469_v11  ;;  %v1513_v44 = vsel %vm1505_vm10, %v1473_v12, %v1481_v16 }
 0xe70   : > { %v1517_v45 = vadd.f32 %v1513_v44, %v1509_v43  ;;  %v1524_v46 = vsub.f32 %v3181_v63, %v1520_v42 }
 0xe71   : > { %v1502_v47 = vpop.xlane.xlu0 %1501 }
 0xe72   : > { %v1521_v48 = vmul.f32 0.5, %v1517_v45  ;;  %vm1506_vm11 = vcmp.ge.f32.partialorder %v1502_v47, 1.0  ;;  %v1528_v49 = vmax.f32 %v1524_v46, 0.0 }
 0xe73   : > { %v1510_v50 = vsel %vm1506_vm11, %v1482_v23, %v1470_v18  ;;  %v1514_v51 = vsel %vm1506_vm11, %v1474_v19, %v1482_v23 }
 0xe74   : > { %v1518_v52 = vadd.f32 %v1514_v51, %v1510_v50  ;;  %v1534_v53 = vsel %vm618_vm4, %v1528_v49, 0.0  ;;  %v1525_v54 = vsub.f32 %v3184_v3, %v1521_v48 }
 0xe75   : > { %1535 = vadd.xlane.f32.xlu0 %v1534_v53 }
 0xe76   : > { %v1522_v55 = vmul.f32 0.5, %v1518_v52  ;;  %v1529_v56 = vmax.f32 %v1525_v54, 0.0 }
 0xe78   : > { %v1537_v57 = vsel %vm618_vm4, %v1529_v56, 0.0  ;;  %v1526_v59 = vsub.f32 %v3188_v8, %v1522_v55 }
 0xe79   : > { %1538 = vadd.xlane.f32.xlu1 %v1537_v57 }
 0xe7a   : > { %v1530_v60 = vmax.f32 %v1526_v59, 0.0 }
 0xe7c   : > { %v1540_v61 = vsel %vm618_vm4, %v1530_v60, 0.0 }
 0xe7d   : > { %1541 = vadd.xlane.f32.xlu0 %v1540_v61 }
 0xe8f   : > { %v1533_v62 = vpop.xlane.xlu1 %1532 }
 0xe90   : > { %vm1543_vm12 = vcmp.ge.f32.partialorder %v1533_v62, 1.0 }
 0xe91   : > { %v1547_v1 = vsel %vm1543_vm12, %v1519_v33, %v1507_v30  ;;  %v1551_v2 = vsel %vm1543_vm12, %v1511_v31, %v1519_v33 }
 0xe92   : > { %v1555_v4 = vadd.f32 %v1551_v2, %v1547_v1 }
 0xe94   : > { %v1559_v5 = vmul.f32 0.5, %v1555_v4 }
 0xe96   : > { %v1563_v6 = vsub.f32 %v3177_v58, %v1559_v5 }
 0xe98   : > { %v1567_v7 = vmax.f32 %v1563_v6, 0.0 }
 0xe9a   : > { %v1571_v9 = vsel %vm618_vm4, %v1567_v7, 0.0 }
 0xe9b   : > { %1572 = vadd.xlane.f32.xlu1 %v1571_v9 }
 0xf02   : > { %v1536_v10 = vpop.xlane.xlu0 %1535 }
 0xf03   : > { %vm1544_vm13 = vcmp.ge.f32.partialorder %v1536_v10, 1.0 }
 0xf04   : > { %v1548_v11 = vsel %vm1544_vm13, %v1520_v42, %v1508_v38  ;;  %v1552_v12 = vsel %vm1544_vm13, %v1512_v39, %v1520_v42 }
 0xf05   : > { %v1556_v13 = vadd.f32 %v1552_v12, %v1548_v11 }
 0xf06   : > { %v1539_v14 = vpop.xlane.xlu1 %1538 }
 0xf07   : > { %v1560_v15 = vmul.f32 0.5, %v1556_v13  ;;  %vm1545_vm14 = vcmp.ge.f32.partialorder %v1539_v14, 1.0 }
 0xf08   : > { %v1549_v16 = vsel %vm1545_vm14, %v1521_v48, %v1509_v43  ;;  %v1553_v17 = vsel %vm1545_vm14, %v1513_v44, %v1521_v48 }
 0xf09   : > { %v1557_v18 = vadd.f32 %v1553_v17, %v1549_v16  ;;  %v1564_v19 = vsub.f32 %v3181_v63, %v1560_v15 }
 0xf0a   : > { %v1542_v20 = vpop.xlane.xlu0 %1541 }
 0xf0b   : > { %v1561_v21 = vmul.f32 0.5, %v1557_v18  ;;  %vm1546_vm15 = vcmp.ge.f32.partialorder %v1542_v20, 1.0  ;;  %v1568_v22 = vmax.f32 %v1564_v19, 0.0 }
 0xf0c   : > { %v1550_v23 = vsel %vm1546_vm15, %v1522_v55, %v1510_v50  ;;  %v1554_v24 = vsel %vm1546_vm15, %v1514_v51, %v1522_v55  ;;  %vm1727_vm15 = vcmask 125952  }
 0xf0d   : > { %v1558_v25 = vadd.f32 %v1554_v24, %v1550_v23  ;;  %v1574_v26 = vsel %vm618_vm4, %v1568_v22, 0.0  ;;  %v1565_v27 = vsub.f32 %v3184_v3, %v1561_v21 }
 0xf0e   : > { %1575 = vadd.xlane.f32.xlu0 %v1574_v26 }
 0xf0f   : > { %v1562_v28 = vmul.f32 0.5, %v1558_v25  ;;  %v1569_v29 = vmax.f32 %v1565_v27, 0.0 }
 0xf11   : > { %v1577_v30 = vsel %vm618_vm4, %v1569_v29, 0.0  ;;  %v1566_v31 = vsub.f32 %v3188_v8, %v1562_v28 }
 0xf12   : > { %1578 = vadd.xlane.f32.xlu1 %v1577_v30 }
 0xf13   : > { %v1570_v32 = vmax.f32 %v1566_v31, 0.0 }
 0xf15   : > { %v1580_v33 = vsel %vm618_vm4, %v1570_v32, 0.0 }
 0xf16   : > { %1581 = vadd.xlane.f32.xlu0 %v1580_v33 }
 0xf28   : > { %v1573_v34 = vpop.xlane.xlu1 %1572 }
 0xf29   : > { %vm1583_vm1 = vcmp.ge.f32.partialorder %v1573_v34, 1.0 }
 0xf2a   : > { %v1587_v35 = vsel %vm1583_vm1, %v1559_v5, %v1547_v1  ;;  %v1591_v36 = vsel %vm1583_vm1, %v1551_v2, %v1559_v5 }
 0xf2b   : > { %v1595_v37 = vadd.f32 %v1591_v36, %v1587_v35 }
 0xf2d   : > { %v1599_v38 = vmul.f32 0.5, %v1595_v37 }
 0xf2f   : > { %vm1603_vm2 = vcmp.ge.f32.partialorder %v3177_v58, %v1599_v38 }
 0xf30   : > { %v2194_v39 = vsel %vm1603_vm2, 1.0, %v2773_v0 }
 0xf31   : > { %v1615_v40 = vsel %vm618_vm4, %v2194_v39, 0.0  ;;  %v1631_v61 = vmul.f32 %v2194_v39, %v3177_v58 }
 0xf32   : > { %1616 = vadd.xlane.f32.xlu1 %v1615_v40 }
 0xf33   : > { %v1635_v1 = vsel %vm618_vm4, %v1631_v61, 0.0 }
 0xf9b   : > { %v1576_v41 = vpop.xlane.xlu0 %1575 }
 0xf9c   : > { %vm1584_vm5 = vcmp.ge.f32.partialorder %v1576_v41, 1.0 }
 0xf9d   : > { %v1588_v42 = vsel %vm1584_vm5, %v1560_v15, %v1548_v11  ;;  %v1592_v43 = vsel %vm1584_vm5, %v1552_v12, %v1560_v15  ;;  %v3365_v11 = vld [vmem:[#allocation2] sm:$0xff] }
 0xf9e   : > { %v1596_v44 = vadd.f32 %v1592_v43, %v1588_v42 }
 0xf9f   : > { %v1579_v45 = vpop.xlane.xlu1 %1578 }
 0xfa0   : > { %v1600_v46 = vmul.f32 0.5, %v1596_v44  ;;  %vm1585_vm6 = vcmp.ge.f32.partialorder %v1579_v45, 1.0 }
 0xfa1   : > { %v1589_v47 = vsel %vm1585_vm6, %v1561_v21, %v1549_v16  ;;  %v1593_v48 = vsel %vm1585_vm6, %v1553_v17, %v1561_v21 }
 0xfa2   : > { %v1597_v49 = vadd.f32 %v1593_v48, %v1589_v47  ;;  %vm1604_vm7 = vcmp.ge.f32.partialorder %v3181_v63, %v1600_v46 }
 0xfa3   : > { %v1582_v50 = vpop.xlane.xlu0 %1581  ;;  %v2195_v51 = vsel %vm1604_vm7, 1.0, %v2773_v0 }
 0xfa4   : > { %v1601_v52 = vmul.f32 0.5, %v1597_v49  ;;  %vm1586_vm8 = vcmp.ge.f32.partialorder %v1582_v50, 1.0  ;;  %v1618_v53 = vsel %vm618_vm4, %v2195_v51, 0.0  ;;  %v1632_v5 = vmul.f32 %v2195_v51, %v3181_v63 }
 0xfa5   : > { %v1590_v54 = vsel %vm1586_vm8, %v1562_v28, %v1550_v23  ;;  %v1594_v55 = vsel %vm1586_vm8, %v1554_v24, %v1562_v28  ;;  %1619 = vadd.xlane.f32.xlu0 %v1618_v53 }
 0xfa6   : > { %v1598_v56 = vadd.f32 %v1594_v55, %v1590_v54  ;;  %vm1605_vm9 = vcmp.ge.f32.partialorder %v3184_v3, %v1601_v52  ;;  %v1638_v9 = vsel %vm618_vm4, %v1632_v5, 0.0 }
 0xfa7   : > { %v2196_v57 = vsel %vm1605_vm9, 1.0, %v2773_v0 }
 0xfa8   : > { %v1602_v59 = vmul.f32 0.5, %v1598_v56  ;;  %v1621_v60 = vsel %vm618_vm4, %v2196_v57, 0.0  ;;  %v1633_v4 = vmul.f32 %v2196_v57, %v3184_v3 }
 0xfa9   : > { %1622 = vadd.xlane.f32.xlu1 %v1621_v60 }
 0xfaa   : > { %vm1606_vm10 = vcmp.ge.f32.partialorder %v3188_v8, %v1602_v59  ;;  %v1641_v7 = vsel %vm618_vm4, %v1633_v4, 0.0 }
 0xfab   : > { %v2197_v62 = vsel %vm1606_vm10, 1.0, %v2773_v0 }
 0xfac   : > { %v1624_v2 = vsel %vm618_vm4, %v2197_v62, 0.0  ;;  %v1634_v6 = vmul.f32 %v2197_v62, %v3188_v8 }
 0xfad   : > { %1636 = vadd.xlane.f32.xlu1 %v1635_v1  ;;  %1625 = vadd.xlane.f32.xlu0 %v1624_v2 }
 0xfae   : > { %v1644_v10 = vsel %vm618_vm4, %v1634_v6, 0.0 }
 0xfb1   : > { %1642 = vadd.xlane.f32.xlu1 %v1641_v7  ;;  %1639 = vadd.xlane.f32.xlu0 %v1638_v9 }
 0xfb5   : > { %1645 = vadd.xlane.f32.xlu0 %v1644_v10 }
 0xfbf   : > { %v1617_v12 = vpop.xlane.xlu1 %1616 }
 0xfc0   : > { %v1627_v13 = vmax.f32 %v1617_v12, 1.0 }
 0xfc2   : > { %1734 = vrot.lane.b32.xlu1 %v3365_v11, %s2780_s6  ;;  %2445 = vrcp.f32 %v1627_v13  ;;  %s2639_s6 = scalar_lea.vmem %s2638_s15, 512 }
 0xfc3   : > { %p2641_p7 = scmp.lt.s32.totalorder %s2639_s6, %s2633_s30 }
 0xfc5   : > { %p2642_p5 = por %p2641_p7, %p2640_p0 }
 0xfc7   : > { %p2643_p11 = pnand %p2642_p5, %p2636_p9 }
 0xfcc   : > { %v2446_v22 = vpop.eup %2445 }
0x1032   : > { %v1620_v14 = vpop.xlane.xlu0 %1619 }
0x1033   : > { %v1628_v15 = vmax.f32 %v1620_v14, 1.0 }
0x1035   : > { %2447 = vrcp.f32 %v1628_v15 }
0x1036   : > { %v1623_v16 = vpop.xlane.xlu1 %1622 }
0x1037   : > { %v1629_v17 = vmax.f32 %v1623_v16, 1.0 }
0x1039   : > { %2449 = vrcp.f32 %v1629_v17 }
0x103a   : > { %v1637_v18 = vpop.xlane.xlu1 %1636  ;;  %v1626_v19 = vpop.xlane.xlu0 %1625 }
0x103b   : > { %v2198_v20 = vadd.f32 -1.0, %v1637_v18  ;;  %v1630_v21 = vmax.f32 %v1626_v19, 1.0 }
0x103d   : > { %v1652_v23 = vmul.f32 %v2446_v22, %v2198_v20  ;;  %2451 = vrcp.f32 %v1630_v21 }
0x103e   : > { %v1643_v24 = vpop.xlane.xlu1 %1642  ;;  %v1640_v25 = vpop.xlane.xlu0 %1639 }
0x103f   : > { %v2448_v26 = vpop.eup %2447  ;;  %v2199_v27 = vadd.f32 -1.0, %v1640_v25  ;;  %vm1659_vm11 = vcmp.ge.f32.partialorder %v3177_v58, %v1652_v23  ;;  %v2200_v32 = vadd.f32 -1.0, %v1643_v24 }
0x1040   : > { %v2202_v28 = vsel %vm1659_vm11, 1.0, %v2773_v0 }
0x1041   : > { %v1654_v29 = vmul.f32 %v2448_v26, %v2199_v27  ;;  %v1671_v30 = vsel %vm618_vm4, %v2202_v28, 0.0  ;;  %v1687_v31 = vmul.f32 %v2202_v28, %v3177_v58 }
0x1042   : > { %1672 = vadd.xlane.f32.xlu1 %v1671_v30  ;;  %v1735_v33 = vpop.permute.xlu1 %1734  ;;  %v1646_v35 = vpop.xlane.xlu0 %1645 }
0x1043   : > { %v2450_v34 = vpop.eup %2449  ;;  %2286 = vmatpush3.bf16.msra.mxu0 %v1735_v33  ;;  %vm1660_vm12 = vcmp.ge.f32.partialorder %v3181_v63, %v1654_v29  ;;  %v1691_v38 = vsel %vm618_vm4, %v1687_v31, 0.0  ;;  %v2201_v41 = vadd.f32 -1.0, %v1646_v35 }
0x1044   : > { %v1656_v36 = vmul.f32 %v2450_v34, %v2200_v32  ;;  %v2203_v37 = vsel %vm1660_vm12, 1.0, %v2773_v0  ;;  %2297 = vmatprep.subr.bf16.mxu0 %v2773_v0 }
0x1045   : > { %v1674_v39 = vsel %vm618_vm4, %v2203_v37, 0.0  ;;  %v1688_v40 = vmul.f32 %v2203_v37, %v3181_v63 }
0x1046   : > { %1692 = vadd.xlane.f32.xlu1 %v1691_v38  ;;  %1675 = vadd.xlane.f32.xlu0 %v1674_v39  ;;  %vm1661_vm13 = vcmp.ge.f32.partialorder %v3184_v3, %v1656_v36 }
0x1047   : > { %v2452_v42 = vpop.eup %2451  ;;  %v2204_v43 = vsel %vm1661_vm13, 1.0, %v2773_v0  ;;  %v1694_v46 = vsel %vm618_vm4, %v1688_v40, 0.0 }
0x1048   : > { %v1658_v44 = vmul.f32 %v2452_v42, %v2201_v41  ;;  %v1677_v45 = vsel %vm618_vm4, %v2204_v43, 0.0  ;;  %v1689_v47 = vmul.f32 %v2204_v43, %v3184_v3 }
0x104a   : > { %1678 = vadd.xlane.f32.xlu1 %v1677_v45  ;;  %1695 = vadd.xlane.f32.xlu0 %v1694_v46  ;;  %vm1662_vm14 = vcmp.ge.f32.partialorder %v3188_v8, %v1658_v44  ;;  %v1697_v50 = vsel %vm618_vm4, %v1689_v47, 0.0 }
0x104b   : > { %v2205_v48 = vsel %vm1662_vm14, 1.0, %v2773_v0 }
0x104c   : > { %v1680_v49 = vsel %vm618_vm4, %v2205_v48, 0.0  ;;  %v1690_v51 = vmul.f32 %v2205_v48, %v3188_v8 }
0x104e   : > { %1698 = vadd.xlane.f32.xlu1 %v1697_v50  ;;  %1681 = vadd.xlane.f32.xlu0 %v1680_v49  ;;  %v1700_v52 = vsel %vm618_vm4, %v1690_v51, 0.0 }
0x1052   : > { %1701 = vadd.xlane.f32.xlu0 %v1700_v52 }
0x105f   : > { %1837 = vrot.lane.b32.xlu1 %v3365_v11, %s2781_s16 }
0x1063   : > { %1891 = vrot.lane.b32.xlu1 %v3365_v11, %s2782_s21 }
0x1068   : > { %1783 = vrot.lane.b32.xlu0 %v3365_v11, %s2783_s20 }
0x10cf   : > { %v1673_v53 = vpop.xlane.xlu1 %1672 }
0x10d0   : > { %v1683_v54 = vmax.f32 %v1673_v53, 1.0 }
0x10d2   : > { %2453 = vrcp.f32 %v1683_v54 }
0x10d3   : > { %v1693_v55 = vpop.xlane.xlu1 %1692  ;;  %v1676_v56 = vpop.xlane.xlu0 %1675 }
0x10d4   : > { %v1684_v57 = vmax.f32 %v1676_v56, 1.0  ;;  %v2206_v62 = vadd.f32 -1.0, %v1693_v55 }
0x10d6   : > { %2455 = vrcp.f32 %v1684_v57 }
0x10d7   : > { %v1679_v59 = vpop.xlane.xlu1 %1678  ;;  %v1696_v60 = vpop.xlane.xlu0 %1695 }
0x10d8   : > { %v1685_v61 = vmax.f32 %v1679_v59, 1.0  ;;  %v2207_v9 = vadd.f32 -1.0, %v1696_v60 }
0x10da   : > { %2457 = vrcp.f32 %v1685_v61 }
0x10db   : > { %v1682_v1 = vpop.xlane.xlu0 %1681  ;;  %v1699_v6 = vpop.xlane.xlu1 %1698 }
0x10dc   : > { %v2454_v2 = vpop.eup %2453  ;;  %v1686_v4 = vmax.f32 %v1682_v1, 1.0  ;;  %v2208_v16 = vadd.f32 -1.0, %v1699_v6 }
0x10dd   : > { %v1708_v5 = vmul.f32 %v2454_v2, %v2206_v62 }
0x10de   : > { %2459 = vrcp.f32 %v1686_v4 }
0x10df   : > { %v1715_v7 = vsub.f32 %v3177_v58, %v1708_v5  ;;  %v1702_v10 = vpop.xlane.xlu0 %1701  ;;  %v1838_v17 = vpop.permute.xlu1 %1837 }
0x10e0   : > { %v2456_v11 = vpop.eup %2455  ;;  %v2209_v22 = vadd.f32 -1.0, %v1702_v10 }
0x10e1   : > { %v1719_v12 = vmax.f32 %v1715_v7, 0.0  ;;  %v1710_v13 = vmul.f32 %v2456_v11, %v2207_v9 }
0x10e3   : > { %v1723_v14 = vpack.c.bf16 %v1719_v12, %v1719_v12  ;;  %v1716_v15 = vsub.f32 %v3181_v63, %v1710_v13  ;;  %v1784_v18 = vpop.permute.xlu0 %1783  ;;  %v1892_v26 = vpop.permute.xlu1 %1891 }
0x10e4   : > { %v2458_v19 = vpop.eup %2457  ;;  %2292 = vmatpush3.bf16.msra.mxu1 %v1784_v18 }
0x10e5   : > { %1728 = vst.msk [vmem:[%s3395_s4] sm:$0xf] %vm1727_vm15, %v1723_v14  ;;  %v1720_v58 = vmax.f32 %v1716_v15, 0.0  ;;  %v1712_v20 = vmul.f32 %v2458_v19, %v2208_v16  ;;  %2288 = vmatmul.mubr.msk.bf16.vlgmr.msra.gmra.mrb[12].mxu0 %vm618_vm4, %v1723_v14  ;;  %2303 = vmatprep.subr.bf16.mxu1 %v2773_v0 }
0x10e6   : > { %2298 = vmatpush3.bf16.msra.mxu0 %v1838_v17  ;;  %2299 = vmatprep.mubr.msk.bf16.mxu0 %vm2774_vm0, %v2773_v0 }
0x10e7   : > { %v1724_v63 = vpack.c.bf16 %v1720_v58, %v1720_v58  ;;  %v1717_v21 = vsub.f32 %v3184_v3, %v1712_v20 }
0x10e8   : > { %v2460_v23 = vpop.eup %2459 }
0x10e9   : > { %1729 = vst.msk [vmem:[%s3395_s4 + $0x4] sm:$0xf] %vm1727_vm15, %v1724_v63  ;;  %v1721_v24 = vmax.f32 %v1717_v21, 0.0  ;;  %v1714_v25 = vmul.f32 %v2460_v23, %v2209_v22  ;;  %2294 = vmatmul.mubr.msk.bf16.vlgmr.msra.gmra.mrb[12].mxu1 %vm618_vm4, %v1724_v63 }
0x10ea   : > { %2304 = vmatpush3.bf16.msra.mxu1 %v1892_v26  ;;  %2305 = vmatprep.mubr.msk.bf16.mxu1 %vm2774_vm0, %v2773_v0 }
0x10eb   : > { %v1725_v27 = vpack.c.bf16 %v1721_v24, %v1721_v24  ;;  %v1718_v3 = vsub.f32 %v3188_v8, %v1714_v25 }
0x10ed   : > { %1730 = vst.msk [vmem:[%s3395_s4 + $0x8] sm:$0xf] %vm1727_vm15, %v1725_v27  ;;  %v1722_v28 = vmax.f32 %v1718_v3, 0.0  ;;  %2300 = vmatmul.mubr.msk.bf16.vlgmr.msra.gmra.mrb[16].mxu0 %vm618_vm4, %v1725_v27 }
0x10ef   : > { %v1726_v29 = vpack.c.bf16 %v1722_v28, %v1722_v28 }
0x10f1   : > { %1731 = vst.msk [vmem:[%s3395_s4 + $0xc] sm:$0xf] %vm1727_vm15, %v1726_v29  ;;  %2306 = vmatmul.mubr.msk.bf16.vlgmr.msra.gmra.mrb[16].mxu1 %vm618_vm4, %v1726_v29 }
0x11b8   : > { %v1774_v30 = vpop.f32.mrb[12].mxu0 }
0x11b9   : > { %1780 = vst.msk [vmem:[%s3418_s17] sm:$0xff] %vm571_vm3, %v1774_v30  ;;  %v2289_v0 = vpop.f32.mrb[13].mxu0 }
0x11ba   : > { %v1777_v8 = vpop.f32.mrb[14].mxu0 }
0x11bb   : > { %v2290_v31 = vpop.f32.mrb[15].mxu0 }
0x11bc   : > { %v1823_v32 = vpop.f32.mrb[12].mxu1 }
0x11bd   : > { %1830 = vrot.lane.b32.xlu0 %v1823_v32, %s2784_s3  ;;  %v2295_v33 = vpop.f32.mrb[13].mxu1 }
0x11be   : > { %v1826_v34 = vpop.f32.mrb[14].mxu1 }
0x11bf   : > { %2646 = shalt.err (!%p2643_p11)
}
0x11c0   : > { %s2647_s16 = scalar_lea.hbm %s3427_s8, 256  ;;  %s2651_s14 = scalar_lea.hbm %s3519_s7, 512 }
0x11c1   : > { %p2648_p10 = scmp.ne.s32.totalorder %s3427_s8, %s2647_s16  ;;  %p2652_p1 = scmp.lt.u32.totalorder %s3427_s8, %s3519_s7 }
0x11c2   : > { %p2653_p3 = scmp.lt.u32.totalorder %s2651_s14, %s2647_s16  ;;  %p2655_p2 = scmp.lt.u32.totalorder %s2647_s16, %s3427_s8 }
0x11c3   : > { %p2649_p12 = pnand %p2648_p10, %p3554_p13 }
0x11c4   : > { %p2654_p6 = por %p2653_p3, %p2652_p1 }
0x11c5   : > { %p2650_p8 = pneg %p2649_p12 }
0x11c6   : > { %p2656_p4 = por %p2655_p2, %p2654_p6 }
0x11c8   : > { %p2657_p9 = pnand %p2656_p4, %p2650_p8 }
0x11ca   : > { %2660 = shalt.err (!%p2657_p9)
}
0x11cb   : > { %s2786_s11 = smov 64   ;;  %s2787_s0 = smov 4   ;;  %v2296_v35 = vpop.f32.mrb[15].mxu1  ;;  %v1877_v36 = vpop.f32.mrb[16].mxu0  ;;  %vm1833_vm0 = vcmask 130112   ;;  %vm1887_vm3 = vcmask 195712  }
0x11cc   : > { %2330 = dma.vmem_to_hbm [thread:$0]  (%p3554_p13), %s3429_s18, 256, %s3427_s8, %s1949_s12, %s2786_s11, %s2786_s11, %s2787_s0   ;;  %v2301_v37 = vpop.f32.mrb[17].mxu0  ;;  %v1931_v40 = vpop.f32.mrb[16].mxu1  ;;  %vm1941_vm4 = vcmask 261312  }
0x11cd   : > { %s2788_s3 = smov 16   ;;  %v1880_v38 = vpop.f32.mrb[18].mxu0  ;;  %s2789_s30 = smov 24   ;;  %v2307_v41 = vpop.f32.mrb[17].mxu1 }
0x11ce   : > { %1884 = vrot.lane.b32.xlu1 %v1877_v36, %s2788_s3  ;;  %v2302_v39 = vpop.f32.mrb[19].mxu0  ;;  %1938 = vrot.lane.b32.xlu0 %v1931_v40, %s2789_s30  ;;  %v1934_v42 = vpop.f32.mrb[18].mxu1  ;;  %s2216_s18 = sshll.u32 %s2755_s27, 7  ;;  %s1963_s8 = sshll.u32 %s3418_s17, 4  ;;  %s3464_s8 = int_to_ptr.vmem [resolvable:$true] %s1963_s8 }
0x11cf   : > { %v2308_v43 = vpop.f32.mrb[19].mxu1  ;;  %s3555_s15 = sld [smem:[#allocation29_spill]]  ;;  %s1944_s16 = scalar_lea.sflag [#allocation6], %s3104_s2 }
0x11d0   : > { %s2661_s21 = scalar_lea.vmem %s3464_s8, 128  ;;  %s2790_s27 = smov [#allocation15]  }
0x11d1   : > { %p2662_p0 = scmp.ne.s32.totalorder %s3464_s8, %s2661_s21  ;;  %s2665_s20 = sshll.u32 %s2790_s27, 4  ;;  %s2666_s20 = int_to_ptr.vmem [resolvable:$false] %s2665_s20 }
0x11d2   : > { %s2667_s14 = scalar_lea.vmem %s2666_s20, 256  ;;  %p2668_p11 = scmp.lt.s32.totalorder %s3464_s8, %s2666_s20 }
0x11d3   : > { %p2663_p7 = pnand %p2662_p0, %p3554_p13  ;;  %p2669_p10 = scmp.lt.s32.totalorder %s2667_s14, %s2661_s21 }
0x11d5   : > { %s3462_s6 = scalar_lea.hbm %s3555_s15, %s2216_s18  ;;  %p2664_p5 = pneg %p2663_p7 }
0x11d6   : > { %p2670_p12 = por %p2669_p10, %p2668_p11 }
0x11d8   : > { %p2671_p8 = pnand %p2670_p12, %p2664_p5 }
0x122f   : > { %v1831_v44 = vpop.permute.xlu0 %1830 }
0x1230   : > { %1834 = vst.msk [vmem:[%s3418_s17] sm:$0xff] %vm1833_vm0, %v1831_v44 }
0x1240   : > { %v1885_v45 = vpop.permute.xlu1 %1884  ;;  %v1939_v46 = vpop.permute.xlu0 %1938 }
0x1241   : > { %1888 = vst.msk [vmem:[%s3418_s17] sm:$0xff] %vm1887_vm3, %v1885_v45 }
0x1242   : > { %1942 = vst.msk [vmem:[%s3418_s17] sm:$0xff] %vm1941_vm4, %v1939_v46 }
0x1243   : > { %2674 = shalt.err (!%p2671_p8)
}
0x1244   : > { %s2675_s2 = scalar_lea.hbm %s3462_s6, 128  ;;  %s2679_s13 = scalar_lea.hbm %s3555_s15, 256 }
0x1245   : > { %p2676_p1 = scmp.ne.s32.totalorder %s3462_s6, %s2675_s2  ;;  %p2680_p2 = scmp.lt.u32.totalorder %s3462_s6, %s3555_s15 }
0x1246   : > { %p2681_p4 = scmp.lt.u32.totalorder %s2679_s13, %s2675_s2  ;;  %p2683_p0 = scmp.lt.u32.totalorder %s2675_s2, %s3462_s6 }
0x1247   : > { %p2677_p3 = pnand %p2676_p1, %p3554_p13 }
0x1248   : > { %p2682_p9 = por %p2681_p4, %p2680_p2 }
0x1249   : > { %p2678_p6 = pneg %p2677_p3 }
0x124a   : > { %p2684_p7 = por %p2683_p0, %p2682_p9 }
0x124c   : > { %p2685_p5 = pnand %p2684_p7, %p2678_p6 }
0x124e   : > { %2688 = shalt.err (!%p2685_p5)
}
0x124f   : > { %2329 = dma.vmem_to_hbm [thread:$0]  (%p3554_p13), %s3464_s8, 128, %s3462_s6, %s1944_s16  }
0x1250 PF: > { %s1992_s3 = sand.u32 1, %s2743_s24   ;;  %p3556_p11 = scmp.ne.s32.totalorder %s3541_s10, 0 }
0x1251   : > { %p3557_p10 = scmp.ge.s32.totalorder %s2763_s29, 2  ;;  %s1993_s30 = scalar_lea.sflag [#allocation6], %s1992_s3 }
0x1253   : > { %p2354_p12 = pnand %p3557_p10, %p3556_p11 }
0x1255   : > { %2734 = dma.done.wait (!%p2354_p12), %s1993_s30, 128  }
0x1256   : > { %2736 = vsyncadd (!%p2354_p12), %s1993_s30, 4294967168  ;;  %s2002_s18 = scalar_lea.sflag [#allocation17], %s1992_s3 }
0x1257   : > { %2738 = dma.done.wait (!%p2354_p12), %s2002_s18, 256  }
0x1258   : > { %2740 = vsyncadd (!%p2354_p12), %s2002_s18, 4294967040  ;;  %s32_s29 = sadd.s32 1, %s2763_s29   ;;  %s3558_s24 = smov %s2747_s25 }
0x1259   : > { %p29_p8 = scmp.ge.s32.totalorder %s32_s29, 4   ;;  %s3559_s25 = smov %s2751_s26 }
0x125a   : > { %s3560_s26 = smov %s3009_s9  ;;  %s3561_s27 = smov %s2759_s28 }
0x125b   : > { %s3562_s28 = smov %s3564_s19  ;;  %31 = sbr.rel (!%p29_p8) target bundleno = 18 (0x12), region = 142 }
0x1262   :  { %2007 = vsyncpa [#allocation5], 1 }
0x1263   :  { %2009 = vsyncpa [#allocation5 + $0x1], 1 }
0x1264   :  { %2010 = vsyncpa [#allocation8], 1 }
0x1265   :  { %2012 = vsyncpa [#allocation8 + $0x1], 1 }
0x1266   :  { %2013 = vsyncpa [#allocation11], 1 }
0x1267   :  { %2014 = vsyncpa [#allocation14], 1 }
0x1268   :  { %2015 = vsyncpa [#allocation6], 1 }
0x1269   :  { %2017 = vsyncpa [#allocation6 + $0x1], 1 }
0x126a   :  { %2018 = vsyncpa [#allocation17], 1 }
0x126b   :  { %2020 = vsyncpa [#allocation17 + $0x1], 1 }

</bundles_post_ra>
